<compile_context>
chip_gen: v6e
topology: v6e:2x2x1
jax: 0.10.0
libtpu: 0.0.40
codegen_flags: <defaults>
</compile_context>

<pallas_src>
import math

import jax
import jax.numpy as jnp
from jax import lax
from jax.experimental import pallas as pl
from jax.experimental.pallas import tpu as pltpu


_MT_CONV = 256   # row tile for the conv kernels  (rows = pooled output pixels)
_MT_FC = 256     # row tile for the fc-tail kernel (rows = batch samples)
_CPARAMS = pltpu.CompilerParams(dimension_semantics=("parallel",))


def _sigmoid(z):
    # Numerically stable sigmoid that maps onto the EUP tanh unit (no inf
    # intermediate for large |z|).
    return 0.5 * (jnp.tanh(0.5 * z) + 1.0)


# ----------------------------------------------------------------------------
# Pallas kernels
# ----------------------------------------------------------------------------
def _conv_sig_pool_kernel(a0_ref, a1_ref, a2_ref, a3_ref, w_ref, b_ref, o_ref):
    """Fused conv (matmul over im2col) + bias + sigmoid + 2x2 average pool.

    a0..a3 hold the im2col patches of the four conv-output pixels feeding one
    pooled output pixel, so pooling is just the mean of four epilogues.
    """
    w = w_ref[...]
    b = b_ref[...]
    acc = _sigmoid(jnp.dot(a0_ref[...], w, preferred_element_type=jnp.float32) + b)
    acc = acc + _sigmoid(jnp.dot(a1_ref[...], w, preferred_element_type=jnp.float32) + b)
    acc = acc + _sigmoid(jnp.dot(a2_ref[...], w, preferred_element_type=jnp.float32) + b)
    acc = acc + _sigmoid(jnp.dot(a3_ref[...], w, preferred_element_type=jnp.float32) + b)
    o_ref[...] = (0.25 * acc).astype(o_ref.dtype)


def _fc_tail_kernel(f_ref, w1_ref, b1_ref, w2_ref, b2_ref, w3_ref, b3_ref, o_ref):
    """Fused fc1+sigmoid -> fc2+sigmoid -> fc3 -> softmax (single launch).

    Hidden dims are zero-padded to 128 lanes: padded lanes compute
    sigmoid(0)=0.5, but the matching weight rows of the next layer are zero,
    so they contribute nothing.
    """
    h = _sigmoid(jnp.dot(f_ref[...], w1_ref[...],
                         preferred_element_type=jnp.float32) + b1_ref[...])
    h = _sigmoid(jnp.dot(h.astype(jnp.bfloat16), w2_ref[...],
                         preferred_element_type=jnp.float32) + b2_ref[...])
    z = jnp.dot(h.astype(jnp.bfloat16), w3_ref[...],
                preferred_element_type=jnp.float32) + b3_ref[...]
    m = jnp.max(z, axis=-1, keepdims=True)
    e = jnp.exp(z - m)
    o_ref[...] = e * pl.reciprocal(jnp.sum(e, axis=-1, keepdims=True), approx=True)


# ----------------------------------------------------------------------------
# pallas_call wrappers (row-tiled, weights resident with constant index_map)
# ----------------------------------------------------------------------------
def _row_tiles(M, tile):
    if M <= tile:
        return M, 1
    return tile, pl.cdiv(M, tile)


def _conv_sigmoid_pool(a4, w, b):
    M, K = a4[0].shape
    Co = w.shape[1]
    tm, steps = _row_tiles(M, _MT_CONV)
    row_spec = pl.BlockSpec((tm, K), lambda i: (i, 0))
    w_spec = pl.BlockSpec(w.shape, lambda i: (0, 0))
    b_spec = pl.BlockSpec(b.shape, lambda i: (0, 0))
    return pl.pallas_call(
        _conv_sig_pool_kernel,
        out_shape=jax.ShapeDtypeStruct((M, Co), jnp.bfloat16),
        grid=(steps,),
        in_specs=[row_spec] * 4 + [w_spec, b_spec],
        out_specs=pl.BlockSpec((tm, Co), lambda i: (i, 0)),
        compiler_params=_CPARAMS,
    )(*a4, w, b)


def _fc_tail(f, w1, b1, w2, b2, w3, b3):
    N, K = f.shape
    Nc = w3.shape[1]
    tn, steps = _row_tiles(N, _MT_FC)
    const = lambda a: pl.BlockSpec(a.shape, lambda i: (0, 0))
    return pl.pallas_call(
        _fc_tail_kernel,
        out_shape=jax.ShapeDtypeStruct((N, Nc), jnp.float32),
        grid=(steps,),
        in_specs=[pl.BlockSpec((tn, K), lambda i: (i, 0)),
                  const(w1), const(b1), const(w2), const(b2), const(w3), const(b3)],
        out_specs=pl.BlockSpec((tn, Nc), lambda i: (i, 0)),
        compiler_params=_CPARAMS,
    )(f, w1, b1, w2, b2, w3, b3)


# ----------------------------------------------------------------------------
# Glue: pooled im2col (layout transform only; all FLOPs run in the kernels)
# ----------------------------------------------------------------------------
def _im2col_pooled(x_nhwc, k, pad):
    """Build the 4 pool-tap im2col matrices (bf16).

    Returns ([A00, A01, A10, A11], PH, PW); each A is (N*PH*PW, C*k*k) with
    columns ordered (ci, kh, kw) to match torch's weight.reshape(Co, Ci*k*k);
    row (b, oy, ox) of A(dy, dx) is the patch of conv-output pixel
    (2*oy + dy, 2*ox + dx).
    """
    N, H, W, C = x_nhwc.shape
    xp = jnp.pad(x_nhwc, ((0, 0), (pad, pad), (pad, pad), (0, 0))).astype(jnp.bfloat16)
    OH = H + 2 * pad - k + 1
    OW = W + 2 * pad - k + 1
    PH, PW = OH // 2, OW // 2
    mats = []
    for dy in (0, 1):
        for dx in (0, 1):
            taps = [xp[:, dy + kh: dy + kh + 2 * PH: 2,
                       dx + kw: dx + kw + 2 * PW: 2, :]
                    for kh in range(k) for kw in range(k)]      # each (N, PH, PW, C)
            patch = jnp.stack(taps, axis=4)                      # (N, PH, PW, C, k*k)
            mats.append(patch.reshape(N * PH * PW, C * k * k))
    return mats, PH, PW


# ----------------------------------------------------------------------------
# Parameters (PyTorch-like uniform(-1/sqrt(fan_in), 1/sqrt(fan_in)))
# ----------------------------------------------------------------------------
def init_params(key):
    def uni(k, shape, fan_in):
        bound = 1.0 / math.sqrt(fan_in)
        return jax.random.uniform(k, shape, jnp.float32, -bound, bound)

    ks = jax.random.split(key, 10)
    w1 = uni(ks[0], (6, 1, 5, 5), 25)
    b1 = uni(ks[1], (6,), 25)
    w2 = uni(ks[2], (16, 6, 5, 5), 150)
    b2 = uni(ks[3], (16,), 150)
    wf1 = uni(ks[4], (120, 400), 400)
    bf1 = uni(ks[5], (120,), 400)
    wf2 = uni(ks[6], (84, 120), 120)
    bf2 = uni(ks[7], (84,), 120)
    wf3 = uni(ks[8], (10, 84), 84)
    bf3 = uni(ks[9], (10,), 84)

    # round weights through bf16 once so the reference and the kernels use
    # identical weight values (activation precision is the only difference).
    rnd = lambda a: a.astype(jnp.bfloat16).astype(jnp.float32)
    w1, w2, wf1, wf2, wf3 = map(rnd, (w1, w2, wf1, wf2, wf3))

    # fc1 expects torch's NCHW flatten order (c*25 + y*5 + x); our activations
    # are flattened channels-last ((y*5 + x)*16 + c) -> permute fc1 input rows.
    j = jnp.arange(400)
    perm = (j % 16) * 25 + (j // 16)

    wf1_p = jnp.zeros((400, 128), jnp.float32).at[:, :120].set(wf1.T[perm, :])
    bf1_p = jnp.zeros((1, 128), jnp.float32).at[0, :120].set(bf1)
    wf2_p = jnp.zeros((128, 128), jnp.float32).at[:120, :84].set(wf2.T)
    bf2_p = jnp.zeros((1, 128), jnp.float32).at[0, :84].set(bf2)
    wf3_p = jnp.zeros((128, 10), jnp.float32).at[:84, :].set(wf3.T)

    params = {
        "w1": w1.reshape(6, 25).T.astype(jnp.bfloat16),     # (K=25,  Co=6)
        "b1": b1.reshape(1, 6),
        "w2": w2.reshape(16, 150).T.astype(jnp.bfloat16),   # (K=150, Co=16)
        "b2": b2.reshape(1, 16),
        "wf1": wf1_p.astype(jnp.bfloat16), "bf1": bf1_p,
        "wf2": wf2_p.astype(jnp.bfloat16), "bf2": bf2_p,
        "wf3": wf3_p.astype(jnp.bfloat16), "bf3": bf3.reshape(1, 10),
    }
    raw = {"w1": w1, "b1": b1, "w2": w2, "b2": b2,
           "wf1": wf1, "bf1": bf1, "wf2": wf2, "bf2": bf2,
           "wf3": wf3, "bf3": bf3}
    return params, raw


# ----------------------------------------------------------------------------
# Forward pass (equivalent to LeNet.forward(x, batch_norm=False))
# ----------------------------------------------------------------------------
def lenet_forward(params, x):
    # x: (N, 1, 28, 28) float32, NCHW (PyTorch convention)
    N = x.shape[0]
    x_nhwc = x.reshape(N, 28, 28, 1)   # Ci=1 -> NCHW->NHWC is a free reshape

    # conv1 (k=5, pad=2) + sigmoid + avgpool 2x2  -> (N*14*14, 6) channels-last
    a1, PH1, PW1 = _im2col_pooled(x_nhwc, k=5, pad=2)
    p1 = _conv_sigmoid_pool(a1, params["w1"], params["b1"])
    p1 = p1.reshape(N, PH1, PW1, 6)

    # conv2 (k=5, pad=0) + sigmoid + avgpool 2x2  -> (N*5*5, 16) channels-last
    a2, PH2, PW2 = _im2col_pooled(p1, k=5, pad=0)
    p2 = _conv_sigmoid_pool(a2, params["w2"], params["b2"])

    # flatten channels-last (fc1 weight rows were permuted for torch parity)
    f = p2.reshape(N, PH2 * PW2 * 16)

    # TODO(synk): BatchNorm layers (bn1..bn4) are only used when batch_norm=True;
    # the default forward path (batch_norm=False) never touches them.
    return _fc_tail(f, params["wf1"], params["bf1"], params["wf2"], params["bf2"],
                    params["wf3"], params["bf3"])


# ----------------------------------------------------------------------------
# Pure-XLA f32 reference (torch-equivalent) for the parity check in __main__
# ----------------------------------------------------------------------------
def lenet_reference(raw, x):
    N = x.shape[0]
    dn = ("NCHW", "OIHW", "NCHW")
    y = lax.conv_general_dilated(x, raw["w1"], (1, 1), ((2, 2), (2, 2)),
                                 dimension_numbers=dn)
    y = jax.nn.sigmoid(y + raw["b1"][None, :, None, None])
    y = lax.reduce_window(y, 0.0, lax.add, (1, 1, 2, 2), (1, 1, 2, 2), "VALID") * 0.25
    y = lax.conv_general_dilated(y, raw["w2"], (1, 1), ((0, 0), (0, 0)),
                                 dimension_numbers=dn)
    y = jax.nn.sigmoid(y + raw["b2"][None, :, None, None])
    y = lax.reduce_window(y, 0.0, lax.add, (1, 1, 2, 2), (1, 1, 2, 2), "VALID") * 0.25
    f = y.reshape(N, 400)                       # torch NCHW flatten
    h = jax.nn.sigmoid(f @ raw["wf1"].T + raw["bf1"])
    h = jax.nn.sigmoid(h @ raw["wf2"].T + raw["bf2"])
    return jax.nn.softmax(h @ raw["wf3"].T + raw["bf3"], axis=-1)


if __name__ == "__main__":
    key = jax.random.PRNGKey(0)
    pkey, xkey = jax.random.split(key)
    params, raw = init_params(pkey)
    x = jax.random.normal(xkey, (2, 1, 28, 28), dtype=jnp.float32)

    out = jax.jit(lenet_forward)(params, x)
    out = jax.block_until_ready(out)

    assert out.shape == (2, 10)
    assert bool(jnp.all(jnp.isfinite(out)))
    # softmax rows sum to ~1 (approx reciprocal in the epilogue -> loose tol)
    assert bool(jnp.allclose(jnp.sum(out, axis=-1), 1.0, atol=5e-3))
    # end-to-end parity vs pure-XLA f32 reference (bf16 activations -> loose tol)
    ref = jax.jit(lenet_reference)(raw, x)
    assert bool(jnp.allclose(out, ref, atol=3e-2))
    print("KERNEL_OK")
</pallas_src>

<mosaic_0001>
module attributes {stable_mosaic.version = 11 : i64} {
  func.func @_conv_sig_pool_kernel(%arg0: i32, %arg1: memref<256x25xbf16, #tpu.memory_space<vmem>>, %arg2: memref<256x25xbf16, #tpu.memory_space<vmem>>, %arg3: memref<256x25xbf16, #tpu.memory_space<vmem>>, %arg4: memref<256x25xbf16, #tpu.memory_space<vmem>>, %arg5: memref<25x6xbf16, #tpu.memory_space<vmem>>, %arg6: memref<1x6xf32, #tpu.memory_space<vmem>>, %arg7: memref<256x6xbf16, #tpu.memory_space<vmem>>) attributes {dimension_semantics = [#tpu.dimension_semantics<parallel>], iteration_bounds = array<i64: 2>, scalar_prefetch = 0 : i64, scratch_operands = 0 : i64, tpu.core_type = #tpu.core_type<tc>, window_params = [{transform_indices = @transform_0, window_bounds = array<i64: 256, 25>}, {transform_indices = @transform_1, window_bounds = array<i64: 256, 25>}, {transform_indices = @transform_2, window_bounds = array<i64: 256, 25>}, {transform_indices = @transform_3, window_bounds = array<i64: 256, 25>}, {pipeline_mode = #tpu.pipeline_mode<synchronous>, transform_indices = @transform_4, window_bounds = array<i64: 25, 6>}, {pipeline_mode = #tpu.pipeline_mode<synchronous>, transform_indices = @transform_5, window_bounds = array<i64: 1, 6>}, {transform_indices = @transform_6, window_bounds = array<i64: 256, 6>}]} {
    %c0 = arith.constant 0 : index
    %c0_0 = arith.constant 0 : index
    %0 = vector.load %arg5[%c0, %c0_0] : memref<25x6xbf16, #tpu.memory_space<vmem>>, vector<25x6xbf16>
    %c0_1 = arith.constant 0 : index
    %c0_2 = arith.constant 0 : index
    %1 = vector.load %arg6[%c0_1, %c0_2] : memref<1x6xf32, #tpu.memory_space<vmem>>, vector<1x6xf32>
    %c0_3 = arith.constant 0 : index
    %c0_4 = arith.constant 0 : index
    %2 = vector.load %arg1[%c0_3, %c0_4] : memref<256x25xbf16, #tpu.memory_space<vmem>>, vector<256x25xbf16>
    %cst = arith.constant dense<0.000000e+00> : vector<256x6xf32>
    %3 = tpu.matmul %2, %0, %cst {dimension_numbers = #tpu.dot_dimension_numbers<[1], [0], [0], [1], [0, 0, 1, 1], [], []>} : vector<256x25xbf16>, vector<25x6xbf16>, vector<256x6xf32> -> vector<256x6xf32>
    %4 = vector.broadcast %1 : vector<1x6xf32> to vector<256x6xf32>
    %5 = arith.addf %3, %4 : vector<256x6xf32>
    %cst_5 = arith.constant 5.000000e-01 : f32
    %6 = vector.broadcast %cst_5 : f32 to vector<256x6xf32>
    %7 = arith.mulf %6, %5 : vector<256x6xf32>
    %8 = math.tanh %7 : vector<256x6xf32>
    %cst_6 = arith.constant 1.000000e+00 : f32
    %9 = vector.broadcast %cst_6 : f32 to vector<256x6xf32>
    %10 = arith.addf %8, %9 : vector<256x6xf32>
    %cst_7 = arith.constant 5.000000e-01 : f32
    %11 = vector.broadcast %cst_7 : f32 to vector<256x6xf32>
    %12 = arith.mulf %11, %10 : vector<256x6xf32>
    %c0_8 = arith.constant 0 : index
    %c0_9 = arith.constant 0 : index
    %13 = vector.load %arg2[%c0_8, %c0_9] : memref<256x25xbf16, #tpu.memory_space<vmem>>, vector<256x25xbf16>
    %cst_10 = arith.constant dense<0.000000e+00> : vector<256x6xf32>
    %14 = tpu.matmul %13, %0, %cst_10 {dimension_numbers = #tpu.dot_dimension_numbers<[1], [0], [0], [1], [0, 0, 1, 1], [], []>} : vector<256x25xbf16>, vector<25x6xbf16>, vector<256x6xf32> -> vector<256x6xf32>
    %15 = vector.broadcast %1 : vector<1x6xf32> to vector<256x6xf32>
    %16 = arith.addf %14, %15 : vector<256x6xf32>
    %cst_11 = arith.constant 5.000000e-01 : f32
    %17 = vector.broadcast %cst_11 : f32 to vector<256x6xf32>
    %18 = arith.mulf %17, %16 : vector<256x6xf32>
    %19 = math.tanh %18 : vector<256x6xf32>
    %cst_12 = arith.constant 1.000000e+00 : f32
    %20 = vector.broadcast %cst_12 : f32 to vector<256x6xf32>
    %21 = arith.addf %19, %20 : vector<256x6xf32>
    %cst_13 = arith.constant 5.000000e-01 : f32
    %22 = vector.broadcast %cst_13 : f32 to vector<256x6xf32>
    %23 = arith.mulf %22, %21 : vector<256x6xf32>
    %24 = arith.addf %12, %23 : vector<256x6xf32>
    %c0_14 = arith.constant 0 : index
    %c0_15 = arith.constant 0 : index
    %25 = vector.load %arg3[%c0_14, %c0_15] : memref<256x25xbf16, #tpu.memory_space<vmem>>, vector<256x25xbf16>
    %cst_16 = arith.constant dense<0.000000e+00> : vector<256x6xf32>
    %26 = tpu.matmul %25, %0, %cst_16 {dimension_numbers = #tpu.dot_dimension_numbers<[1], [0], [0], [1], [0, 0, 1, 1], [], []>} : vector<256x25xbf16>, vector<25x6xbf16>, vector<256x6xf32> -> vector<256x6xf32>
    %27 = vector.broadcast %1 : vector<1x6xf32> to vector<256x6xf32>
    %28 = arith.addf %26, %27 : vector<256x6xf32>
    %cst_17 = arith.constant 5.000000e-01 : f32
    %29 = vector.broadcast %cst_17 : f32 to vector<256x6xf32>
    %30 = arith.mulf %29, %28 : vector<256x6xf32>
    %31 = math.tanh %30 : vector<256x6xf32>
    %cst_18 = arith.constant 1.000000e+00 : f32
    %32 = vector.broadcast %cst_18 : f32 to vector<256x6xf32>
    %33 = arith.addf %31, %32 : vector<256x6xf32>
    %cst_19 = arith.constant 5.000000e-01 : f32
    %34 = vector.broadcast %cst_19 : f32 to vector<256x6xf32>
    %35 = arith.mulf %34, %33 : vector<256x6xf32>
    %36 = arith.addf %24, %35 : vector<256x6xf32>
    %c0_20 = arith.constant 0 : index
    %c0_21 = arith.constant 0 : index
    %37 = vector.load %arg4[%c0_20, %c0_21] : memref<256x25xbf16, #tpu.memory_space<vmem>>, vector<256x25xbf16>
    %cst_22 = arith.constant dense<0.000000e+00> : vector<256x6xf32>
    %38 = tpu.matmul %37, %0, %cst_22 {dimension_numbers = #tpu.dot_dimension_numbers<[1], [0], [0], [1], [0, 0, 1, 1], [], []>} : vector<256x25xbf16>, vector<25x6xbf16>, vector<256x6xf32> -> vector<256x6xf32>
    %39 = vector.broadcast %1 : vector<1x6xf32> to vector<256x6xf32>
    %40 = arith.addf %38, %39 : vector<256x6xf32>
    %cst_23 = arith.constant 5.000000e-01 : f32
    %41 = vector.broadcast %cst_23 : f32 to vector<256x6xf32>
    %42 = arith.mulf %41, %40 : vector<256x6xf32>
    %43 = math.tanh %42 : vector<256x6xf32>
    %cst_24 = arith.constant 1.000000e+00 : f32
    %44 = vector.broadcast %cst_24 : f32 to vector<256x6xf32>
    %45 = arith.addf %43, %44 : vector<256x6xf32>
    %cst_25 = arith.constant 5.000000e-01 : f32
    %46 = vector.broadcast %cst_25 : f32 to vector<256x6xf32>
    %47 = arith.mulf %46, %45 : vector<256x6xf32>
    %48 = arith.addf %36, %47 : vector<256x6xf32>
    %cst_26 = arith.constant 2.500000e-01 : f32
    %49 = vector.broadcast %cst_26 : f32 to vector<256x6xf32>
    %50 = arith.mulf %49, %48 : vector<256x6xf32>
    %51 = arith.truncf %50 : vector<256x6xf32> to vector<256x6xbf16>
    %c0_27 = arith.constant 0 : index
    %c0_28 = arith.constant 0 : index
    %52 = vector.load %arg7[%c0_27, %c0_28] : memref<256x6xbf16, #tpu.memory_space<vmem>>, vector<256x6xbf16>
    tpu.vector_store %arg7[%c0_27, %c0_28], %51 {strides = array<i32>} : memref<256x6xbf16, #tpu.memory_space<vmem>>, vector<256x6xbf16>,
    return
  }
  func.func @transform_0(%arg0: i32) -> (i32, i32) {
    %c0_i32 = arith.constant 0 : i32
    %c0_i32_0 = arith.constant 0 : i32
    return %arg0, %c0_i32 : i32, i32
  }
  func.func @transform_1(%arg0: i32) -> (i32, i32) {
    %c0_i32 = arith.constant 0 : i32
    %c0_i32_0 = arith.constant 0 : i32
    return %arg0, %c0_i32 : i32, i32
  }
  func.func @transform_2(%arg0: i32) -> (i32, i32) {
    %c0_i32 = arith.constant 0 : i32
    %c0_i32_0 = arith.constant 0 : i32
    return %arg0, %c0_i32 : i32, i32
  }
  func.func @transform_3(%arg0: i32) -> (i32, i32) {
    %c0_i32 = arith.constant 0 : i32
    %c0_i32_0 = arith.constant 0 : i32
    return %arg0, %c0_i32 : i32, i32
  }
  func.func @transform_4(%arg0: i32) -> (i32, i32) {
    %c0_i32 = arith.constant 0 : i32
    %c0_i32_0 = arith.constant 0 : i32
    %c0_i32_1 = arith.constant 0 : i32
    return %c0_i32, %c0_i32_0 : i32, i32
  }
  func.func @transform_5(%arg0: i32) -> (i32, i32) {
    %c0_i32 = arith.constant 0 : i32
    %c0_i32_0 = arith.constant 0 : i32
    %c0_i32_1 = arith.constant 0 : i32
    return %c0_i32, %c0_i32_0 : i32, i32
  }
  func.func @transform_6(%arg0: i32) -> (i32, i32) {
    %c0_i32 = arith.constant 0 : i32
    %c0_i32_0 = arith.constant 0 : i32
    return %arg0, %c0_i32 : i32, i32
  }
}

module attributes {stable_mosaic.version = 11 : i64} {
  func.func @_conv_sig_pool_kernel(%arg0: i32, %arg1: memref<50x150xbf16, #tpu.memory_space<vmem>>, %arg2: memref<50x150xbf16, #tpu.memory_space<vmem>>, %arg3: memref<50x150xbf16, #tpu.memory_space<vmem>>, %arg4: memref<50x150xbf16, #tpu.memory_space<vmem>>, %arg5: memref<150x16xbf16, #tpu.memory_space<vmem>>, %arg6: memref<1x16xf32, #tpu.memory_space<vmem>>, %arg7: memref<50x16xbf16, #tpu.memory_space<vmem>>) attributes {dimension_semantics = [#tpu.dimension_semantics<parallel>], iteration_bounds = array<i64: 1>, scalar_prefetch = 0 : i64, scratch_operands = 0 : i64, tpu.core_type = #tpu.core_type<tc>, window_params = [{transform_indices = @transform_0, window_bounds = array<i64: 50, 150>}, {transform_indices = @transform_1, window_bounds = array<i64: 50, 150>}, {transform_indices = @transform_2, window_bounds = array<i64: 50, 150>}, {transform_indices = @transform_3, window_bounds = array<i64: 50, 150>}, {pipeline_mode = #tpu.pipeline_mode<synchronous>, transform_indices = @transform_4, window_bounds = array<i64: 150, 16>}, {pipeline_mode = #tpu.pipeline_mode<synchronous>, transform_indices = @transform_5, window_bounds = array<i64: 1, 16>}, {transform_indices = @transform_6, window_bounds = array<i64: 50, 16>}]} {
    %c0 = arith.constant 0 : index
    %c0_0 = arith.constant 0 : index
    %0 = vector.load %arg5[%c0, %c0_0] : memref<150x16xbf16, #tpu.memory_space<vmem>>, vector<150x16xbf16>
    %c0_1 = arith.constant 0 : index
    %c0_2 = arith.constant 0 : index
    %1 = vector.load %arg6[%c0_1, %c0_2] : memref<1x16xf32, #tpu.memory_space<vmem>>, vector<1x16xf32>
    %c0_3 = arith.constant 0 : index
    %c0_4 = arith.constant 0 : index
    %2 = vector.load %arg1[%c0_3, %c0_4] : memref<50x150xbf16, #tpu.memory_space<vmem>>, vector<50x150xbf16>
    %cst = arith.constant dense<0.000000e+00> : vector<50x16xf32>
    %3 = tpu.matmul %2, %0, %cst {dimension_numbers = #tpu.dot_dimension_numbers<[1], [0], [0], [1], [0, 0, 1, 1], [], []>} : vector<50x150xbf16>, vector<150x16xbf16>, vector<50x16xf32> -> vector<50x16xf32>
    %4 = vector.broadcast %1 : vector<1x16xf32> to vector<50x16xf32>
    %5 = arith.addf %3, %4 : vector<50x16xf32>
    %cst_5 = arith.constant 5.000000e-01 : f32
    %6 = vector.broadcast %cst_5 : f32 to vector<50x16xf32>
    %7 = arith.mulf %6, %5 : vector<50x16xf32>
    %8 = math.tanh %7 : vector<50x16xf32>
    %cst_6 = arith.constant 1.000000e+00 : f32
    %9 = vector.broadcast %cst_6 : f32 to vector<50x16xf32>
    %10 = arith.addf %8, %9 : vector<50x16xf32>
    %cst_7 = arith.constant 5.000000e-01 : f32
    %11 = vector.broadcast %cst_7 : f32 to vector<50x16xf32>
    %12 = arith.mulf %11, %10 : vector<50x16xf32>
    %c0_8 = arith.constant 0 : index
    %c0_9 = arith.constant 0 : index
    %13 = vector.load %arg2[%c0_8, %c0_9] : memref<50x150xbf16, #tpu.memory_space<vmem>>, vector<50x150xbf16>
    %cst_10 = arith.constant dense<0.000000e+00> : vector<50x16xf32>
    %14 = tpu.matmul %13, %0, %cst_10 {dimension_numbers = #tpu.dot_dimension_numbers<[1], [0], [0], [1], [0, 0, 1, 1], [], []>} : vector<50x150xbf16>, vector<150x16xbf16>, vector<50x16xf32> -> vector<50x16xf32>
    %15 = vector.broadcast %1 : vector<1x16xf32> to vector<50x16xf32>
    %16 = arith.addf %14, %15 : vector<50x16xf32>
    %cst_11 = arith.constant 5.000000e-01 : f32
    %17 = vector.broadcast %cst_11 : f32 to vector<50x16xf32>
    %18 = arith.mulf %17, %16 : vector<50x16xf32>
    %19 = math.tanh %18 : vector<50x16xf32>
    %cst_12 = arith.constant 1.000000e+00 : f32
    %20 = vector.broadcast %cst_12 : f32 to vector<50x16xf32>
    %21 = arith.addf %19, %20 : vector<50x16xf32>
    %cst_13 = arith.constant 5.000000e-01 : f32
    %22 = vector.broadcast %cst_13 : f32 to vector<50x16xf32>
    %23 = arith.mulf %22, %21 : vector<50x16xf32>
    %24 = arith.addf %12, %23 : vector<50x16xf32>
    %c0_14 = arith.constant 0 : index
    %c0_15 = arith.constant 0 : index
    %25 = vector.load %arg3[%c0_14, %c0_15] : memref<50x150xbf16, #tpu.memory_space<vmem>>, vector<50x150xbf16>
    %cst_16 = arith.constant dense<0.000000e+00> : vector<50x16xf32>
    %26 = tpu.matmul %25, %0, %cst_16 {dimension_numbers = #tpu.dot_dimension_numbers<[1], [0], [0], [1], [0, 0, 1, 1], [], []>} : vector<50x150xbf16>, vector<150x16xbf16>, vector<50x16xf32> -> vector<50x16xf32>
    %27 = vector.broadcast %1 : vector<1x16xf32> to vector<50x16xf32>
    %28 = arith.addf %26, %27 : vector<50x16xf32>
    %cst_17 = arith.constant 5.000000e-01 : f32
    %29 = vector.broadcast %cst_17 : f32 to vector<50x16xf32>
    %30 = arith.mulf %29, %28 : vector<50x16xf32>
    %31 = math.tanh %30 : vector<50x16xf32>
    %cst_18 = arith.constant 1.000000e+00 : f32
    %32 = vector.broadcast %cst_18 : f32 to vector<50x16xf32>
    %33 = arith.addf %31, %32 : vector<50x16xf32>
    %cst_19 = arith.constant 5.000000e-01 : f32
    %34 = vector.broadcast %cst_19 : f32 to vector<50x16xf32>
    %35 = arith.mulf %34, %33 : vector<50x16xf32>
    %36 = arith.addf %24, %35 : vector<50x16xf32>
    %c0_20 = arith.constant 0 : index
    %c0_21 = arith.constant 0 : index
    %37 = vector.load %arg4[%c0_20, %c0_21] : memref<50x150xbf16, #tpu.memory_space<vmem>>, vector<50x150xbf16>
    %cst_22 = arith.constant dense<0.000000e+00> : vector<50x16xf32>
    %38 = tpu.matmul %37, %0, %cst_22 {dimension_numbers = #tpu.dot_dimension_numbers<[1], [0], [0], [1], [0, 0, 1, 1], [], []>} : vector<50x150xbf16>, vector<150x16xbf16>, vector<50x16xf32> -> vector<50x16xf32>
    %39 = vector.broadcast %1 : vector<1x16xf32> to vector<50x16xf32>
    %40 = arith.addf %38, %39 : vector<50x16xf32>
    %cst_23 = arith.constant 5.000000e-01 : f32
    %41 = vector.broadcast %cst_23 : f32 to vector<50x16xf32>
    %42 = arith.mulf %41, %40 : vector<50x16xf32>
    %43 = math.tanh %42 : vector<50x16xf32>
    %cst_24 = arith.constant 1.000000e+00 : f32
    %44 = vector.broadcast %cst_24 : f32 to vector<50x16xf32>
    %45 = arith.addf %43, %44 : vector<50x16xf32>
    %cst_25 = arith.constant 5.000000e-01 : f32
    %46 = vector.broadcast %cst_25 : f32 to vector<50x16xf32>
    %47 = arith.mulf %46, %45 : vector<50x16xf32>
    %48 = arith.addf %36, %47 : vector<50x16xf32>
    %cst_26 = arith.constant 2.500000e-01 : f32
    %49 = vector.broadcast %cst_26 : f32 to vector<50x16xf32>
    %50 = arith.mulf %49, %48 : vector<50x16xf32>
    %51 = arith.truncf %50 : vector<50x16xf32> to vector<50x16xbf16>
    %c0_27 = arith.constant 0 : index
    %c0_28 = arith.constant 0 : index
    %52 = vector.load %arg7[%c0_27, %c0_28] : memref<50x16xbf16, #tpu.memory_space<vmem>>, vector<50x16xbf16>
    tpu.vector_store %arg7[%c0_27, %c0_28], %51 {strides = array<i32>} : memref<50x16xbf16, #tpu.memory_space<vmem>>, vector<50x16xbf16>,
    return
  }
  func.func @transform_0(%arg0: i32) -> (i32, i32) {
    %c0_i32 = arith.constant 0 : i32
    %c0_i32_0 = arith.constant 0 : i32
    return %arg0, %c0_i32 : i32, i32
  }
  func.func @transform_1(%arg0: i32) -> (i32, i32) {
    %c0_i32 = arith.constant 0 : i32
    %c0_i32_0 = arith.constant 0 : i32
    return %arg0, %c0_i32 : i32, i32
  }
  func.func @transform_2(%arg0: i32) -> (i32, i32) {
    %c0_i32 = arith.constant 0 : i32
    %c0_i32_0 = arith.constant 0 : i32
    return %arg0, %c0_i32 : i32, i32
  }
  func.func @transform_3(%arg0: i32) -> (i32, i32) {
    %c0_i32 = arith.constant 0 : i32
    %c0_i32_0 = arith.constant 0 : i32
    return %arg0, %c0_i32 : i32, i32
  }
  func.func @transform_4(%arg0: i32) -> (i32, i32) {
    %c0_i32 = arith.constant 0 : i32
    %c0_i32_0 = arith.constant 0 : i32
    %c0_i32_1 = arith.constant 0 : i32
    return %c0_i32, %c0_i32_0 : i32, i32
  }
  func.func @transform_5(%arg0: i32) -> (i32, i32) {
    %c0_i32 = arith.constant 0 : i32
    %c0_i32_0 = arith.constant 0 : i32
    %c0_i32_1 = arith.constant 0 : i32
    return %c0_i32, %c0_i32_0 : i32, i32
  }
  func.func @transform_6(%arg0: i32) -> (i32, i32) {
    %c0_i32 = arith.constant 0 : i32
    %c0_i32_0 = arith.constant 0 : i32
    return %arg0, %c0_i32 : i32, i32
  }
}

module attributes {stable_mosaic.version = 11 : i64} {
  func.func @_fc_tail_kernel(%arg0: i32, %arg1: memref<2x400xbf16, #tpu.memory_space<vmem>>, %arg2: memref<400x128xbf16, #tpu.memory_space<vmem>>, %arg3: memref<1x128xf32, #tpu.memory_space<vmem>>, %arg4: memref<128x128xbf16, #tpu.memory_space<vmem>>, %arg5: memref<1x128xf32, #tpu.memory_space<vmem>>, %arg6: memref<128x10xbf16, #tpu.memory_space<vmem>>, %arg7: memref<1x10xf32, #tpu.memory_space<vmem>>, %arg8: memref<2x10xf32, #tpu.memory_space<vmem>>) attributes {dimension_semantics = [#tpu.dimension_semantics<parallel>], iteration_bounds = array<i64: 1>, scalar_prefetch = 0 : i64, scratch_operands = 0 : i64, tpu.core_type = #tpu.core_type<tc>, window_params = [{transform_indices = @transform_0, window_bounds = array<i64: 2, 400>}, {pipeline_mode = #tpu.pipeline_mode<synchronous>, transform_indices = @transform_1, window_bounds = array<i64: 400, 128>}, {pipeline_mode = #tpu.pipeline_mode<synchronous>, transform_indices = @transform_2, window_bounds = array<i64: 1, 128>}, {pipeline_mode = #tpu.pipeline_mode<synchronous>, transform_indices = @transform_3, window_bounds = array<i64: 128, 128>}, {pipeline_mode = #tpu.pipeline_mode<synchronous>, transform_indices = @transform_4, window_bounds = array<i64: 1, 128>}, {pipeline_mode = #tpu.pipeline_mode<synchronous>, transform_indices = @transform_5, window_bounds = array<i64: 128, 10>}, {pipeline_mode = #tpu.pipeline_mode<synchronous>, transform_indices = @transform_6, window_bounds = array<i64: 1, 10>}, {transform_indices = @transform_7, window_bounds = array<i64: 2, 10>}]} {
    %c0 = arith.constant 0 : index
    %c0_0 = arith.constant 0 : index
    %0 = vector.load %arg1[%c0, %c0_0] : memref<2x400xbf16, #tpu.memory_space<vmem>>, vector<2x400xbf16>
    %c0_1 = arith.constant 0 : index
    %c0_2 = arith.constant 0 : index
    %1 = vector.load %arg2[%c0_1, %c0_2] : memref<400x128xbf16, #tpu.memory_space<vmem>>, vector<400x128xbf16>
    %cst = arith.constant dense<0.000000e+00> : vector<2x128xf32>
    %2 = tpu.matmul %0, %1, %cst {dimension_numbers = #tpu.dot_dimension_numbers<[1], [0], [0], [1], [0, 0, 1, 1], [], []>} : vector<2x400xbf16>, vector<400x128xbf16>, vector<2x128xf32> -> vector<2x128xf32>
    %c0_3 = arith.constant 0 : index
    %c0_4 = arith.constant 0 : index
    %3 = vector.load %arg3[%c0_3, %c0_4] : memref<1x128xf32, #tpu.memory_space<vmem>>, vector<1x128xf32>
    %4 = vector.broadcast %3 : vector<1x128xf32> to vector<2x128xf32>
    %5 = arith.addf %2, %4 : vector<2x128xf32>
    %cst_5 = arith.constant 5.000000e-01 : f32
    %6 = vector.broadcast %cst_5 : f32 to vector<2x128xf32>
    %7 = arith.mulf %6, %5 : vector<2x128xf32>
    %8 = math.tanh %7 : vector<2x128xf32>
    %cst_6 = arith.constant 1.000000e+00 : f32
    %9 = vector.broadcast %cst_6 : f32 to vector<2x128xf32>
    %10 = arith.addf %8, %9 : vector<2x128xf32>
    %cst_7 = arith.constant 5.000000e-01 : f32
    %11 = vector.broadcast %cst_7 : f32 to vector<2x128xf32>
    %12 = arith.mulf %11, %10 : vector<2x128xf32>
    %13 = arith.truncf %12 : vector<2x128xf32> to vector<2x128xbf16>
    %c0_8 = arith.constant 0 : index
    %c0_9 = arith.constant 0 : index
    %14 = vector.load %arg4[%c0_8, %c0_9] : memref<128x128xbf16, #tpu.memory_space<vmem>>, vector<128x128xbf16>
    %cst_10 = arith.constant dense<0.000000e+00> : vector<2x128xf32>
    %15 = tpu.matmul %13, %14, %cst_10 {dimension_numbers = #tpu.dot_dimension_numbers<[1], [0], [0], [1], [0, 0, 1, 1], [], []>} : vector<2x128xbf16>, vector<128x128xbf16>, vector<2x128xf32> -> vector<2x128xf32>
    %c0_11 = arith.constant 0 : index
    %c0_12 = arith.constant 0 : index
    %16 = vector.load %arg5[%c0_11, %c0_12] : memref<1x128xf32, #tpu.memory_space<vmem>>, vector<1x128xf32>
    %17 = vector.broadcast %16 : vector<1x128xf32> to vector<2x128xf32>
    %18 = arith.addf %15, %17 : vector<2x128xf32>
    %cst_13 = arith.constant 5.000000e-01 : f32
    %19 = vector.broadcast %cst_13 : f32 to vector<2x128xf32>
    %20 = arith.mulf %19, %18 : vector<2x128xf32>
    %21 = math.tanh %20 : vector<2x128xf32>
    %cst_14 = arith.constant 1.000000e+00 : f32
    %22 = vector.broadcast %cst_14 : f32 to vector<2x128xf32>
    %23 = arith.addf %21, %22 : vector<2x128xf32>
    %cst_15 = arith.constant 5.000000e-01 : f32
    %24 = vector.broadcast %cst_15 : f32 to vector<2x128xf32>
    %25 = arith.mulf %24, %23 : vector<2x128xf32>
    %26 = arith.truncf %25 : vector<2x128xf32> to vector<2x128xbf16>
    %c0_16 = arith.constant 0 : index
    %c0_17 = arith.constant 0 : index
    %27 = vector.load %arg6[%c0_16, %c0_17] : memref<128x10xbf16, #tpu.memory_space<vmem>>, vector<128x10xbf16>
    %cst_18 = arith.constant dense<0.000000e+00> : vector<2x10xf32>
    %28 = tpu.matmul %26, %27, %cst_18 {dimension_numbers = #tpu.dot_dimension_numbers<[1], [0], [0], [1], [0, 0, 1, 1], [], []>} : vector<2x128xbf16>, vector<128x10xbf16>, vector<2x10xf32> -> vector<2x10xf32>
    %c0_19 = arith.constant 0 : index
    %c0_20 = arith.constant 0 : index
    %29 = vector.load %arg7[%c0_19, %c0_20] : memref<1x10xf32, #tpu.memory_space<vmem>>, vector<1x10xf32>
    %30 = vector.broadcast %29 : vector<1x10xf32> to vector<2x10xf32>
    %31 = arith.addf %28, %30 : vector<2x10xf32>
    %cst_21 = arith.constant dense<0xFF800000> : vector<2xf32>
    %32 = vector.multi_reduction <maximumf>, %31, %cst_21 [1] : vector<2x10xf32> to vector<2xf32>
    %33 = vector.shape_cast %32 : vector<2xf32> to vector<2x1xf32>
    %34 = vector.broadcast %33 : vector<2x1xf32> to vector<2x10xf32>
    %35 = arith.subf %31, %34 : vector<2x10xf32>
    %36 = math.exp %35 : vector<2x10xf32>
    %cst_22 = arith.constant dense<0.000000e+00> : vector<2xf32>
    %37 = vector.multi_reduction <add>, %36, %cst_22 [1] : vector<2x10xf32> to vector<2xf32>
    %38 = vector.shape_cast %37 : vector<2xf32> to vector<2x1xf32>
    %39 = tpu.reciprocal %38 {approx = true} : vector<2x1xf32> -> vector<2x1xf32>
    %40 = vector.broadcast %39 : vector<2x1xf32> to vector<2x10xf32>
    %41 = arith.mulf %36, %40 : vector<2x10xf32>
    %c0_23 = arith.constant 0 : index
    %c0_24 = arith.constant 0 : index
    %42 = vector.load %arg8[%c0_23, %c0_24] : memref<2x10xf32, #tpu.memory_space<vmem>>, vector<2x10xf32>
    tpu.vector_store %arg8[%c0_23, %c0_24], %41 {strides = array<i32>} : memref<2x10xf32, #tpu.memory_space<vmem>>, vector<2x10xf32>,
    return
  }
  func.func @transform_0(%arg0: i32) -> (i32, i32) {
    %c0_i32 = arith.constant 0 : i32
    %c0_i32_0 = arith.constant 0 : i32
    return %arg0, %c0_i32 : i32, i32
  }
  func.func @transform_1(%arg0: i32) -> (i32, i32) {
    %c0_i32 = arith.constant 0 : i32
    %c0_i32_0 = arith.constant 0 : i32
    %c0_i32_1 = arith.constant 0 : i32
    return %c0_i32, %c0_i32_0 : i32, i32
  }
  func.func @transform_2(%arg0: i32) -> (i32, i32) {
    %c0_i32 = arith.constant 0 : i32
    %c0_i32_0 = arith.constant 0 : i32
    %c0_i32_1 = arith.constant 0 : i32
    return %c0_i32, %c0_i32_0 : i32, i32
  }
  func.func @transform_3(%arg0: i32) -> (i32, i32) {
    %c0_i32 = arith.constant 0 : i32
    %c0_i32_0 = arith.constant 0 : i32
    %c0_i32_1 = arith.constant 0 : i32
    return %c0_i32, %c0_i32_0 : i32, i32
  }
  func.func @transform_4(%arg0: i32) -> (i32, i32) {
    %c0_i32 = arith.constant 0 : i32
    %c0_i32_0 = arith.constant 0 : i32
    %c0_i32_1 = arith.constant 0 : i32
    return %c0_i32, %c0_i32_0 : i32, i32
  }
  func.func @transform_5(%arg0: i32) -> (i32, i32) {
    %c0_i32 = arith.constant 0 : i32
    %c0_i32_0 = arith.constant 0 : i32
    %c0_i32_1 = arith.constant 0 : i32
    return %c0_i32, %c0_i32_0 : i32, i32
  }
  func.func @transform_6(%arg0: i32) -> (i32, i32) {
    %c0_i32 = arith.constant 0 : i32
    %c0_i32_0 = arith.constant 0 : i32
    %c0_i32_1 = arith.constant 0 : i32
    return %c0_i32, %c0_i32_0 : i32, i32
  }
  func.func @transform_7(%arg0: i32) -> (i32, i32) {
    %c0_i32 = arith.constant 0 : i32
    %c0_i32_0 = arith.constant 0 : i32
    return %arg0, %c0_i32 : i32, i32
  }
}

</mosaic_0001>

<bundles_post_ra>
// kernel: lenet_forward.3
= control target key start
LH: loop header
LB: loop body
LE: loop exit
PB: predicated region body
PF: predicated region fallthrough
CT: control target
= control target key end

     0   :  { %s3871_s21 = smov 0   ;;  %s3873_s22 = smov 0   ;;  %s4717_s0 = inlined_call_operand.vmem [shape: bf16[392,25], index: 0, kind: input, shape index: {}]   ;;  %s4718_s1 = inlined_call_operand.vmem [shape: bf16[392,25], index: 1, kind: input, shape index: {}]   ;;  %s4719_s2 = inlined_call_operand.vmem [shape: bf16[392,25], index: 2, kind: input, shape index: {}]   ;;  %s4720_s3 = inlined_call_operand.vmem [shape: bf16[392,25], index: 3, kind: input, shape index: {}]   ;;  %s4721_s4 = inlined_call_operand.vmem [shape: bf16[25,6], index: 4, kind: input, shape index: {}]   ;;  %s4722_s5 = inlined_call_operand.vmem [shape: f32[1,6], index: 5, kind: input, shape index: {}]   ;;  %s4723_s6 = inlined_call_operand.vmem [shape: bf16[392,6], index: 6, kind: output, shape index: {}]  }
   0x1   :  { %s3875_s23 = smov 0  }
   0x2 LB: > { %s3884_s24 = sadd.s32 4294967295, %s3801_s23   ;;  %s3886_s25 = sadd.s32 1, %s3801_s23   ;;  %s3801_s23 = sphi %s3875_s23, %s4730_s23   ;;  %s3797_s22 = sphi %s3873_s22, %s4729_s22   ;;  %s3793_s21 = sphi %s3871_s21, %s4728_s21  }
   0x3   : > { %s166_s26 = ssub.s32 %s3801_s23, %s3886_s25  ;;  %s169_s27 = sadd.s32 1, %s3797_s22 }
   0x4   : > { %p167_p0 = scmp.eq.s32.totalorder %s166_s26, 0  ;;  %p179_p1 = scmp.ne.s32.totalorder %s3797_s22, %s3793_s21 }
   0x5   : > { %p180_p2 = scmp.eq.s32.totalorder %s3884_s24, 1  ;;  %p2894_p3 = scmp.ge.s32.totalorder %s3801_s23, 1 }
   0x6   : > { %s3894_s28 = scalar_select %p167_p0, %s3797_s22, %s169_s27  }
   0x7   : > { %p3896_p4 = por %p180_p2, %p179_p1  ;;  %p278_p5 = scmp.lt.s32.totalorder %s3801_s23, 3 }
   0x9   : > { %p279_p6 = pnand %p2894_p3, %p278_p5 }
   0xa   : > { %s3904_s8 = sshll.u32 (!%p279_p6), %s3884_s24, 5 }
   0xb   : > { %282 = sbr.rel (%p279_p6) target bundleno = 500 (0x1f4), region = 44  ;;  %p343_p7 = scmp.lt.s32.totalorder (!%p279_p6), %s3904_s8, 48 }
  0x10   : > { %v3424_v0 = vld [vmem:[%s4721_s4 + $0x8] sm:$0x1f]   ;;  %vm583_vm0 = vcmask 1043456   ;;  %vm584_vm1 = vcmask 1044480   ;;  %v3835_v1 = vmov 65535   ;;  %v3425_v5 = vld [vmem:[%s4721_s4] sm:$0xff]  }
  0x11   : > { %v585_v2 = vsel %vm583_vm0, 4294967295, %v3835_v1  ;;  %s344_s11 = scalar_select %p343_p7, %s3904_s8, 48  ;;  %vm534_vm2 = vcmask 203776   ;;  %vm2482_vm3 = vcmask 44032  }
  0x12   : > { %v586_v3 = vsel %vm584_vm1, %v585_v2, 0  ;;  %s2523_s14 = ssub.s32 (%p3896_p4), 49, %s3904_s8 }
  0x13   : > { %v588_v4 = vand.u32 %v3424_v0, %v586_v3  ;;  %s3911_s12 = sshll.u32 %s344_s11, 2  ;;  %p2524_p8 = scmp.lt.s32.totalorder (%p3896_p4), %s2523_s14, 32 }
  0x14   : > { %s3917_s15 = scalar_lea.vmem %s4717_s0, %s3911_s12  ;;  %s3923_s18 = scalar_lea.vmem %s4718_s1, %s3911_s12 }
  0x15   : > { %3191 = vmatprep.subr.bf16.mxu0 %v588_v4  ;;  %3227 = vmatprep.subr.bf16.mxu1 %v588_v4  ;;  %v3426_v6 = vld [vmem:[%s3917_s15] sm:$0xff]   ;;  %v3428_v8 = vld [vmem:[%s3917_s15 + $0x8] sm:$0xff]   ;;  %v3430_v10 = vld [vmem:[%s3917_s15 + $0x10] sm:$0xff]   ;;  %s3966_s23 = scalar_lea.vmem %s4719_s2, %s3911_s12  ;;  %s3973_s30 = scalar_lea.vmem %s4720_s3, %s3911_s12 }
  0x16   : > { %3192 = vmatpush3.bf16.msra.mxu0 %v588_v4  ;;  %3228 = vmatpush3.bf16.msra.mxu1 %v588_v4  ;;  %v3427_v7 = vld [vmem:[%s3923_s18] sm:$0xff]   ;;  %v3429_v9 = vld [vmem:[%s3923_s18 + $0x8] sm:$0xff]   ;;  %v3431_v11 = vld [vmem:[%s3923_s18 + $0x10] sm:$0xff]   ;;  %s335_s12 = sand.u32 1, %s3793_s21  }
  0x17   : > { %3193 = vmatprep.subr.bf16.mxu0 %v3425_v5  ;;  %3229 = vmatprep.subr.bf16.mxu1 %v3425_v5  ;;  %v3432_v12 = vld [vmem:[%s3917_s15 + $0x18] sm:$0xff]   ;;  %v3434_v14 = vld [vmem:[%s3917_s15 + $0x20] sm:$0xff]   ;;  %v3436_v16 = vld [vmem:[%s3917_s15 + $0x28] sm:$0xff]   ;;  %s4366_s21 = sshll.u32 %s335_s12, 7 }
  0x18   : > { %3195 = vmatprep.mubr.msk.bf16.mxu0 %vm534_vm2, %v3426_v6  ;;  %3231 = vmatprep.mubr.msk.bf16.mxu1 %vm534_vm2, %v3427_v7  ;;  %v3433_v13 = vld [vmem:[%s3923_s18 + $0x18] sm:$0xff]   ;;  %v3435_v15 = vld [vmem:[%s3923_s18 + $0x20] sm:$0xff]   ;;  %v3437_v17 = vld [vmem:[%s3923_s18 + $0x28] sm:$0xff]   ;;  %s4379_s13 = scalar_lea.vmem [#allocation2], %s4366_s21  }
  0x19   : > { %v3438_v18 = vld [vmem:[%s3917_s15 + $0x30] sm:$0xff]   ;;  %v3440_v20 = vld [vmem:[%s3917_s15 + $0x38] sm:$0xff]   ;;  %v3442_v22 = vld [vmem:[%s3917_s15 + $0x40] sm:$0xff]  }
  0x1a   : > { %3194 = vmatpush3.bf16.msra.mxu0 %v3425_v5  ;;  %3230 = vmatpush3.bf16.msra.mxu1 %v3425_v5  ;;  %v3439_v19 = vld [vmem:[%s3923_s18 + $0x30] sm:$0xff]   ;;  %v3441_v21 = vld [vmem:[%s3923_s18 + $0x38] sm:$0xff]   ;;  %v3443_v23 = vld [vmem:[%s3923_s18 + $0x40] sm:$0xff]  }
  0x1b   : > { %3263 = vmatprep.subr.bf16.mxu0 %v588_v4  ;;  %3299 = vmatprep.subr.bf16.mxu1 %v588_v4  ;;  %v3444_v24 = vld [vmem:[%s3917_s15 + $0x48] sm:$0xff]   ;;  %v3446_v26 = vld [vmem:[%s3917_s15 + $0x50] sm:$0xff]   ;;  %v3448_v28 = vld [vmem:[%s3917_s15 + $0x58] sm:$0xff]  }
  0x1c   : > { %v3445_v25 = vld [vmem:[%s3923_s18 + $0x48] sm:$0xff]   ;;  %v3447_v27 = vld [vmem:[%s3923_s18 + $0x50] sm:$0xff]   ;;  %v3449_v29 = vld [vmem:[%s3923_s18 + $0x58] sm:$0xff]  }
  0x1d   : > { %3196 = vmatmul.mubr.msk.bf16.vlgmr.msra.gmra.mxu0 %vm534_vm2, %v3428_v8  ;;  %3232 = vmatmul.mubr.msk.bf16.vlgmr.msra.gmra.mxu1 %vm534_vm2, %v3429_v9  ;;  %v3450_v30 = vld [vmem:[%s3917_s15 + $0x60] sm:$0xff]   ;;  %v3452_v32 = vld [vmem:[%s3917_s15 + $0x68] sm:$0xff]   ;;  %v3454_v34 = vld [vmem:[%s3917_s15 + $0x70] sm:$0xff]  }
  0x1e   : > { %3264 = vmatpush3.bf16.msra.mxu0 %v588_v4  ;;  %3300 = vmatpush3.bf16.msra.mxu1 %v588_v4  ;;  %v3451_v31 = vld [vmem:[%s3923_s18 + $0x60] sm:$0xff]   ;;  %v3453_v33 = vld [vmem:[%s3923_s18 + $0x68] sm:$0xff]   ;;  %v3455_v35 = vld [vmem:[%s3923_s18 + $0x70] sm:$0xff]  }
  0x1f   : > { %3199 = vmatprep.mubr.msk.bf16.mxu0 %vm534_vm2, %v3430_v10  ;;  %3235 = vmatprep.mubr.msk.bf16.mxu1 %vm534_vm2, %v3431_v11  ;;  %v3456_v36 = vld [vmem:[%s3917_s15 + $0x78] sm:$0xff]   ;;  %v3458_v38 = vld [vmem:[%s3966_s23] sm:$0xff]   ;;  %v3460_v40 = vld [vmem:[%s3966_s23 + $0x8] sm:$0xff]   ;;  %s3116_s15 = sshll.u32 (%p3896_p4), %s3884_s24, 7 }
  0x20   : > { %3265 = vmatprep.subr.bf16.mxu0 %v3425_v5  ;;  %3301 = vmatprep.subr.bf16.mxu1 %v3425_v5  ;;  %v3457_v37 = vld [vmem:[%s3923_s18 + $0x78] sm:$0xff]   ;;  %v3459_v39 = vld [vmem:[%s3973_s30] sm:$0xff]   ;;  %v3461_v41 = vld [vmem:[%s3973_s30 + $0x8] sm:$0xff]   ;;  %s4589_s18 = scalar_lea.vmem (%p3896_p4), %s4723_s6, %s3116_s15  }
  0x21   : > { %v3462_v42 = vld [vmem:[%s3966_s23 + $0x10] sm:$0xff]   ;;  %v3464_v44 = vld [vmem:[%s3966_s23 + $0x18] sm:$0xff]   ;;  %v3466_v46 = vld [vmem:[%s3966_s23 + $0x20] sm:$0xff]  }
  0x22   : > { %3266 = vmatpush3.bf16.msra.mxu0 %v3425_v5  ;;  %3302 = vmatpush3.bf16.msra.mxu1 %v3425_v5  ;;  %v3463_v43 = vld [vmem:[%s3973_s30 + $0x10] sm:$0xff]   ;;  %v3465_v45 = vld [vmem:[%s3973_s30 + $0x18] sm:$0xff]   ;;  %v3467_v47 = vld [vmem:[%s3973_s30 + $0x20] sm:$0xff]  }
  0x23   : > { %v3468_v48 = vld [vmem:[%s3966_s23 + $0x28] sm:$0xff]   ;;  %v3470_v50 = vld [vmem:[%s3966_s23 + $0x30] sm:$0xff]   ;;  %v3472_v52 = vld [vmem:[%s3966_s23 + $0x38] sm:$0xff]  }
  0x24   : > { %v3469_v49 = vld [vmem:[%s3973_s30 + $0x28] sm:$0xff]   ;;  %v3471_v51 = vld [vmem:[%s3973_s30 + $0x30] sm:$0xff]   ;;  %v3473_v53 = vld [vmem:[%s3973_s30 + $0x38] sm:$0xff]  }
  0x25   : > { %3200 = vmatmul.mubr.msk.bf16.gmra.mxu0 %vm534_vm2, %v3432_v12  ;;  %3236 = vmatmul.mubr.msk.bf16.gmra.mxu1 %vm534_vm2, %v3433_v13  ;;  %v3474_v54 = vld [vmem:[%s3966_s23 + $0x40] sm:$0xff]   ;;  %v3476_v56 = vld [vmem:[%s3966_s23 + $0x48] sm:$0xff]   ;;  %v3478_v58 = vld [vmem:[%s3966_s23 + $0x50] sm:$0xff]  }
  0x26   : > { %3203 = vmatprep.mubr.msk.bf16.mxu0 %vm534_vm2, %v3434_v14  ;;  %3239 = vmatprep.mubr.msk.bf16.mxu1 %vm534_vm2, %v3435_v15  ;;  %v3475_v55 = vld [vmem:[%s3973_s30 + $0x40] sm:$0xff]   ;;  %v3477_v57 = vld [vmem:[%s3973_s30 + $0x48] sm:$0xff]   ;;  %v3479_v59 = vld [vmem:[%s3973_s30 + $0x50] sm:$0xff]  }
  0x27   : > { %v3480_v60 = vld [vmem:[%s3966_s23 + $0x58] sm:$0xff]   ;;  %v3482_v62 = vld [vmem:[%s3966_s23 + $0x60] sm:$0xff]   ;;  %v3484_v0 = vld [vmem:[%s3966_s23 + $0x68] sm:$0xff]  }
  0x28   : > { %v3481_v61 = vld [vmem:[%s3973_s30 + $0x58] sm:$0xff]   ;;  %v3483_v63 = vld [vmem:[%s3973_s30 + $0x60] sm:$0xff]   ;;  %v3485_v1 = vld [vmem:[%s3973_s30 + $0x68] sm:$0xff]  }
  0x29   : > { %v3486_v2 = vld [vmem:[%s3966_s23 + $0x70] sm:$0xff]   ;;  %v3488_v4 = vld [vmem:[%s3966_s23 + $0x78] sm:$0xff]   ;;  %v4068_v6 = vld [vmem:[%s4722_s5] ss:$0 sm:$0xff] }
  0x2a   : > { %v3487_v3 = vld [vmem:[%s3973_s30 + $0x70] sm:$0xff]   ;;  %v3489_v5 = vld [vmem:[%s3973_s30 + $0x78] sm:$0xff]  }
  0x2d   : > { %3204 = vmatmul.mubr.msk.bf16.gmra.mxu0 %vm534_vm2, %v3436_v16  ;;  %3240 = vmatmul.mubr.msk.bf16.gmra.mxu1 %vm534_vm2, %v3437_v17 }
  0x2e   : > { %3207 = vmatprep.mubr.msk.bf16.mxu0 %vm534_vm2, %v3438_v18  ;;  %3243 = vmatprep.mubr.msk.bf16.mxu1 %vm534_vm2, %v3439_v19 }
  0x35   : > { %3208 = vmatmul.mubr.msk.bf16.gmra.mxu0 %vm534_vm2, %v3440_v20  ;;  %3244 = vmatmul.mubr.msk.bf16.gmra.mxu1 %vm534_vm2, %v3441_v21 }
  0x36   : > { %3211 = vmatprep.mubr.msk.bf16.mxu0 %vm534_vm2, %v3442_v22  ;;  %3247 = vmatprep.mubr.msk.bf16.mxu1 %vm534_vm2, %v3443_v23 }
  0x3d   : > { %3212 = vmatmul.mubr.msk.bf16.gmra.mxu0 %vm534_vm2, %v3444_v24  ;;  %3248 = vmatmul.mubr.msk.bf16.gmra.mxu1 %vm534_vm2, %v3445_v25 }
  0x3e   : > { %3215 = vmatprep.mubr.msk.bf16.mxu0 %vm534_vm2, %v3446_v26  ;;  %3251 = vmatprep.mubr.msk.bf16.mxu1 %vm534_vm2, %v3447_v27 }
  0x45   : > { %3216 = vmatmul.mubr.msk.bf16.gmra.mxu0 %vm534_vm2, %v3448_v28  ;;  %3252 = vmatmul.mubr.msk.bf16.gmra.mxu1 %vm534_vm2, %v3449_v29 }
  0x46   : > { %3219 = vmatprep.mubr.msk.bf16.mxu0 %vm534_vm2, %v3450_v30  ;;  %3255 = vmatprep.mubr.msk.bf16.mxu1 %vm534_vm2, %v3451_v31 }
  0x4d   : > { %3220 = vmatmul.mubr.msk.bf16.gmra.mxu0 %vm534_vm2, %v3452_v32  ;;  %3256 = vmatmul.mubr.msk.bf16.gmra.mxu1 %vm534_vm2, %v3453_v33 }
  0x4e   : > { %3223 = vmatprep.mubr.msk.bf16.mxu0 %vm534_vm2, %v3454_v34  ;;  %3259 = vmatprep.mubr.msk.bf16.mxu1 %vm534_vm2, %v3455_v35 }
  0x55   : > { %3224 = vmatmul.mubr.msk.bf16.gmra.mxu0 %vm534_vm2, %v3456_v36  ;;  %3260 = vmatmul.mubr.msk.bf16.gmra.mxu1 %vm534_vm2, %v3457_v37 }
  0x56   : > { %3267 = vmatprep.mubr.msk.bf16.mxu0 %vm534_vm2, %v3458_v38  ;;  %3303 = vmatprep.mubr.msk.bf16.mxu1 %vm534_vm2, %v3459_v39 }
  0x5d   : > { %3268 = vmatmul.mubr.msk.bf16.vlgmr.msra.gmra.mxu0 %vm534_vm2, %v3460_v40  ;;  %3304 = vmatmul.mubr.msk.bf16.vlgmr.msra.gmra.mxu1 %vm534_vm2, %v3461_v41 }
  0x5e   : > { %3271 = vmatprep.mubr.msk.bf16.mxu0 %vm534_vm2, %v3462_v42  ;;  %3307 = vmatprep.mubr.msk.bf16.mxu1 %vm534_vm2, %v3463_v43 }
  0x65   : > { %3272 = vmatmul.mubr.msk.bf16.gmra.mxu0 %vm534_vm2, %v3464_v44  ;;  %3308 = vmatmul.mubr.msk.bf16.gmra.mxu1 %vm534_vm2, %v3465_v45 }
  0x66   : > { %3275 = vmatprep.mubr.msk.bf16.mxu0 %vm534_vm2, %v3466_v46  ;;  %3311 = vmatprep.mubr.msk.bf16.mxu1 %vm534_vm2, %v3467_v47 }
  0x6d   : > { %3276 = vmatmul.mubr.msk.bf16.gmra.mxu0 %vm534_vm2, %v3468_v48  ;;  %3312 = vmatmul.mubr.msk.bf16.gmra.mxu1 %vm534_vm2, %v3469_v49 }
  0x6e   : > { %3279 = vmatprep.mubr.msk.bf16.mxu0 %vm534_vm2, %v3470_v50  ;;  %3315 = vmatprep.mubr.msk.bf16.mxu1 %vm534_vm2, %v3471_v51 }
  0x75   : > { %3280 = vmatmul.mubr.msk.bf16.gmra.mxu0 %vm534_vm2, %v3472_v52  ;;  %3316 = vmatmul.mubr.msk.bf16.gmra.mxu1 %vm534_vm2, %v3473_v53 }
  0x76   : > { %3283 = vmatprep.mubr.msk.bf16.mxu0 %vm534_vm2, %v3474_v54  ;;  %3319 = vmatprep.mubr.msk.bf16.mxu1 %vm534_vm2, %v3475_v55 }
  0x7d   : > { %3284 = vmatmul.mubr.msk.bf16.gmra.mxu0 %vm534_vm2, %v3476_v56  ;;  %3320 = vmatmul.mubr.msk.bf16.gmra.mxu1 %vm534_vm2, %v3477_v57 }
  0x7e   : > { %3287 = vmatprep.mubr.msk.bf16.mxu0 %vm534_vm2, %v3478_v58  ;;  %3323 = vmatprep.mubr.msk.bf16.mxu1 %vm534_vm2, %v3479_v59 }
  0x85   : > { %3288 = vmatmul.mubr.msk.bf16.gmra.mxu0 %vm534_vm2, %v3480_v60  ;;  %3324 = vmatmul.mubr.msk.bf16.gmra.mxu1 %vm534_vm2, %v3481_v61 }
  0x86   : > { %3291 = vmatprep.mubr.msk.bf16.mxu0 %vm534_vm2, %v3482_v62  ;;  %3327 = vmatprep.mubr.msk.bf16.mxu1 %vm534_vm2, %v3483_v63 }
  0x8d   : > { %3292 = vmatmul.mubr.msk.bf16.gmra.mxu0 %vm534_vm2, %v3484_v0  ;;  %3328 = vmatmul.mubr.msk.bf16.gmra.mxu1 %vm534_vm2, %v3485_v1 }
  0x8e   : > { %3295 = vmatprep.mubr.msk.bf16.mxu0 %vm534_vm2, %v3486_v2  ;;  %3331 = vmatprep.mubr.msk.bf16.mxu1 %vm534_vm2, %v3487_v3 }
  0x95   : > { %3296 = vmatmul.mubr.msk.bf16.gmra.mxu0 %vm534_vm2, %v3488_v4  ;;  %3332 = vmatmul.mubr.msk.bf16.gmra.mxu1 %vm534_vm2, %v3489_v5 }
  0xdd   : > { %v3197_v7 = vpop.f32.mrf.mxu0  ;;  %v3233_v8 = vpop.f32.mrf.mxu1 }
  0xde   : > { %v633_v9 = vadd.f32 %v3197_v7, %v4068_v6  ;;  %v1082_v10 = vadd.f32 %v3233_v8, %v4068_v6 }
  0xdf   : > { %v624_v11 = vpop.f32.mrf.mxu0  ;;  %v1073_v12 = vpop.f32.mrf.mxu1 }
  0xe0   : > { %v753_v13 = vmul.f32 0.5, %v633_v9  ;;  %v1202_v14 = vmul.f32 0.5, %v1082_v10  ;;  %v625_v15 = vadd.f32 %v4068_v6, %v624_v11  ;;  %v1074_v16 = vadd.f32 %v4068_v6, %v1073_v12 }
  0xe1   : > { %v3198_v17 = vpop.f32.mrf.mxu0  ;;  %v3234_v18 = vpop.f32.mrf.mxu1 }
  0xe2   : > { %3490 = vtanh.f32 %v753_v13  ;;  %v751_v19 = vmul.f32 0.5, %v625_v15  ;;  %v1200_v20 = vmul.f32 0.5, %v1074_v16  ;;  %v636_v21 = vadd.f32 %v3198_v17, %v4068_v6 }
  0xe3   : > { %3492 = vtanh.f32 %v1202_v14  ;;  %v1085_v22 = vadd.f32 %v3234_v18, %v4068_v6  ;;  %v627_v23 = vpop.f32.mrf.mxu0  ;;  %v1076_v24 = vpop.f32.mrf.mxu1 }
  0xe4   : > { %3494 = vtanh.f32 %v751_v19  ;;  %v754_v25 = vmul.f32 0.5, %v636_v21  ;;  %v628_v26 = vadd.f32 %v4068_v6, %v627_v23  ;;  %v1077_v27 = vadd.f32 %v4068_v6, %v1076_v24 }
  0xe5   : > { %3496 = vtanh.f32 %v1200_v20  ;;  %v1203_v28 = vmul.f32 0.5, %v1085_v22  ;;  %v3201_v29 = vpop.f32.mrf.mxu0  ;;  %v3237_v30 = vpop.f32.mrf.mxu1 }
  0xe6   : > { %3498 = vtanh.f32 %v754_v25  ;;  %v752_v31 = vmul.f32 0.5, %v628_v26  ;;  %v1201_v32 = vmul.f32 0.5, %v1077_v27  ;;  %v649_v33 = vadd.f32 %v3201_v29, %v4068_v6 }
  0xe7   : > { %3500 = vtanh.f32 %v1203_v28  ;;  %v1098_v34 = vadd.f32 %v3237_v30, %v4068_v6  ;;  %v640_v35 = vpop.f32.mrf.mxu0  ;;  %v1089_v36 = vpop.f32.mrf.mxu1 }
  0xe8   : > { %3502 = vtanh.f32 %v752_v31  ;;  %v757_v37 = vmul.f32 0.5, %v649_v33  ;;  %v641_v38 = vadd.f32 %v4068_v6, %v640_v35  ;;  %v1090_v39 = vadd.f32 %v4068_v6, %v1089_v36 }
  0xe9   : > { %3504 = vtanh.f32 %v1201_v32  ;;  %v1206_v40 = vmul.f32 0.5, %v1098_v34  ;;  %v3202_v41 = vpop.f32.mrf.mxu0  ;;  %v3238_v42 = vpop.f32.mrf.mxu1 }
  0xea   : > { %3506 = vtanh.f32 %v757_v37  ;;  %v755_v43 = vmul.f32 0.5, %v641_v38  ;;  %v1204_v44 = vmul.f32 0.5, %v1090_v39  ;;  %v652_v45 = vadd.f32 %v3202_v41, %v4068_v6 }
  0xeb   : > { %3508 = vtanh.f32 %v1206_v40  ;;  %v1101_v46 = vadd.f32 %v3238_v42, %v4068_v6  ;;  %v643_v47 = vpop.f32.mrf.mxu0  ;;  %v1092_v48 = vpop.f32.mrf.mxu1 }
  0xec   : > { %3510 = vtanh.f32 %v755_v43  ;;  %v758_v49 = vmul.f32 0.5, %v652_v45  ;;  %v644_v50 = vadd.f32 %v4068_v6, %v643_v47  ;;  %v1093_v51 = vadd.f32 %v4068_v6, %v1092_v48 }
  0xed   : > { %3512 = vtanh.f32 %v1204_v44  ;;  %v1207_v52 = vmul.f32 0.5, %v1101_v46  ;;  %v3205_v53 = vpop.f32.mrf.mxu0  ;;  %v3241_v54 = vpop.f32.mrf.mxu1 }
  0xee   : > { %3514 = vtanh.f32 %v758_v49  ;;  %v756_v55 = vmul.f32 0.5, %v644_v50  ;;  %v1205_v56 = vmul.f32 0.5, %v1093_v51  ;;  %v665_v57 = vadd.f32 %v3205_v53, %v4068_v6 }
  0xef   : > { %v3491_v58 = vpop.eup %3490  ;;  %3516 = vtanh.f32 %v1207_v52  ;;  %v1114_v59 = vadd.f32 %v3241_v54, %v4068_v6  ;;  %v656_v60 = vpop.f32.mrf.mxu0 }
  0xf0   : > { %v1105_v61 = vpop.f32.mrf.mxu1  ;;  %v3493_v62 = vpop.eup %3492  ;;  %v817_v63 = vadd.f32 1.0, %v3491_v58  ;;  %3518 = vtanh.f32 %v756_v55  ;;  %v761_v0 = vmul.f32 0.5, %v665_v57  ;;  %v657_v1 = vadd.f32 %v4068_v6, %v656_v60 }
  0xf1   : > { %v3495_v2 = vpop.eup %3494  ;;  %v1266_v3 = vadd.f32 1.0, %v3493_v62  ;;  %3520 = vtanh.f32 %v1205_v56  ;;  %v1210_v4 = vmul.f32 0.5, %v1114_v59  ;;  %v1106_v5 = vadd.f32 %v4068_v6, %v1105_v61  ;;  %v3206_v7 = vpop.f32.mrf.mxu0 }
  0xf2   : > { %v3242_v8 = vpop.f32.mrf.mxu1  ;;  %v3497_v9 = vpop.eup %3496  ;;  %v849_v10 = vmul.f32 0.5, %v817_v63  ;;  %v815_v11 = vadd.f32 1.0, %v3495_v2  ;;  %3522 = vtanh.f32 %v761_v0  ;;  %v759_v12 = vmul.f32 0.5, %v657_v1 }
  0xf3   : > { %v3499_v13 = vpop.eup %3498  ;;  %v1298_v14 = vmul.f32 0.5, %v1266_v3  ;;  %v1264_v15 = vadd.f32 1.0, %v3497_v9  ;;  %3524 = vtanh.f32 %v1210_v4  ;;  %v1208_v16 = vmul.f32 0.5, %v1106_v5  ;;  %v659_v17 = vpop.f32.mrf.mxu0 }
  0xf4   : > { %v1108_v18 = vpop.f32.mrf.mxu1  ;;  %v3501_v19 = vpop.eup %3500  ;;  %v847_v20 = vmul.f32 0.5, %v815_v11  ;;  %v818_v21 = vadd.f32 1.0, %v3499_v13  ;;  %3526 = vtanh.f32 %v759_v12  ;;  %v668_v22 = vadd.f32 %v3206_v7, %v4068_v6 }
  0xf5   : > { %v3503_v23 = vpop.eup %3502  ;;  %v4091_v24 = vadd.f32 %v1298_v14, %v849_v10  ;;  %v1296_v25 = vmul.f32 0.5, %v1264_v15  ;;  %v1267_v26 = vadd.f32 1.0, %v3501_v19  ;;  %3528 = vtanh.f32 %v1208_v16  ;;  %v3209_v27 = vpop.f32.mrf.mxu0 }
  0xf6   : > { %v3245_v28 = vpop.f32.mrf.mxu1  ;;  %v3505_v29 = vpop.eup %3504  ;;  %v850_v30 = vmul.f32 0.5, %v818_v21  ;;  %v816_v31 = vadd.f32 1.0, %v3503_v23  ;;  %v762_v32 = vmul.f32 0.5, %v668_v22  ;;  %v1117_v33 = vadd.f32 %v3242_v8, %v4068_v6 }
  0xf7   : > { %v3507_v34 = vpop.eup %3506  ;;  %v4094_v35 = vadd.f32 %v1296_v25, %v847_v20  ;;  %v1299_v36 = vmul.f32 0.5, %v1267_v26  ;;  %v1265_v37 = vadd.f32 1.0, %v3505_v29  ;;  %v660_v38 = vadd.f32 %v4068_v6, %v659_v17  ;;  %v672_v39 = vpop.f32.mrf.mxu0 }
  0xf8   : > { %v4097_v40 = vpop.f32.mrf.mxu1  ;;  %v3509_v41 = vpop.eup %3508  ;;  %v848_v42 = vmul.f32 0.5, %v816_v31  ;;  %v821_v43 = vadd.f32 1.0, %v3507_v34  ;;  %3530 = vtanh.f32 %v762_v32  ;;  %v1211_v44 = vmul.f32 0.5, %v1117_v33 }
  0xf9   : > { %v3511_v45 = vpop.eup %3510  ;;  %v4099_v46 = vadd.f32 %v1299_v36, %v850_v30  ;;  %v1297_v47 = vmul.f32 0.5, %v1265_v37  ;;  %v1270_v48 = vadd.f32 1.0, %v3509_v41  ;;  %v760_v49 = vmul.f32 0.5, %v660_v38  ;;  %v3210_v50 = vpop.f32.mrf.mxu0 }
  0xfa   : > { %v4101_v51 = vpop.f32.mrf.mxu1  ;;  %v3513_v52 = vpop.eup %3512  ;;  %v853_v53 = vmul.f32 0.5, %v821_v43  ;;  %v819_v54 = vadd.f32 1.0, %v3511_v45  ;;  %3532 = vtanh.f32 %v1211_v44  ;;  %v1109_v55 = vadd.f32 %v4068_v6, %v1108_v18 }
  0xfb   : > { %v3515_v56 = vpop.eup %3514  ;;  %v4104_v57 = vadd.f32 %v1297_v47, %v848_v42  ;;  %v1302_v58 = vmul.f32 0.5, %v1270_v48  ;;  %v1268_v59 = vadd.f32 1.0, %v3513_v52  ;;  %3534 = vtanh.f32 %v760_v49  ;;  %v675_v60 = vpop.f32.mrf.mxu0 }
  0xfc   : > { %v1124_v61 = vpop.f32.mrf.mxu1  ;;  %v3517_v62 = vpop.eup %3516  ;;  %v851_v63 = vmul.f32 0.5, %v819_v54  ;;  %v822_v0 = vadd.f32 1.0, %v3515_v56  ;;  %v1209_v1 = vmul.f32 0.5, %v1109_v55  ;;  %v681_v2 = vadd.f32 %v3209_v27, %v4068_v6 }
  0xfd   : > { %v3519_v3 = vpop.eup %3518  ;;  %v4107_v4 = vadd.f32 %v1302_v58, %v853_v53  ;;  %v1300_v5 = vmul.f32 0.5, %v1268_v59  ;;  %v1271_v7 = vadd.f32 1.0, %v3517_v62  ;;  %v1130_v8 = vadd.f32 %v3245_v28, %v4068_v6  ;;  %v3213_v9 = vpop.f32.mrf.mxu0 }
  0xfe   : > { %v4110_v10 = vpop.f32.mrf.mxu1  ;;  %v3521_v11 = vpop.eup %3520  ;;  %v854_v12 = vmul.f32 0.5, %v822_v0  ;;  %v820_v13 = vadd.f32 1.0, %v3519_v3  ;;  %3536 = vtanh.f32 %v1209_v1  ;;  %v765_v14 = vmul.f32 0.5, %v681_v2 }
  0xff   : > { %v3523_v15 = vpop.eup %3522  ;;  %v4112_v16 = vadd.f32 %v1300_v5, %v851_v63  ;;  %v1303_v17 = vmul.f32 0.5, %v1271_v7  ;;  %v1269_v18 = vadd.f32 1.0, %v3521_v11  ;;  %v1214_v19 = vmul.f32 0.5, %v1130_v8  ;;  %v688_v20 = vpop.f32.mrf.mxu0 }
 0x100   : > { %v1137_v21 = vpop.f32.mrf.mxu1  ;;  %v3525_v22 = vpop.eup %3524  ;;  %v852_v23 = vmul.f32 0.5, %v820_v13  ;;  %v825_v25 = vadd.f32 1.0, %v3523_v15  ;;  %3538 = vtanh.f32 %v765_v14  ;;  %v673_v26 = vadd.f32 %v4068_v6, %v672_v39 }
 0x101   : > { %v3527_v27 = vpop.eup %3526  ;;  %v4115_v28 = vadd.f32 %v1303_v17, %v854_v12  ;;  %v1301_v29 = vmul.f32 0.5, %v1269_v18  ;;  %v1274_v30 = vadd.f32 1.0, %v3525_v22  ;;  %3540 = vtanh.f32 %v1214_v19  ;;  %v3214_v31 = vpop.f32.mrf.mxu0 }
 0x102   : > { %v4117_v32 = vpop.f32.mrf.mxu1  ;;  %v3529_v33 = vpop.eup %3528  ;;  %v857_v34 = vmul.f32 0.5, %v825_v25  ;;  %v823_v36 = vadd.f32 1.0, %v3527_v27  ;;  %v763_v37 = vmul.f32 0.5, %v673_v26  ;;  %v1122_v38 = vadd.f32 %v4068_v6, %v4097_v40 }
 0x103   : > { %v4121_v41 = vadd.f32 %v1301_v29, %v852_v23  ;;  %v1306_v42 = vmul.f32 0.5, %v1274_v30  ;;  %v1272_v39 = vadd.f32 1.0, %v3529_v33  ;;  %v684_v43 = vadd.f32 %v3210_v50, %v4068_v6  ;;  %v691_v44 = vpop.f32.mrf.mxu0 }
 0x104   : > { %v1140_v45 = vpop.f32.mrf.mxu1  ;;  %v855_v47 = vmul.f32 0.5, %v823_v36  ;;  %3542 = vtanh.f32 %v763_v37  ;;  %v1212_v48 = vmul.f32 0.5, %v1122_v38  ;;  %v1133_v49 = vadd.f32 %v4101_v51, %v4068_v6 }
 0x105   : > { %v3531_v52 = vpop.eup %3530  ;;  %v4126_v53 = vadd.f32 %v1306_v42, %v857_v34  ;;  %v1304_v54 = vmul.f32 0.5, %v1272_v39  ;;  %v766_v55 = vmul.f32 0.5, %v684_v43  ;;  %v676_v40 = vadd.f32 %v4068_v6, %v675_v60  ;;  %v4129_v56 = vpop.f32.mrf.mxu0 }
 0x106   : > { %v4131_v58 = vpop.f32.mrf.mxu1  ;;  %v826_v50 = vadd.f32 1.0, %v3531_v52  ;;  %3544 = vtanh.f32 %v1212_v48  ;;  %v1215_v59 = vmul.f32 0.5, %v1133_v49  ;;  %v1125_v62 = vadd.f32 %v4068_v6, %v1124_v61 }
 0x107   : > { %v3533_v63 = vpop.eup %3532  ;;  %v4134_v0 = vadd.f32 %v1304_v54, %v855_v47  ;;  %3546 = vtanh.f32 %v766_v55  ;;  %v764_v51 = vmul.f32 0.5, %v676_v40  ;;  %v697_v1 = vadd.f32 %v3213_v9, %v4068_v6  ;;  %v704_v2 = vpop.f32.mrf.mxu0 }
 0x108   : > { %v1153_v3 = vpop.f32.mrf.mxu1  ;;  %v3535_v5 = vpop.eup %3534  ;;  %v858_v60 = vmul.f32 0.5, %v826_v50  ;;  %v1275_v7 = vadd.f32 1.0, %v3533_v63  ;;  %3548 = vtanh.f32 %v1215_v59  ;;  %v1213_v8 = vmul.f32 0.5, %v1125_v62 }
 0x109   : > { %v824_v11 = vadd.f32 1.0, %v3535_v5  ;;  %3550 = vtanh.f32 %v764_v51  ;;  %v769_v12 = vmul.f32 0.5, %v697_v1  ;;  %v1146_v61 = vadd.f32 %v4110_v10, %v4068_v6  ;;  %v4139_v13 = vpop.f32.mrf.mxu0 }
 0x10a   : > { %v4141_v14 = vpop.f32.mrf.mxu1  ;;  %v1307_v15 = vmul.f32 0.5, %v1275_v7  ;;  %3552 = vtanh.f32 %v1213_v8  ;;  %v689_v9 = vadd.f32 %v4068_v6, %v688_v20  ;;  %v1138_v17 = vadd.f32 %v4068_v6, %v1137_v21 }
 0x10b   : > { %v3537_v18 = vpop.eup %3536  ;;  %v856_v19 = vmul.f32 0.5, %v824_v11  ;;  %3554 = vtanh.f32 %v769_v12  ;;  %v1218_v22 = vmul.f32 0.5, %v1146_v61  ;;  %v700_v23 = vadd.f32 %v3214_v31, %v4068_v6  ;;  %v707_v25 = vpop.f32.mrf.mxu0 }
 0x10c   : > { %v4146_v26 = vpop.f32.mrf.mxu1  ;;  %v4148_v10 = vadd.f32 %v1307_v15, %v858_v60  ;;  %v1273_v27 = vadd.f32 1.0, %v3537_v18  ;;  %v767_v29 = vmul.f32 0.5, %v689_v9  ;;  %v1216_v30 = vmul.f32 0.5, %v1138_v17 }
 0x10d   : > { %v3539_v33 = vpop.eup %3538  ;;  %3556 = vtanh.f32 %v1218_v22  ;;  %v770_v34 = vmul.f32 0.5, %v700_v23  ;;  %v1149_v20 = vadd.f32 %v4117_v32, %v4068_v6  ;;  %v692_v21 = vadd.f32 %v4068_v6, %v691_v44  ;;  %v4153_v36 = vpop.f32.mrf.mxu0 }
 0x10e   : > { %v4155_v37 = vpop.f32.mrf.mxu1  ;;  %v3541_v31 = vpop.eup %3540  ;;  %v1305_v38 = vmul.f32 0.5, %v1273_v27  ;;  %v829_v42 = vadd.f32 1.0, %v3539_v33  ;;  %3558 = vtanh.f32 %v767_v29  ;;  %v1141_v39 = vadd.f32 %v4068_v6, %v1140_v45 }
 0x10f   : > { %v1278_v43 = vadd.f32 1.0, %v3541_v31  ;;  %3560 = vtanh.f32 %v1216_v30  ;;  %v1219_v47 = vmul.f32 0.5, %v1149_v20  ;;  %v768_v48 = vmul.f32 0.5, %v692_v21  ;;  %v4158_v49 = vpop.f32.mrf.mxu0 }
 0x110   : > { %v4160_v52 = vpop.f32.mrf.mxu1  ;;  %v4162_v32 = vadd.f32 %v1305_v38, %v856_v19  ;;  %v861_v44 = vmul.f32 0.5, %v829_v42  ;;  %3562 = vtanh.f32 %v770_v34  ;;  %v1217_v54 = vmul.f32 0.5, %v1141_v39 }
 0x111   : > { %v3543_v55 = vpop.eup %3542  ;;  %v1310_v40 = vmul.f32 0.5, %v1278_v43  ;;  %3564 = vtanh.f32 %v1219_v47  ;;  %v713_v50 = vadd.f32 %v4129_v56, %v4068_v6  ;;  %v1162_v45 = vadd.f32 %v4131_v58, %v4068_v6  ;;  %v4168_v59 = vpop.f32.mrf.mxu0 }
 0x112   : > { %v4170_v62 = vpop.f32.mrf.mxu1  ;;  %v827_v63 = vadd.f32 1.0, %v3543_v55  ;;  %3566 = vtanh.f32 %v768_v48  ;;  %v705_v51 = vadd.f32 %v4068_v6, %v704_v2  ;;  %v1154_v1 = vadd.f32 %v4068_v6, %v1153_v3 }
 0x113   : > { %v3545_v5 = vpop.eup %3544  ;;  %v4174_v60 = vadd.f32 %v1310_v40, %v861_v44  ;;  %3568 = vtanh.f32 %v1217_v54  ;;  %v773_v7 = vmul.f32 0.5, %v713_v50  ;;  %v1222_v8 = vmul.f32 0.5, %v1162_v45  ;;  %v4176_v56 = vpop.f32.mrf.mxu0 }
 0x114   : > { %v4178_v11 = vpop.f32.mrf.mxu1  ;;  %v3547_v58 = vpop.eup %3546  ;;  %v859_v12 = vmul.f32 0.5, %v827_v63  ;;  %v1276_v61 = vadd.f32 1.0, %v3545_v5  ;;  %v771_v15 = vmul.f32 0.5, %v705_v51  ;;  %v1220_v9 = vmul.f32 0.5, %v1154_v1 }
 0x115   : > { %v3549_v17 = vpop.eup %3548  ;;  %v830_v18 = vadd.f32 1.0, %v3547_v58  ;;  %3570 = vtanh.f32 %v773_v7  ;;  %v716_v2 = vadd.f32 %v4139_v13, %v4068_v6  ;;  %v1165_v3 = vadd.f32 %v4141_v14, %v4068_v6  ;;  %v4184_v19 = vpop.f32.mrf.mxu0 }
 0x116   : > { %v4186_v22 = vpop.f32.mrf.mxu1  ;;  %v3551_v23 = vpop.eup %3550  ;;  %v1308_v27 = vmul.f32 0.5, %v1276_v61  ;;  %v1279_v29 = vadd.f32 1.0, %v3549_v17  ;;  %3572 = vtanh.f32 %v1222_v8  ;;  %v708_v30 = vadd.f32 %v4068_v6, %v707_v25 }
 0x117   : > { %v3553_v33 = vpop.eup %3552  ;;  %v862_v34 = vmul.f32 0.5, %v830_v18  ;;  %v828_v20 = vadd.f32 1.0, %v3551_v23  ;;  %3574 = vtanh.f32 %v771_v15  ;;  %v774_v21 = vmul.f32 0.5, %v716_v2  ;;  %v4189_v31 = vpop.f32.mrf.mxu0 }
 0x118   : > { %v4191_v13 = vpop.f32.mrf.mxu1  ;;  %v3555_v14 = vpop.eup %3554  ;;  %v4193_v38 = vadd.f32 %v1308_v27, %v859_v12  ;;  %v1311_v42 = vmul.f32 0.5, %v1279_v29  ;;  %v1277_v39 = vadd.f32 1.0, %v3553_v33  ;;  %3576 = vtanh.f32 %v1220_v9 }
 0x119   : > { %v860_v43 = vmul.f32 0.5, %v828_v20  ;;  %v833_v47 = vadd.f32 1.0, %v3555_v14  ;;  %3578 = vtanh.f32 %v774_v21  ;;  %v1223_v48 = vmul.f32 0.5, %v1165_v3  ;;  %v4195_v25 = vpop.f32.mrf.mxu0 }
 0x11a   : > { %v4197_v44 = vpop.f32.mrf.mxu1  ;;  %v3557_v54 = vpop.eup %3556  ;;  %v4199_v55 = vadd.f32 %v1311_v42, %v862_v34  ;;  %v1309_v40 = vmul.f32 0.5, %v1277_v39  ;;  %v772_v50 = vmul.f32 0.5, %v708_v30  ;;  %v1157_v45 = vadd.f32 %v4068_v6, %v4146_v26 }
 0x11b   : > { %v3559_v63 = vpop.eup %3558  ;;  %v865_v51 = vmul.f32 0.5, %v833_v47  ;;  %v1282_v1 = vadd.f32 1.0, %v3557_v54  ;;  %3580 = vtanh.f32 %v1223_v48  ;;  %v729_v5 = vadd.f32 %v4153_v36, %v4068_v6  ;;  %v4205_v7 = vpop.f32.mrf.mxu0 }
 0x11c   : > { %v4207_v8 = vpop.f32.mrf.mxu1  ;;  %v3561_v58 = vpop.eup %3560  ;;  %v4209_v12 = vadd.f32 %v1309_v40, %v860_v43  ;;  %v831_v61 = vadd.f32 1.0, %v3559_v63  ;;  %3582 = vtanh.f32 %v772_v50  ;;  %v1221_v15 = vmul.f32 0.5, %v1157_v45 }
 0x11d   : > { %v3563_v9 = vpop.eup %3562  ;;  %v1314_v17 = vmul.f32 0.5, %v1282_v1  ;;  %v1280_v26 = vadd.f32 1.0, %v3561_v58  ;;  %v777_v18 = vmul.f32 0.5, %v729_v5  ;;  %v1178_v2 = vadd.f32 %v4155_v37, %v4068_v6  ;;  %v4213_v3 = vpop.f32.mrf.mxu0 }
 0x11e   : > { %v4215_v36 = vpop.f32.mrf.mxu1  ;;  %v3565_v23 = vpop.eup %3564  ;;  %v863_v27 = vmul.f32 0.5, %v831_v61  ;;  %v834_v29 = vadd.f32 1.0, %v3563_v9  ;;  %3584 = vtanh.f32 %v1221_v15  ;;  %v721_v30 = vadd.f32 %v4068_v6, %v4158_v49 }
 0x11f   : > { %v3567_v33 = vpop.eup %3566  ;;  %v4219_v34 = vadd.f32 %v1314_v17, %v865_v51  ;;  %v1312_v20 = vmul.f32 0.5, %v1280_v26  ;;  %v1283_v21 = vadd.f32 1.0, %v3565_v23  ;;  %3586 = vtanh.f32 %v777_v18  ;;  %v4221_v14 = vpop.f32.mrf.mxu0 }
 0x120   : > { %v4223_v37 = vpop.f32.mrf.mxu1  ;;  %v3569_v42 = vpop.eup %3568  ;;  %v866_v39 = vmul.f32 0.5, %v834_v29  ;;  %v832_v43 = vadd.f32 1.0, %v3567_v33  ;;  %v1226_v47 = vmul.f32 0.5, %v1178_v2  ;;  %v775_v48 = vmul.f32 0.5, %v721_v30 }
 0x121   : > { %v4225_v54 = vadd.f32 %v1312_v20, %v863_v27  ;;  %v1315_v40 = vmul.f32 0.5, %v1283_v21  ;;  %v1281_v50 = vadd.f32 1.0, %v3569_v42  ;;  %v1170_v49 = vadd.f32 %v4068_v6, %v4160_v52  ;;  %v4229_v45 = vpop.f32.mrf.mxu0 }
 0x122   : > { %v4231_v63 = vpop.f32.mrf.mxu1  ;;  %v3571_v51 = vpop.eup %3570  ;;  %v864_v1 = vmul.f32 0.5, %v832_v43  ;;  %3588 = vtanh.f32 %v1226_v47  ;;  %v732_v5 = vadd.f32 %v4168_v59, %v4068_v6  ;;  %v1181_v58 = vadd.f32 %v4170_v62, %v4068_v6 }
 0x123   : > { %v3573_v61 = vpop.eup %3572  ;;  %v4237_v15 = vadd.f32 %v1315_v40, %v866_v39  ;;  %v1313_v9 = vmul.f32 0.5, %v1281_v50  ;;  %v837_v17 = vadd.f32 1.0, %v3571_v51  ;;  %3590 = vtanh.f32 %v775_v48  ;;  %v4239_v27 = vpop.f32.mrf.mxu0 }
 0x124   : > { %v3575_v52 = vpop.eup %3574  ;;  %v1286_v26 = vadd.f32 1.0, %v3573_v61  ;;  %v1224_v18 = vmul.f32 0.5, %v1170_v49  ;;  %v778_v2 = vmul.f32 0.5, %v732_v5  ;;  %v1227_v23 = vmul.f32 0.5, %v1181_v58  ;;  %v4241_v29 = vpop.f32.mrf.mxu1 }
 0x125   : > { %v3577_v30 = vpop.eup %3576  ;;  %v4243_v59 = vadd.f32 %v1313_v9, %v864_v1  ;;  %v869_v33 = vmul.f32 0.5, %v837_v17  ;;  %v835_v62 = vadd.f32 1.0, %v3575_v52  ;;  %v724_v20 = vadd.f32 %v4068_v6, %v4176_v56  ;;  %v4251_v5 = vpop.f32.mrf.mxu0 }
 0x126   : > { %v3579_v21 = vpop.eup %3578  ;;  %v1318_v42 = vmul.f32 0.5, %v1286_v26  ;;  %v1284_v39 = vadd.f32 1.0, %v3577_v30  ;;  %3592 = vtanh.f32 %v1224_v18  ;;  %v1173_v43 = vadd.f32 %v4068_v6, %v4178_v11  ;;  %v4253_v56 = vpop.f32.mrf.mxu1 }
 0x127   : > { %v867_v47 = vmul.f32 0.5, %v835_v62  ;;  %v838_v48 = vadd.f32 1.0, %v3579_v21  ;;  %3594 = vtanh.f32 %v778_v2  ;;  %v776_v40 = vmul.f32 0.5, %v724_v20 }
 0x128   : > { %v3581_v50 = vpop.eup %3580  ;;  %v4249_v49 = vadd.f32 %v1318_v42, %v869_v33  ;;  %v1316_v51 = vmul.f32 0.5, %v1284_v39  ;;  %3596 = vtanh.f32 %v1227_v23  ;;  %v1225_v1 = vmul.f32 0.5, %v1173_v43  ;;  %v4267_v39 = vpop.f32.mrf.mxu0 }
 0x129   : > { %v3583_v58 = vpop.eup %3582  ;;  %v870_v61 = vmul.f32 0.5, %v838_v48  ;;  %v1287_v9 = vadd.f32 1.0, %v3581_v50  ;;  %3598 = vtanh.f32 %v776_v40  ;;  %v745_v11 = vadd.f32 %v4184_v19, %v4068_v6  ;;  %v4269_v43 = vpop.f32.mrf.mxu1 }
 0x12a   : > { %v4257_v17 = vadd.f32 %v1316_v51, %v867_v47  ;;  %v836_v52 = vadd.f32 1.0, %v3583_v58  ;;  %3600 = vtanh.f32 %v1225_v1  ;;  %v1194_v26 = vadd.f32 %v4186_v22, %v4068_v6 }
 0x12b   : > { %v3585_v18 = vpop.eup %3584  ;;  %v1319_v2 = vmul.f32 0.5, %v1287_v9  ;;  %v781_v23 = vmul.f32 0.5, %v745_v11  ;;  %v737_v30 = vadd.f32 %v4068_v6, %v4189_v31  ;;  %v1186_v33 = vadd.f32 %v4068_v6, %v4191_v13 }
 0x12c   : > { %v3587_v62 = vpop.eup %3586  ;;  %v868_v20 = vmul.f32 0.5, %v836_v52  ;;  %v1285_v21 = vadd.f32 1.0, %v3585_v18  ;;  %v1230_v19 = vmul.f32 0.5, %v1194_v26  ;;  %v748_v42 = vadd.f32 %v4195_v25, %v4068_v6  ;;  %v4281_v52 = vpop.f32.mrf.mxu0 }
 0x12d   : > { %v4271_v22 = vadd.f32 %v1319_v2, %v870_v61  ;;  %v841_v47 = vadd.f32 1.0, %v3587_v62  ;;  %3602 = vtanh.f32 %v781_v23  ;;  %v779_v48 = vmul.f32 0.5, %v737_v30  ;;  %v4283_v26 = vpop.f32.mrf.mxu1 }
 0x12e   : > { %v1317_v31 = vmul.f32 0.5, %v1285_v21  ;;  %3604 = vtanh.f32 %v1230_v19  ;;  %v1228_v40 = vmul.f32 0.5, %v1186_v33  ;;  %v782_v13 = vmul.f32 0.5, %v748_v42 }
 0x12f   : > { %v3589_v50 = vpop.eup %3588  ;;  %v873_v51 = vmul.f32 0.5, %v841_v47  ;;  %3606 = vtanh.f32 %v779_v48  ;;  %v1197_v1 = vadd.f32 %v4197_v44, %v4068_v6  ;;  %v740_v25 = vadd.f32 %v4068_v6, %v4205_v7 }
 0x130   : > { %v3591_v58 = vpop.eup %3590  ;;  %v4277_v9 = vadd.f32 %v1317_v31, %v868_v20  ;;  %v1290_v61 = vadd.f32 1.0, %v3589_v50  ;;  %3608 = vtanh.f32 %v1228_v40  ;;  %v1189_v11 = vadd.f32 %v4068_v6, %v4207_v8  ;;  %v4295_v31 = vpop.f32.mrf.mxu0 }
 0x131   : > { %v839_v18 = vadd.f32 1.0, %v3591_v58  ;;  %3610 = vtanh.f32 %v782_v13  ;;  %v1231_v2 = vmul.f32 0.5, %v1197_v1  ;;  %v780_v23 = vmul.f32 0.5, %v740_v25 }
 0x132   : > { %v1322_v44 = vmul.f32 0.5, %v1290_v61  ;;  %v1229_v30 = vmul.f32 0.5, %v1189_v11  ;;  %v1563_v7 = vadd.f32 %v4213_v3, %v4068_v6  ;;  %v2044_v33 = vadd.f32 %v4215_v36, %v4068_v6  ;;  %v4297_v3 = vpop.f32.mrf.mxu1 }
 0x133   : > { %v3593_v62 = vpop.eup %3592  ;;  %v871_v20 = vmul.f32 0.5, %v839_v18  ;;  %3612 = vtanh.f32 %v1231_v2  ;;  %v1555_v8 = vadd.f32 %v4068_v6, %v4221_v14  ;;  %v2036_v21 = vadd.f32 %v4068_v6, %v4223_v37 }
 0x134   : > { %v3595_v19 = vpop.eup %3594  ;;  %v4293_v42 = vadd.f32 %v1322_v44, %v873_v51  ;;  %v1288_v47 = vadd.f32 1.0, %v3593_v62  ;;  %3614 = vtanh.f32 %v780_v23  ;;  %v1683_v48 = vmul.f32 0.5, %v1563_v7  ;;  %v4303_v44 = vpop.f32.mrf.mxu0 }
 0x135   : > { %v3597_v36 = vpop.eup %3596  ;;  %v842_v40 = vadd.f32 1.0, %v3595_v19  ;;  %3616 = vtanh.f32 %v1229_v30  ;;  %v2164_v13 = vmul.f32 0.5, %v2044_v33  ;;  %v1681_v50 = vmul.f32 0.5, %v1555_v8  ;;  %v4305_v30 = vpop.f32.mrf.mxu1 }
 0x136   : > { %v3599_v1 = vpop.eup %3598  ;;  %v1320_v14 = vmul.f32 0.5, %v1288_v47  ;;  %v1291_v25 = vadd.f32 1.0, %v3597_v36  ;;  %3618 = vtanh.f32 %v1683_v48  ;;  %v2162_v37 = vmul.f32 0.5, %v2036_v21 }
 0x137   : > { %v3601_v58 = vpop.eup %3600  ;;  %v874_v51 = vmul.f32 0.5, %v842_v40  ;;  %v840_v61 = vadd.f32 1.0, %v3599_v1  ;;  %3620 = vtanh.f32 %v2164_v13  ;;  %v1566_v11 = vadd.f32 %v4229_v45, %v4068_v6 }
 0x138   : > { %v4301_v18 = vadd.f32 %v1320_v14, %v871_v20  ;;  %v1323_v2 = vmul.f32 0.5, %v1291_v25  ;;  %v1289_v23 = vadd.f32 1.0, %v3601_v58  ;;  %3622 = vtanh.f32 %v1681_v50  ;;  %v4319_v25 = vpop.f32.mrf.mxu0 }
 0x139   : > { %v872_v7 = vmul.f32 0.5, %v840_v61  ;;  %3624 = vtanh.f32 %v2162_v37  ;;  %v1684_v33 = vmul.f32 0.5, %v1566_v11  ;;  %v2047_v62 = vadd.f32 %v4231_v63, %v4068_v6  ;;  %v4321_v37 = vpop.f32.mrf.mxu1 }
 0x13a   : > { %v3603_v8 = vpop.eup %3602  ;;  %v4309_v21 = vadd.f32 %v1323_v2, %v874_v51  ;;  %v1321_v19 = vmul.f32 0.5, %v1289_v23  ;;  %v1558_v45 = vadd.f32 %v4068_v6, %v4239_v27  ;;  %v2039_v20 = vadd.f32 %v4068_v6, %v4241_v29 }
 0x13b   : > { %v3605_v47 = vpop.eup %3604  ;;  %v845_v48 = vadd.f32 1.0, %v3603_v8  ;;  %3626 = vtanh.f32 %v1684_v33  ;;  %v2165_v36 = vmul.f32 0.5, %v2047_v62  ;;  %v1579_v40 = vadd.f32 %v4251_v5, %v4068_v6  ;;  %v4328_v33 = vld [vmem:[%s4722_s5] ss:$0 sm:$0xff] }
 0x13c   : > { %v3607_v13 = vpop.eup %3606  ;;  %v4317_v50 = vadd.f32 %v1321_v19, %v872_v7  ;;  %v1294_v63 = vadd.f32 1.0, %v3605_v47  ;;  %v1682_v1 = vmul.f32 0.5, %v1558_v45  ;;  %v2163_v14 = vmul.f32 0.5, %v2039_v20  ;;  %v4334_v47 = vpop.f32.mrf.mxu0 }
 0x13d   : > { %v3609_v27 = vpop.eup %3608  ;;  %v877_v58 = vmul.f32 0.5, %v845_v48  ;;  %v843_v29 = vadd.f32 1.0, %v3607_v13  ;;  %3628 = vtanh.f32 %v2165_v36  ;;  %v1687_v51 = vmul.f32 0.5, %v1579_v40 }
 0x13e   : > { %v3611_v61 = vpop.eup %3610  ;;  %v1326_v11 = vmul.f32 0.5, %v1294_v63  ;;  %v1292_v2 = vadd.f32 1.0, %v3609_v27  ;;  %3630 = vtanh.f32 %v1682_v1  ;;  %v2060_v5 = vadd.f32 %v4253_v56, %v4068_v6  ;;  %v4336_v6 = vpop.f32.mrf.mxu1 }
 0x13f   : > { %v875_v23 = vmul.f32 0.5, %v843_v29  ;;  %v846_v7 = vadd.f32 1.0, %v3611_v61  ;;  %3632 = vtanh.f32 %v2163_v14  ;;  %v1571_v62 = vadd.f32 %v4328_v33, %v4267_v39 }
 0x140   : > { %v3613_v8 = vpop.eup %3612  ;;  %v4332_v19 = vadd.f32 %v1326_v11, %v877_v58  ;;  %v1324_v45 = vmul.f32 0.5, %v1292_v2  ;;  %3634 = vtanh.f32 %v1687_v51  ;;  %v2168_v20 = vmul.f32 0.5, %v2060_v5 }
 0x141   : > { %v3615_v56 = vpop.eup %3614  ;;  %v878_v48 = vmul.f32 0.5, %v846_v7  ;;  %v1295_v36 = vadd.f32 1.0, %v3613_v8  ;;  %v1685_v40 = vmul.f32 0.5, %v1571_v62  ;;  %v2052_v13 = vadd.f32 %v4328_v33, %v4269_v43  ;;  %v4348_v7 = vpop.f32.mrf.mxu1 }
 0x142   : > { %v3617_v63 = vpop.eup %3616  ;;  %v4340_v1 = vadd.f32 %v1324_v45, %v875_v23  ;;  %v844_v39 = vadd.f32 1.0, %v3615_v56  ;;  %3636 = vtanh.f32 %v2168_v20  ;;  %v1582_v14 = vadd.f32 %v4328_v33, %v4281_v52  ;;  %v4346_v23 = vpop.f32.mrf.mxu0 }
 0x143   : > { %v3619_v27 = vpop.eup %3618  ;;  %v1327_v58 = vmul.f32 0.5, %v1295_v36  ;;  %v1293_v29 = vadd.f32 1.0, %v3617_v63  ;;  %3638 = vtanh.f32 %v1685_v40  ;;  %v2166_v51 = vmul.f32 0.5, %v2052_v13 }
 0x144   : > { %v3621_v61 = vpop.eup %3620  ;;  %v876_v11 = vmul.f32 0.5, %v844_v39  ;;  %v1747_v2 = vadd.f32 1.0, %v3619_v27  ;;  %v1688_v5 = vmul.f32 0.5, %v1582_v14  ;;  %v2063_v43 = vadd.f32 %v4328_v33, %v4283_v26 }
 0x145   : > { %v3623_v62 = vpop.eup %3622  ;;  %v4350_v8 = vadd.f32 %v1327_v58, %v878_v48  ;;  %v1325_v52 = vmul.f32 0.5, %v1293_v29  ;;  %v2228_v45 = vadd.f32 1.0, %v3621_v61  ;;  %3640 = vtanh.f32 %v2166_v51  ;;  %v4360_v29 = vpop.f32.mrf.mxu0 }
 0x146   : > { %v3625_v20 = vpop.eup %3624  ;;  %v1779_v56 = vmul.f32 0.5, %v1747_v2  ;;  %v1745_v36 = vadd.f32 1.0, %v3623_v62  ;;  %3642 = vtanh.f32 %v1688_v5  ;;  %v2169_v40 = vmul.f32 0.5, %v2063_v43  ;;  %v4362_v51 = vpop.f32.mrf.mxu1 }
 0x147   : > { %v4352_v13 = vadd.f32 %v1325_v52, %v876_v11  ;;  %v2260_v26 = vmul.f32 0.5, %v2228_v45  ;;  %v2226_v63 = vadd.f32 1.0, %v3625_v20  ;;  %v1574_v39 = vadd.f32 %v4328_v33, %v4295_v31 }
 0x148   : > { %v3627_v14 = vpop.eup %3626  ;;  %v1811_v48 = vadd.f32 %v1779_v56, %v4091_v24  ;;  %v1777_v27 = vmul.f32 0.5, %v1745_v36  ;;  %3644 = vtanh.f32 %v2169_v40  ;;  %v2055_v58 = vadd.f32 %v4328_v33, %v4297_v3 }
 0x149   : > { %v2258_v61 = vmul.f32 0.5, %v2226_v63  ;;  %v1748_v11 = vadd.f32 1.0, %v3627_v14  ;;  %v1686_v2 = vmul.f32 0.5, %v1574_v39  ;;  %v1595_v5 = vadd.f32 %v4328_v33, %v4303_v44  ;;  %v4371_v44 = vpop.f32.mrf.mxu0  ;;  %v4373_v14 = vpop.f32.mrf.mxu1 }
 0x14a   : > { %v3629_v43 = vpop.eup %3628  ;;  %v2292_v31 = vadd.f32 %v2260_v26, %v1811_v48  ;;  %v1809_v24 = vadd.f32 %v1777_v27, %v4094_v35  ;;  %v2167_v62 = vmul.f32 0.5, %v2055_v58  ;;  %v2076_v3 = vadd.f32 %v4328_v33, %v4305_v30 }
 0x14b   : > { %v3631_v52 = vpop.eup %3630  ;;  %v1780_v45 = vmul.f32 0.5, %v1748_v11  ;;  %v2229_v20 = vadd.f32 1.0, %v3629_v43  ;;  %3646 = vtanh.f32 %v1686_v2  ;;  %v1691_v56 = vmul.f32 0.5, %v1595_v5 }
 0x14c   : > { %v3633_v36 = vpop.eup %3632  ;;  %v2324_v40 = vmul.f32 0.25, %v2292_v31  ;;  %v2290_v63 = vadd.f32 %v2258_v61, %v1809_v24  ;;  %v1746_v39 = vadd.f32 1.0, %v3631_v52  ;;  %3648 = vtanh.f32 %v2167_v62 }
 0x14d   : > { %v3635_v35 = vpop.eup %3634  ;;  %v1812_v26 = vadd.f32 %v1780_v45, %v4099_v46  ;;  %v2261_v48 = vmul.f32 0.5, %v2229_v20  ;;  %v2227_v30 = vadd.f32 1.0, %v3633_v36  ;;  %3650 = vtanh.f32 %v1691_v56  ;;  %v4384_v56 = vpop.f32.mrf.mxu0 }
 0x14e   : > { %v3086_v27 = vpack.c.bf16 %v2324_v40, %v2324_v40  ;;  %v2322_v58 = vmul.f32 0.25, %v2290_v63  ;;  %v1778_v11 = vmul.f32 0.5, %v1746_v39  ;;  %v1751_v2 = vadd.f32 1.0, %v3635_v35  ;;  %v4386_v36 = vpop.f32.mrf.mxu1 }
 0x14f   : > { %v3637_v5 = vpop.eup %3636  ;;  %v2293_v43 = vadd.f32 %v2261_v48, %v1812_v26  ;;  %v2259_v61 = vmul.f32 0.5, %v2227_v30  ;;  %v2172_v31 = vmul.f32 0.5, %v2076_v3  ;;  %v1587_v24 = vadd.f32 %v4328_v33, %v4319_v25 }
 0x150   : > { %v3639_v62 = vpop.eup %3638  ;;  %2485 = vst.msk [vmem:[%s4379_s13 + $0x8] sm:$0xf] %vm2482_vm3, %v3086_v27  ;;  %v3084_v46 = vpack.c.bf16 %v2322_v58, %v2322_v58  ;;  %v1810_v52 = vadd.f32 %v1778_v11, %v4104_v57  ;;  %v1783_v45 = vmul.f32 0.5, %v1751_v2  ;;  %v2232_v20 = vadd.f32 1.0, %v3637_v5 }
 0x151   : > { %v2325_v3 = vmul.f32 0.25, %v2293_v43  ;;  %v1749_v40 = vadd.f32 1.0, %v3639_v62  ;;  %3652 = vtanh.f32 %v2172_v31  ;;  %v1689_v25 = vmul.f32 0.5, %v1587_v24  ;;  %v4393_v31 = vpop.f32.mrf.mxu0  ;;  %v4395_v24 = vpop.f32.mrf.mxu1 }
 0x152   : > { %v3641_v63 = vpop.eup %3640  ;;  %2483 = vst.msk [vmem:[%s4379_s13] sm:$0xf] %vm2482_vm3, %v3084_v46  ;;  %v2291_v39 = vadd.f32 %v2259_v61, %v1810_v52  ;;  %v1815_v35 = vadd.f32 %v1783_v45, %v4107_v4  ;;  %v2264_v26 = vmul.f32 0.5, %v2232_v20  ;;  %v2068_v57 = vadd.f32 %v4328_v33, %v4321_v37 }
 0x153   : > { %v3643_v48 = vpop.eup %3642  ;;  %v3087_v30 = vpack.c.bf16 %v2325_v3, %v2325_v3  ;;  %v1781_v27 = vmul.f32 0.5, %v1749_v40  ;;  %v2230_v58 = vadd.f32 1.0, %v3641_v63  ;;  %3654 = vtanh.f32 %v1689_v25 }
 0x154   : > { %v2323_v11 = vmul.f32 0.25, %v2291_v39  ;;  %v2296_v2 = vadd.f32 %v2264_v26, %v1815_v35  ;;  %v1752_v5 = vadd.f32 1.0, %v3643_v48  ;;  %v2170_v43 = vmul.f32 0.5, %v2068_v57  ;;  %v4411_v57 = vpop.f32.mrf.mxu1 }
 0x155   : > { %v3645_v61 = vpop.eup %3644  ;;  %2486 = vst.msk [vmem:[%s4379_s13 + $0xc] sm:$0xf] %vm2482_vm3, %v3087_v30  ;;  %v1813_v4 = vadd.f32 %v1781_v27, %v4112_v16  ;;  %v2262_v37 = vmul.f32 0.5, %v2230_v58  ;;  %v1598_v62 = vadd.f32 %v4328_v33, %v4334_v47  ;;  %v2079_v46 = vadd.f32 %v4328_v33, %v4336_v6  ;;  %v4409_v6 = vpop.f32.mrf.mxu0 }
 0x156   : > { %v3085_v52 = vpack.c.bf16 %v2323_v11, %v2323_v11  ;;  %v2328_v45 = vmul.f32 0.25, %v2296_v2  ;;  %v1784_v20 = vmul.f32 0.5, %v1752_v5  ;;  %v2233_v3 = vadd.f32 1.0, %v3645_v61 }
 0x157   : > { %v2294_v40 = vadd.f32 %v2262_v37, %v1813_v4  ;;  %3656 = vtanh.f32 %v2170_v43  ;;  %v1692_v25 = vmul.f32 0.5, %v1598_v62  ;;  %v2173_v63 = vmul.f32 0.5, %v2079_v46 }
 0x158   : > { %v3647_v39 = vpop.eup %3646  ;;  %2484 = vst.msk [vmem:[%s4379_s13 + $0x4] sm:$0xf] %vm2482_vm3, %v3085_v52  ;;  %v3090_v16 = vpack.c.bf16 %v2328_v45, %v2328_v45  ;;  %v1816_v35 = vadd.f32 %v1784_v20, %v4115_v28  ;;  %v2265_v26 = vmul.f32 0.5, %v2233_v3  ;;  %v1590_v47 = vadd.f32 %v4328_v33, %v4346_v23  ;;  %v1618_v52 = vpop.f32.mrf.mxu0 }
 0x159   : > { %v3649_v48 = vpop.eup %3648  ;;  %v2326_v30 = vmul.f32 0.25, %v2294_v40  ;;  %v1750_v27 = vadd.f32 1.0, %v3647_v39  ;;  %3658 = vtanh.f32 %v1692_v25  ;;  %v2071_v58 = vadd.f32 %v4328_v33, %v4348_v7  ;;  %v4419_v7 = vpop.f32.mrf.mxu1 }
 0x15a   : > { %v3651_v11 = vpop.eup %3650  ;;  %2489 = vst.msk [vmem:[%s4379_s13 + $0x18] sm:$0xf] %vm2482_vm3, %v3090_v16  ;;  %v2297_v28 = vadd.f32 %v2265_v26, %v1816_v35  ;;  %v2231_v2 = vadd.f32 1.0, %v3649_v48  ;;  %3660 = vtanh.f32 %v2173_v63  ;;  %v1690_v5 = vmul.f32 0.5, %v1590_v47 }
 0x15b   : > { %v3088_v23 = vpack.c.bf16 %v2326_v30, %v2326_v30  ;;  %v1782_v43 = vmul.f32 0.5, %v1750_v27  ;;  %v1755_v61 = vadd.f32 1.0, %v3651_v11  ;;  %v2171_v4 = vmul.f32 0.5, %v2071_v58  ;;  %v3286_v27 = vpop.f32.mrf.mxu0  ;;  %v4435_v58 = vpop.f32.mrf.mxu1 }
 0x15c   : > { %v2329_v37 = vmul.f32 0.25, %v2297_v28  ;;  %v2263_v62 = vmul.f32 0.5, %v2231_v2  ;;  %3662 = vtanh.f32 %v1690_v5  ;;  %v1611_v46 = vadd.f32 %v4328_v33, %v4360_v29 }
 0x15d   : > { %2487 = vst.msk [vmem:[%s4379_s13 + $0x10] sm:$0xf] %vm2482_vm3, %v3088_v23  ;;  %v1814_v45 = vadd.f32 %v1782_v43, %v4121_v41  ;;  %v1787_v20 = vmul.f32 0.5, %v1755_v61  ;;  %3664 = vtanh.f32 %v2171_v4  ;;  %v2092_v3 = vadd.f32 %v4328_v33, %v4362_v51 }
 0x15e   : > { %v3653_v40 = vpop.eup %3652  ;;  %v3091_v25 = vpack.c.bf16 %v2329_v37, %v2329_v37  ;;  %v1695_v63 = vmul.f32 0.5, %v1611_v46  ;;  %v1603_v39 = vadd.f32 %v4328_v33, %v4371_v44  ;;  %v2084_v29 = vadd.f32 %v4328_v33, %v4373_v14  ;;  %v4443_v46 = vpop.f32.mrf.mxu1 }
 0x15f   : > { %v2295_v16 = vadd.f32 %v2263_v62, %v1814_v45  ;;  %v1819_v35 = vadd.f32 %v1787_v20, %v4126_v53  ;;  %v2236_v26 = vadd.f32 1.0, %v3653_v40  ;;  %v2176_v47 = vmul.f32 0.5, %v2092_v3  ;;  %v1621_v62 = vpop.f32.mrf.mxu0 }
 0x160   : > { %v3655_v41 = vpop.eup %3654  ;;  %2490 = vst.msk [vmem:[%s4379_s13 + $0x1c] sm:$0xf] %vm2482_vm3, %v3091_v25  ;;  %3666 = vtanh.f32 %v1695_v63  ;;  %v1693_v48 = vmul.f32 0.5, %v1603_v39  ;;  %v2174_v51 = vmul.f32 0.5, %v2084_v29  ;;  %v1614_v30 = vadd.f32 %v4328_v33, %v4384_v56 }
 0x161   : > { %v2327_v44 = vmul.f32 0.25, %v2295_v16  ;;  %v2268_v11 = vmul.f32 0.5, %v2236_v26  ;;  %v1753_v14 = vadd.f32 1.0, %v3655_v41  ;;  %3668 = vtanh.f32 %v2176_v47  ;;  %v3289_v47 = vpop.f32.mrf.mxu0 }
 0x162   : > { %3670 = vtanh.f32 %v1693_v48  ;;  %v1696_v53 = vmul.f32 0.5, %v1614_v30  ;;  %v2095_v28 = vadd.f32 %v4328_v33, %v4386_v36  ;;  %v1606_v2 = vadd.f32 %v4328_v33, %v4393_v31 }
 0x163   : > { %v3089_v5 = vpack.c.bf16 %v2327_v44, %v2327_v44  ;;  %v2300_v23 = vadd.f32 %v2268_v11, %v1819_v35  ;;  %v1785_v43 = vmul.f32 0.5, %v1753_v14  ;;  %3672 = vtanh.f32 %v2174_v51 }
 0x164   : > { %v3657_v56 = vpop.eup %3656  ;;  %3674 = vtanh.f32 %v1696_v53  ;;  %v2177_v61 = vmul.f32 0.5, %v2095_v28  ;;  %v1694_v4 = vmul.f32 0.5, %v1606_v2  ;;  %v2087_v37 = vadd.f32 %v4328_v33, %v4395_v24 }
 0x165   : > { %2488 = vst.msk [vmem:[%s4379_s13 + $0x14] sm:$0xf] %vm2482_vm3, %v3089_v5  ;;  %v2332_v36 = vmul.f32 0.25, %v2300_v23  ;;  %v1817_v45 = vadd.f32 %v1785_v43, %v4134_v0  ;;  %v2234_v31 = vadd.f32 1.0, %v3657_v56  ;;  %v1627_v20 = vadd.f32 %v4328_v33, %v4409_v6  ;;  %v4453_v6 = vpop.f32.mrf.mxu1  ;;  %v4461_v56 = vpop.f32.mrf.mxu0 }
 0x166   : > { %v3659_v3 = vpop.eup %3658  ;;  %3676 = vtanh.f32 %v2177_v61  ;;  %v2175_v40 = vmul.f32 0.5, %v2087_v37  ;;  %v2108_v25 = vadd.f32 %v4328_v33, %v4411_v57  ;;  %v1619_v24 = vadd.f32 %v4328_v33, %v1618_v52 }
 0x167   : > { %v3661_v63 = vpop.eup %3660  ;;  %v3094_v39 = vpack.c.bf16 %v2332_v36, %v2332_v36  ;;  %v2266_v29 = vmul.f32 0.5, %v2234_v31  ;;  %v1756_v16 = vadd.f32 1.0, %v3659_v3  ;;  %3678 = vtanh.f32 %v1694_v4  ;;  %v4463_v61 = vpop.f32.mrf.mxu1 }
 0x168   : > { %v2237_v35 = vadd.f32 1.0, %v3661_v63  ;;  %3680 = vtanh.f32 %v2175_v40  ;;  %v1699_v0 = vmul.f32 0.5, %v1627_v20  ;;  %v2180_v26 = vmul.f32 0.5, %v2108_v25 }
 0x169   : > { %v3663_v41 = vpop.eup %3662  ;;  %2493 = vst.msk [vmem:[%s4379_s13 + $0x28] sm:$0xf] %vm2482_vm3, %v3094_v39  ;;  %v2298_v48 = vadd.f32 %v2266_v29, %v1817_v45  ;;  %v1788_v51 = vmul.f32 0.5, %v1756_v16  ;;  %v1697_v57 = vmul.f32 0.5, %v1619_v24  ;;  %v2100_v52 = vadd.f32 %v4328_v33, %v4419_v7 }
 0x16a   : > { %v3665_v30 = vpop.eup %3664  ;;  %v2269_v44 = vmul.f32 0.5, %v2237_v35  ;;  %v1754_v11 = vadd.f32 1.0, %v3663_v41  ;;  %3682 = vtanh.f32 %v1699_v0  ;;  %v1630_v14 = vadd.f32 %v4328_v33, %v3286_v27  ;;  %v4471_v35 = vpop.f32.mrf.mxu0 }
 0x16b   : > { %v2330_v53 = vmul.f32 0.25, %v2298_v48  ;;  %v1820_v28 = vadd.f32 %v1788_v51, %v4148_v10  ;;  %v2235_v2 = vadd.f32 1.0, %v3665_v30  ;;  %3684 = vtanh.f32 %v2180_v26 }
 0x16c   : > { %v1786_v5 = vmul.f32 0.5, %v1754_v11  ;;  %3686 = vtanh.f32 %v1697_v57  ;;  %v2178_v23 = vmul.f32 0.5, %v2100_v52  ;;  %v1700_v43 = vmul.f32 0.5, %v1630_v14 }
 0x16d   : > { %v3667_v7 = vpop.eup %3666  ;;  %v3092_v4 = vpack.c.bf16 %v2330_v53, %v2330_v53  ;;  %v2301_v37 = vadd.f32 %v2269_v44, %v1820_v28  ;;  %v2267_v36 = vmul.f32 0.5, %v2235_v2  ;;  %v2111_v27 = vadd.f32 %v4328_v33, %v4435_v58 }
 0x16e   : > { %v3669_v45 = vpop.eup %3668  ;;  %v1818_v10 = vadd.f32 %v1786_v5, %v4162_v32  ;;  %v1759_v31 = vadd.f32 1.0, %v3667_v7  ;;  %3688 = vtanh.f32 %v2178_v23  ;;  %v1622_v20 = vadd.f32 %v4328_v33, %v1621_v62  ;;  %v4473_v32 = vpop.f32.mrf.mxu1 }
 0x16f   : > { %v3671_v3 = vpop.eup %3670  ;;  %2491 = vst.msk [vmem:[%s4379_s13 + $0x20] sm:$0xf] %vm2482_vm3, %v3092_v4  ;;  %v2333_v40 = vmul.f32 0.25, %v2301_v37  ;;  %v2240_v25 = vadd.f32 1.0, %v3669_v45  ;;  %3690 = vtanh.f32 %v1700_v43  ;;  %v2181_v24 = vmul.f32 0.5, %v2111_v27 }
 0x170   : > { %v3673_v63 = vpop.eup %3672  ;;  %v2299_v39 = vadd.f32 %v2267_v36, %v1818_v10  ;;  %v1791_v29 = vmul.f32 0.5, %v1759_v31  ;;  %v1757_v16 = vadd.f32 1.0, %v3671_v3  ;;  %v1698_v58 = vmul.f32 0.5, %v1622_v20  ;;  %v4484_v43 = vpop.f32.mrf.mxu1 }
 0x171   : > { %v3675_v0 = vpop.eup %3674  ;;  %v3095_v26 = vpack.c.bf16 %v2333_v40, %v2333_v40  ;;  %v2272_v62 = vmul.f32 0.5, %v2240_v25  ;;  %v2238_v41 = vadd.f32 1.0, %v3673_v63  ;;  %3692 = vtanh.f32 %v2181_v24 }
 0x172   : > { %v2331_v48 = vmul.f32 0.25, %v2299_v39  ;;  %v1823_v51 = vadd.f32 %v1791_v29, %v4174_v60  ;;  %v1789_v57 = vmul.f32 0.5, %v1757_v16  ;;  %v1760_v52 = vadd.f32 1.0, %v3675_v0  ;;  %v4482_v60 = vpop.f32.mrf.mxu0  ;;  %v4493_v16 = vpop.f32.mrf.mxu1 }
 0x173   : > { %v3677_v30 = vpop.eup %3676  ;;  %2494 = vst.msk [vmem:[%s4379_s13 + $0x2c] sm:$0xf] %vm2482_vm3, %v3095_v26  ;;  %v2270_v44 = vmul.f32 0.5, %v2238_v41  ;;  %3694 = vtanh.f32 %v1698_v58  ;;  %v2103_v11 = vadd.f32 %v4328_v33, %v4443_v46  ;;  %v1643_v14 = vadd.f32 %v4328_v33, %v3289_v47 }
 0x174   : > { %v3679_v53 = vpop.eup %3678  ;;  %v3093_v28 = vpack.c.bf16 %v2331_v48, %v2331_v48  ;;  %v2304_v2 = vadd.f32 %v2272_v62, %v1823_v51  ;;  %v1821_v5 = vadd.f32 %v1789_v57, %v4193_v38  ;;  %v1792_v23 = vmul.f32 0.5, %v1760_v52  ;;  %v4491_v29 = vpop.f32.mrf.mxu0 }
 0x175   : > { %v3681_v7 = vpop.eup %3680  ;;  %v2241_v4 = vadd.f32 1.0, %v3677_v30  ;;  %v1758_v37 = vadd.f32 1.0, %v3679_v53  ;;  %v2179_v36 = vmul.f32 0.5, %v2103_v11  ;;  %v1703_v27 = vmul.f32 0.5, %v1643_v14 }
 0x176   : > { %2492 = vst.msk [vmem:[%s4379_s13 + $0x24] sm:$0xf] %vm2482_vm3, %v3093_v28  ;;  %v2336_v46 = vmul.f32 0.25, %v2304_v2  ;;  %v2302_v45 = vadd.f32 %v2270_v44, %v1821_v5  ;;  %v1824_v47 = vadd.f32 %v1792_v23, %v4199_v55  ;;  %v2239_v10 = vadd.f32 1.0, %v3681_v7  ;;  %v1650_v28 = vpop.f32.mrf.mxu0  ;;  %v2131_v2 = vpop.f32.mrf.mxu1 }
 0x177   : > { %v3683_v31 = vpop.eup %3682  ;;  %v2273_v20 = vmul.f32 0.5, %v2241_v4  ;;  %v1790_v38 = vmul.f32 0.5, %v1758_v37  ;;  %3696 = vtanh.f32 %v2179_v36  ;;  %v2124_v3 = vadd.f32 %v4328_v33, %v4453_v6 }
 0x178   : > { %v3685_v40 = vpop.eup %3684  ;;  %v3098_v25 = vpack.c.bf16 %v2336_v46, %v2336_v46  ;;  %v2334_v24 = vmul.f32 0.25, %v2302_v45  ;;  %v2271_v63 = vmul.f32 0.5, %v2239_v10  ;;  %v1763_v39 = vadd.f32 1.0, %v3683_v31 }
 0x179   : > { %v3687_v58 = vpop.eup %3686  ;;  %v2305_v55 = vadd.f32 %v2273_v20, %v1824_v47  ;;  %v1822_v0 = vadd.f32 %v1790_v38, %v4209_v12  ;;  %v2244_v26 = vadd.f32 1.0, %v3685_v40  ;;  %3698 = vtanh.f32 %v1703_v27  ;;  %v3294_v40 = vpop.f32.mrf.mxu0 }
 0x17a   : > { %2497 = vst.msk [vmem:[%s4379_s13 + $0x38] sm:$0xf] %vm2482_vm3, %v3098_v25  ;;  %v3096_v62 = vpack.c.bf16 %v2334_v24, %v2334_v24  ;;  %v1795_v6 = vmul.f32 0.5, %v1763_v39  ;;  %v1761_v41 = vadd.f32 1.0, %v3687_v58  ;;  %v2184_v48 = vmul.f32 0.5, %v2124_v3 }
 0x17b   : > { %v3689_v51 = vpop.eup %3688  ;;  %v2337_v57 = vmul.f32 0.25, %v2305_v55  ;;  %v2303_v52 = vadd.f32 %v2271_v63, %v1822_v0  ;;  %v2276_v30 = vmul.f32 0.5, %v2244_v26  ;;  %v1635_v44 = vadd.f32 %v4328_v33, %v4461_v56 }
 0x17c   : > { %v3691_v11 = vpop.eup %3690  ;;  %2495 = vst.msk [vmem:[%s4379_s13 + $0x30] sm:$0xf] %vm2482_vm3, %v3096_v62  ;;  %v1827_v12 = vadd.f32 %v1795_v6, %v4219_v34  ;;  %v1793_v14 = vmul.f32 0.5, %v1761_v41  ;;  %v2242_v53 = vadd.f32 1.0, %v3689_v51  ;;  %3700 = vtanh.f32 %v2184_v48  ;;  %v1653_v48 = vpop.f32.mrf.mxu0 }
 0x17d   : > { %v3099_v5 = vpack.c.bf16 %v2337_v57, %v2337_v57  ;;  %v2335_v23 = vmul.f32 0.25, %v2303_v52  ;;  %v1764_v7 = vadd.f32 1.0, %v3691_v11  ;;  %v1701_v4 = vmul.f32 0.5, %v1635_v44 }
 0x17e   : > { %v3693_v37 = vpop.eup %3692  ;;  %v2308_v36 = vadd.f32 %v2276_v30, %v1827_v12  ;;  %v1825_v56 = vadd.f32 %v1793_v14, %v4225_v54  ;;  %v2274_v27 = vmul.f32 0.5, %v2242_v53  ;;  %v2116_v46 = vadd.f32 %v4328_v33, %v4463_v61  ;;  %v3330_v54 = vpop.f32.mrf.mxu1 }
 0x17f   : > { %2498 = vst.msk [vmem:[%s4379_s13 + $0x3c] sm:$0xf] %vm2482_vm3, %v3099_v5  ;;  %v3097_v34 = vpack.c.bf16 %v2335_v23, %v2335_v23  ;;  %v1796_v45 = vmul.f32 0.5, %v1764_v7  ;;  %v2245_v47 = vadd.f32 1.0, %v3693_v37  ;;  %3702 = vtanh.f32 %v1701_v4  ;;  %v3297_v4 = vpop.f32.mrf.mxu0 }
 0x180   : > { %v3695_v10 = vpop.eup %3694  ;;  %v2340_v31 = vmul.f32 0.25, %v2308_v36  ;;  %v2306_v20 = vadd.f32 %v2274_v27, %v1825_v56  ;;  %v2182_v38 = vmul.f32 0.5, %v2116_v46  ;;  %v1646_v3 = vadd.f32 %v4328_v33, %v4471_v35  ;;  %v2134_v51 = vpop.f32.mrf.mxu1 }
 0x181   : > { %2496 = vst.msk [vmem:[%s4379_s13 + $0x34] sm:$0xf] %vm2482_vm3, %v3097_v34  ;;  %v1828_v61 = vadd.f32 %v1796_v45, %v4237_v15  ;;  %v2277_v25 = vmul.f32 0.5, %v2245_v47  ;;  %v1762_v24 = vadd.f32 1.0, %v3695_v10  ;;  %v2127_v63 = vadd.f32 %v4328_v33, %v4473_v32 }
 0x182   : > { %v3102_v39 = vpack.c.bf16 %v2340_v31, %v2340_v31  ;;  %v2338_v58 = vmul.f32 0.25, %v2306_v20  ;;  %3704 = vtanh.f32 %v2182_v38  ;;  %v1704_v55 = vmul.f32 0.5, %v1646_v3  ;;  %v3333_v37 = vpop.f32.mrf.mxu1  ;;  %v1666_v3 = vpop.f32.mrf.mxu0 }
 0x183   : > { %v2309_v0 = vadd.f32 %v2277_v25, %v1828_v61  ;;  %v1794_v26 = vmul.f32 0.5, %v1762_v24  ;;  %v2185_v35 = vmul.f32 0.5, %v2127_v63  ;;  %v1638_v62 = vadd.f32 %v4328_v33, %v4482_v60 }
 0x184   : > { %v3697_v6 = vpop.eup %3696  ;;  %2501 = vst.msk [vmem:[%s4379_s13 + $0x48] sm:$0xf] %vm2482_vm3, %v3102_v39  ;;  %v3100_v15 = vpack.c.bf16 %v2338_v58, %v2338_v58  ;;  %3706 = vtanh.f32 %v1704_v55  ;;  %v2119_v41 = vadd.f32 %v4328_v33, %v4484_v43  ;;  %v1659_v32 = vadd.f32 %v4328_v33, %v4491_v29 }
 0x185   : > { %v2341_v57 = vmul.f32 0.25, %v2309_v0  ;;  %v1826_v52 = vadd.f32 %v1794_v26, %v4243_v59  ;;  %v2243_v30 = vadd.f32 1.0, %v3697_v6  ;;  %3708 = vtanh.f32 %v2185_v35  ;;  %v3298_v6 = vpop.f32.mrf.mxu0 }
 0x186   : > { %v3699_v44 = vpop.eup %3698  ;;  %2499 = vst.msk [vmem:[%s4379_s13 + $0x40] sm:$0xf] %vm2482_vm3, %v3100_v15  ;;  %v1702_v60 = vmul.f32 0.5, %v1638_v62  ;;  %v2183_v11 = vmul.f32 0.5, %v2119_v41  ;;  %v1707_v12 = vmul.f32 0.5, %v1659_v32  ;;  %v2140_v43 = vadd.f32 %v4328_v33, %v4493_v16 }
 0x187   : > { %v3103_v14 = vpack.c.bf16 %v2341_v57, %v2341_v57  ;;  %v2275_v53 = vmul.f32 0.5, %v2243_v30  ;;  %v1767_v29 = vadd.f32 1.0, %v3699_v44  ;;  %v1651_v5 = vadd.f32 %v4328_v33, %v1650_v28 }
 0x188   : > { %3710 = vtanh.f32 %v1702_v60  ;;  %v2188_v23 = vmul.f32 0.5, %v2140_v43  ;;  %v2132_v59 = vadd.f32 %v4328_v33, %v2131_v2  ;;  %v1662_v7 = vadd.f32 %v4328_v33, %v3294_v40  ;;  %v2147_v40 = vpop.f32.mrf.mxu1 }
 0x189   : > { %v3701_v36 = vpop.eup %3700  ;;  %2502 = vst.msk [vmem:[%s4379_s13 + $0x4c] sm:$0xf] %vm2482_vm3, %v3103_v14  ;;  %v2307_v56 = vadd.f32 %v2275_v53, %v1826_v52  ;;  %v1799_v27 = vmul.f32 0.5, %v1767_v29  ;;  %3712 = vtanh.f32 %v2183_v11  ;;  %v1705_v16 = vmul.f32 0.5, %v1651_v5  ;;  %v1669_v29 = vpop.f32.mrf.mxu0 }
 0x18a   : > { %v2248_v46 = vadd.f32 1.0, %v3701_v36  ;;  %3714 = vtanh.f32 %v1707_v12  ;;  %v2186_v34 = vmul.f32 0.5, %v2132_v59  ;;  %v1708_v45 = vmul.f32 0.5, %v1662_v7  ;;  %v3334_v15 = vpop.f32.mrf.mxu1 }
 0x18b   : > { %v2339_v28 = vmul.f32 0.25, %v2307_v56  ;;  %v1831_v47 = vadd.f32 %v1799_v27, %v4249_v49  ;;  %3716 = vtanh.f32 %v2188_v23  ;;  %v2143_v2 = vadd.f32 %v4328_v33, %v3330_v54 }
 0x18c   : > { %v3703_v10 = vpop.eup %3702  ;;  %v2280_v31 = vmul.f32 0.5, %v2248_v46  ;;  %3718 = vtanh.f32 %v1705_v16  ;;  %v1654_v20 = vadd.f32 %v4328_v33, %v1653_v48  ;;  %v2135_v38 = vadd.f32 %v4328_v33, %v2134_v51  ;;  %v2150_v5 = vpop.f32.mrf.mxu1 }
 0x18d   : > { %v3101_v61 = vpack.c.bf16 %v2339_v28, %v2339_v28  ;;  %v1765_v25 = vadd.f32 1.0, %v3703_v10  ;;  %3720 = vtanh.f32 %v2186_v34  ;;  %v2189_v24 = vmul.f32 0.5, %v2143_v2 }
 0x18e   : > { %v2312_v63 = vadd.f32 %v2280_v31, %v1831_v47  ;;  %3722 = vtanh.f32 %v1708_v45  ;;  %v1706_v49 = vmul.f32 0.5, %v1654_v20  ;;  %v2187_v39 = vmul.f32 0.5, %v2135_v38 }
 0x18f   : > { %v3705_v58 = vpop.eup %3704  ;;  %2500 = vst.msk [vmem:[%s4379_s13 + $0x44] sm:$0xf] %vm2482_vm3, %v3101_v61  ;;  %v1797_v54 = vmul.f32 0.5, %v1765_v25  ;;  %3724 = vtanh.f32 %v2189_v24  ;;  %v1675_v55 = vadd.f32 %v4328_v33, %v3297_v4  ;;  %v2156_v0 = vadd.f32 %v4328_v33, %v3333_v37 }
 0x190   : > { %v2344_v26 = vmul.f32 0.25, %v2312_v63  ;;  %v2246_v35 = vadd.f32 1.0, %v3705_v58  ;;  %3726 = vtanh.f32 %v1706_v49  ;;  %v1667_v62 = vadd.f32 %v4328_v33, %v1666_v3 }
 0x191   : > { %v3707_v41 = vpop.eup %3706  ;;  %v1829_v32 = vadd.f32 %v1797_v54, %v4257_v17  ;;  %3728 = vtanh.f32 %v2187_v39  ;;  %v1711_v48 = vmul.f32 0.5, %v1675_v55  ;;  %v2192_v51 = vmul.f32 0.5, %v2156_v0 }
 0x192   : > { %v3709_v57 = vpop.eup %3708  ;;  %v3106_v52 = vpack.c.bf16 %v2344_v26, %v2344_v26  ;;  %v2278_v30 = vmul.f32 0.5, %v2246_v35  ;;  %v1768_v44 = vadd.f32 1.0, %v3707_v41  ;;  %v1709_v60 = vmul.f32 0.5, %v1667_v62 }
 0x193   : > { %v2249_v11 = vadd.f32 1.0, %v3709_v57  ;;  %3730 = vtanh.f32 %v1711_v48  ;;  %v2148_v12 = vadd.f32 %v4328_v33, %v2147_v40  ;;  %v1678_v43 = vadd.f32 %v4328_v33, %v3298_v6 }
 0x194   : > { %2505 = vst.msk [vmem:[%s4379_s13 + $0x58] sm:$0xf] %vm2482_vm3, %v3106_v52  ;;  %v2310_v14 = vadd.f32 %v2278_v30, %v1829_v32  ;;  %v1800_v53 = vmul.f32 0.5, %v1768_v44  ;;  %3732 = vtanh.f32 %v2192_v51  ;;  %v2159_v17 = vadd.f32 %v4328_v33, %v3334_v15 }
 0x195   : > { %v3711_v23 = vpop.eup %3710  ;;  %v2281_v59 = vmul.f32 0.5, %v2249_v11  ;;  %3734 = vtanh.f32 %v1709_v60  ;;  %v2190_v7 = vmul.f32 0.5, %v2148_v12  ;;  %v1712_v4 = vmul.f32 0.5, %v1678_v43 }
 0x196   : > { %v3713_v37 = vpop.eup %3712  ;;  %v2342_v36 = vmul.f32 0.25, %v2310_v14  ;;  %v1832_v56 = vadd.f32 %v1800_v53, %v4271_v22  ;;  %v1766_v27 = vadd.f32 1.0, %v3711_v23  ;;  %v2193_v16 = vmul.f32 0.5, %v2159_v17 }
 0x197   : > { %v3715_v46 = vpop.eup %3714  ;;  %v2247_v34 = vadd.f32 1.0, %v3713_v37  ;;  %3736 = vtanh.f32 %v2190_v7  ;;  %v1670_v45 = vadd.f32 %v4328_v33, %v1669_v29  ;;  %v2151_v28 = vadd.f32 %v4328_v33, %v2150_v5 }
 0x198   : > { %v3717_v47 = vpop.eup %3716  ;;  %v3104_v2 = vpack.c.bf16 %v2342_v36, %v2342_v36  ;;  %v2313_v10 = vadd.f32 %v2281_v59, %v1832_v56  ;;  %v1798_v31 = vmul.f32 0.5, %v1766_v27  ;;  %v1771_v20 = vadd.f32 1.0, %v3715_v46 }
 0x199   : > { %v3719_v38 = vpop.eup %3718  ;;  %v2279_v3 = vmul.f32 0.5, %v2247_v34  ;;  %v2252_v40 = vadd.f32 1.0, %v3717_v47  ;;  %3738 = vtanh.f32 %v1712_v4  ;;  %v1710_v22 = vmul.f32 0.5, %v1670_v45 }
 0x19a   : > { %v3721_v61 = vpop.eup %3720  ;;  %2503 = vst.msk [vmem:[%s4379_s13 + $0x50] sm:$0xf] %vm2482_vm3, %v3104_v2  ;;  %v2345_v25 = vmul.f32 0.25, %v2313_v10  ;;  %v1830_v24 = vadd.f32 %v1798_v31, %v4277_v9  ;;  %v1803_v63 = vmul.f32 0.5, %v1771_v20  ;;  %v1769_v49 = vadd.f32 1.0, %v3719_v38 }
 0x19b   : > { %v3723_v39 = vpop.eup %3722  ;;  %v2284_v33 = vmul.f32 0.5, %v2252_v40  ;;  %v2250_v58 = vadd.f32 1.0, %v3721_v61  ;;  %3740 = vtanh.f32 %v2193_v16  ;;  %v2191_v54 = vmul.f32 0.5, %v2151_v28 }
 0x19c   : > { %v3725_v55 = vpop.eup %3724  ;;  %v3107_v0 = vpack.c.bf16 %v2345_v25, %v2345_v25  ;;  %v2311_v26 = vadd.f32 %v2279_v3, %v1830_v24  ;;  %v1835_v35 = vadd.f32 %v1803_v63, %v4293_v42  ;;  %v1801_v62 = vmul.f32 0.5, %v1769_v49 }
 0x19d   : > { %v3727_v6 = vpop.eup %3726  ;;  %v2282_v15 = vmul.f32 0.5, %v2250_v58  ;;  %v1772_v41 = vadd.f32 1.0, %v3723_v39  ;;  %v2253_v32 = vadd.f32 1.0, %v3725_v55  ;;  %3742 = vtanh.f32 %v1710_v22 }
 0x19e   : > { %v3729_v9 = vpop.eup %3728  ;;  %2506 = vst.msk [vmem:[%s4379_s13 + $0x5c] sm:$0xf] %vm2482_vm3, %v3107_v0  ;;  %v2343_v48 = vmul.f32 0.25, %v2311_v26  ;;  %v2316_v51 = vadd.f32 %v2284_v33, %v1835_v35  ;;  %v1833_v57 = vadd.f32 %v1801_v62, %v4301_v18  ;;  %v1770_v52 = vadd.f32 1.0, %v3727_v6 }
 0x19f   : > { %v1804_v30 = vmul.f32 0.5, %v1772_v41  ;;  %v2251_v44 = vadd.f32 1.0, %v3729_v9  ;;  %3744 = vtanh.f32 %v2191_v54  ;;  %v2285_v17 = vmul.f32 0.5, %v2253_v32 }
 0x1a0   : > { %v3731_v60 = vpop.eup %3730  ;;  %v3105_v42 = vpack.c.bf16 %v2343_v48, %v2343_v48  ;;  %v2348_v11 = vmul.f32 0.25, %v2316_v51  ;;  %v2314_v12 = vadd.f32 %v2282_v15, %v1833_v57  ;;  %v1802_v43 = vmul.f32 0.5, %v1770_v52 }
 0x1a1   : > { %v3733_v14 = vpop.eup %3732  ;;  %v1836_v53 = vadd.f32 %v1804_v30, %v4309_v21  ;;  %v2283_v29 = vmul.f32 0.5, %v2251_v44  ;;  %v1775_v5 = vadd.f32 1.0, %v3731_v60 }
 0x1a2   : > { %v3735_v23 = vpop.eup %3734  ;;  %2504 = vst.msk [vmem:[%s4379_s13 + $0x54] sm:$0xf] %vm2482_vm3, %v3105_v42  ;;  %v3110_v18 = vpack.c.bf16 %v2348_v11, %v2348_v11  ;;  %v2346_v59 = vmul.f32 0.25, %v2314_v12  ;;  %v1834_v7 = vadd.f32 %v1802_v43, %v4317_v50  ;;  %v2256_v4 = vadd.f32 1.0, %v3733_v14 }
 0x1a3   : > { %v2317_v37 = vadd.f32 %v2285_v17, %v1836_v53  ;;  %v1807_v36 = vmul.f32 0.5, %v1775_v5  ;;  %v1773_v56 = vadd.f32 1.0, %v3735_v23 }
 0x1a4   : > { %v3737_v27 = vpop.eup %3736  ;;  %2509 = vst.msk [vmem:[%s4379_s13 + $0x68] sm:$0xf] %vm2482_vm3, %v3110_v18  ;;  %v3108_v16 = vpack.c.bf16 %v2346_v59, %v2346_v59  ;;  %v2315_v21 = vadd.f32 %v2283_v29, %v1834_v7  ;;  %v2288_v46 = vmul.f32 0.5, %v2256_v4 }
 0x1a5   : > { %v2349_v34 = vmul.f32 0.25, %v2317_v37  ;;  %v1839_v45 = vadd.f32 %v1807_v36, %v4332_v19  ;;  %v1805_v28 = vmul.f32 0.5, %v1773_v56  ;;  %v2254_v47 = vadd.f32 1.0, %v3737_v27 }
 0x1a6   : > { %v3739_v2 = vpop.eup %3738  ;;  %2507 = vst.msk [vmem:[%s4379_s13 + $0x60] sm:$0xf] %vm2482_vm3, %v3108_v16  ;;  %v2347_v50 = vmul.f32 0.25, %v2315_v21 }
 0x1a7   : > { %v3111_v10 = vpack.c.bf16 %v2349_v34, %v2349_v34  ;;  %v2320_v31 = vadd.f32 %v2288_v46, %v1839_v45  ;;  %v1837_v20 = vadd.f32 %v1805_v28, %v4340_v1  ;;  %v2286_v38 = vmul.f32 0.5, %v2254_v47 }
 0x1a8   : > { %v3741_v3 = vpop.eup %3740  ;;  %v3109_v40 = vpack.c.bf16 %v2347_v50, %v2347_v50  ;;  %v1776_v22 = vadd.f32 1.0, %v3739_v2 }
 0x1a9   : > { %2510 = vst.msk [vmem:[%s4379_s13 + $0x6c] sm:$0xf] %vm2482_vm3, %v3111_v10  ;;  %v2352_v61 = vmul.f32 0.25, %v2320_v31  ;;  %v2318_v19 = vadd.f32 %v2286_v38, %v1837_v20  ;;  %v2257_v25 = vadd.f32 1.0, %v3741_v3 }
 0x1aa   : > { %v3743_v24 = vpop.eup %3742  ;;  %2508 = vst.msk [vmem:[%s4379_s13 + $0x64] sm:$0xf] %vm2482_vm3, %v3109_v40  ;;  %v1808_v63 = vmul.f32 0.5, %v1776_v22 }
 0x1ab   : > { %v3114_v49 = vpack.c.bf16 %v2352_v61, %v2352_v61  ;;  %v2350_v39 = vmul.f32 0.25, %v2318_v19  ;;  %v1774_v33 = vadd.f32 1.0, %v3743_v24  ;;  %v2289_v54 = vmul.f32 0.5, %v2257_v25 }
 0x1ac   : > { %v3745_v1 = vpop.eup %3744  ;;  %v1840_v58 = vadd.f32 %v1808_v63, %v4350_v8 }
 0x1ad   : > { %2513 = vst.msk [vmem:[%s4379_s13 + $0x78] sm:$0xf] %vm2482_vm3, %v3114_v49  ;;  %v3112_v55 = vpack.c.bf16 %v2350_v39, %v2350_v39  ;;  %v1806_v0 = vmul.f32 0.5, %v1774_v33  ;;  %v2255_v26 = vadd.f32 1.0, %v3745_v1 }
 0x1ae   : > { %v2321_v35 = vadd.f32 %v2289_v54, %v1840_v58 }
 0x1af   : > { %2511 = vst.msk [vmem:[%s4379_s13 + $0x70] sm:$0xf] %vm2482_vm3, %v3112_v55  ;;  %v1838_v62 = vadd.f32 %v1806_v0, %v4352_v13  ;;  %v2287_v6 = vmul.f32 0.5, %v2255_v26 }
 0x1b0   : > { %v2353_v15 = vmul.f32 0.25, %v2321_v35 }
 0x1b1   : > { %v2319_v41 = vadd.f32 %v2287_v6, %v1838_v62 }
 0x1b2   : > { %v3115_v32 = vpack.c.bf16 %v2353_v15, %v2353_v15 }
 0x1b3   : > { %v2351_v9 = vmul.f32 0.25, %v2319_v41  ;;  %2521 = sbr.rel (!%p3896_p4) target bundleno = 500 (0x1f4), region = 48 }
 0x1b4   : > { %2514 = vst.msk [vmem:[%s4379_s13 + $0x7c] sm:$0xf] %vm2482_vm3, %v3115_v32 }
 0x1b5   : > { %v3113_v8 = vpack.c.bf16 %v2351_v9, %v2351_v9 }
 0x1b7   : > { %2512 = vst.msk [vmem:[%s4379_s13 + $0x74] sm:$0xf] %vm2482_vm3, %v3113_v8 }
 0x1b8   : > { %s4732_s14 = smov (!%p2524_p8, %s2523_s14), 32 }
 0x1b9   : > { %s3069_s19 = sshll.u32 %s4732_s14, 6 }
 0x1ba   : > { %p3072_p9 = scmp.eq.s32.totalorder %s3069_s19, 0 }
 0x1bb   : > { %s4595_s20 = sshrl.u32 (!%p3072_p9), %s4732_s14, 5 }
 0x1bc   : > { %2532 = sbr.rel (%p3072_p9) target bundleno = 500 (0x1f4), region = 52  ;;  %p3073_p10 = scmp.le.s32.totalorder (!%p3072_p9), %s4595_s20, 0 }
 0x1c1   : > { %2829 = sbr.rel (%p3073_p10) target bundleno = 483 (0x1e3), region = 133  ;;  %s4725_s24 = smov (!%p3073_p10), %s4589_s18 }
 0x1c2   : > { %s4726_s29 = smov (!%p3073_p10), %s4379_s13  ;;  %s4604_s8 = smov (!%p3073_p10), 0  }
 0x1c3   : > { %s4606_s23 = smov (!%p3073_p10), 0  }
 0x1c6 LB: >> { %v2549_v13 = vld [vmem:[%s3809_s29] sm:$0xf]  ;;  %v2551_v48 = vld [vmem:[%s3809_s29 + $0x4] sm:$0xf]  ;;  %v2553_v51 = vld [vmem:[%s3809_s29 + $0x8] sm:$0xf]  ;;  %s3817_s23 = sphi %s4606_s23, %s2543_s23   ;;  %s3813_s8 = sphi %s4604_s8, %s4727_s8   ;;  %s3809_s29 = sphi %s4726_s29, %s2618_s29   ;;  %s3805_s24 = sphi %s4725_s24, %s2619_s24  }
 0x1c7   : >> { %2550 = vst [vmem:[%s3805_s24] sm:$0xf] %v2549_v13  ;;  %2552 = vst [vmem:[%s3805_s24 + $0x4] sm:$0xf] %v2551_v48  ;;  %v2555_v57 = vld [vmem:[%s3809_s29 + $0xc] sm:$0xf]  ;;  %s2613_s26 = sadd.s32 1, %s3813_s8 }
 0x1c8   : >> { %2554 = vst [vmem:[%s3805_s24 + $0x8] sm:$0xf] %v2553_v51  ;;  %v2557_v52 = vld [vmem:[%s3809_s29 + $0x10] sm:$0xf]  ;;  %v2559_v30 = vld [vmem:[%s3809_s29 + $0x14] sm:$0xf]  ;;  %p2614_p11 = scmp.ge.s32.totalorder %s2613_s26, %s4595_s20 }
 0x1c9   : >> { %2556 = vst [vmem:[%s3805_s24 + $0xc] sm:$0xf] %v2555_v57  ;;  %2558 = vst [vmem:[%s3805_s24 + $0x10] sm:$0xf] %v2557_v52  ;;  %v2561_v44 = vld [vmem:[%s3809_s29 + $0x18] sm:$0xf] }
 0x1ca   : >> { %2560 = vst [vmem:[%s3805_s24 + $0x14] sm:$0xf] %v2559_v30  ;;  %v2563_v60 = vld [vmem:[%s3809_s29 + $0x1c] sm:$0xf]  ;;  %v2565_v42 = vld [vmem:[%s3809_s29 + $0x20] sm:$0xf] }
 0x1cb   : >> { %2562 = vst [vmem:[%s3805_s24 + $0x18] sm:$0xf] %v2561_v44  ;;  %2564 = vst [vmem:[%s3805_s24 + $0x1c] sm:$0xf] %v2563_v60  ;;  %v2567_v11 = vld [vmem:[%s3809_s29 + $0x24] sm:$0xf] }
 0x1cc   : >> { %2566 = vst [vmem:[%s3805_s24 + $0x20] sm:$0xf] %v2565_v42  ;;  %v2569_v12 = vld [vmem:[%s3809_s29 + $0x28] sm:$0xf]  ;;  %v2571_v43 = vld [vmem:[%s3809_s29 + $0x2c] sm:$0xf] }
 0x1cd   : >> { %2568 = vst [vmem:[%s3805_s24 + $0x24] sm:$0xf] %v2567_v11  ;;  %2570 = vst [vmem:[%s3805_s24 + $0x28] sm:$0xf] %v2569_v12  ;;  %v2573_v14 = vld [vmem:[%s3809_s29 + $0x30] sm:$0xf] }
 0x1ce   : >> { %2572 = vst [vmem:[%s3805_s24 + $0x2c] sm:$0xf] %v2571_v43  ;;  %v2575_v53 = vld [vmem:[%s3809_s29 + $0x34] sm:$0xf]  ;;  %v2577_v17 = vld [vmem:[%s3809_s29 + $0x38] sm:$0xf] }
 0x1cf   : >> { %2574 = vst [vmem:[%s3805_s24 + $0x30] sm:$0xf] %v2573_v14  ;;  %2576 = vst [vmem:[%s3805_s24 + $0x34] sm:$0xf] %v2575_v53  ;;  %v2579_v29 = vld [vmem:[%s3809_s29 + $0x3c] sm:$0xf] }
 0x1d0   : >> { %2578 = vst [vmem:[%s3805_s24 + $0x38] sm:$0xf] %v2577_v17  ;;  %v2581_v5 = vld [vmem:[%s3809_s29 + $0x40] sm:$0xf]  ;;  %v2583_v23 = vld [vmem:[%s3809_s29 + $0x44] sm:$0xf] }
 0x1d1   : >> { %2580 = vst [vmem:[%s3805_s24 + $0x3c] sm:$0xf] %v2579_v29  ;;  %2582 = vst [vmem:[%s3805_s24 + $0x40] sm:$0xf] %v2581_v5  ;;  %v2585_v18 = vld [vmem:[%s3809_s29 + $0x48] sm:$0xf] }
 0x1d2   : >> { %2584 = vst [vmem:[%s3805_s24 + $0x44] sm:$0xf] %v2583_v23  ;;  %v2587_v59 = vld [vmem:[%s3809_s29 + $0x4c] sm:$0xf]  ;;  %v2589_v7 = vld [vmem:[%s3809_s29 + $0x50] sm:$0xf] }
 0x1d3   : >> { %2586 = vst [vmem:[%s3805_s24 + $0x48] sm:$0xf] %v2585_v18  ;;  %2588 = vst [vmem:[%s3805_s24 + $0x4c] sm:$0xf] %v2587_v59  ;;  %v2591_v4 = vld [vmem:[%s3809_s29 + $0x54] sm:$0xf] }
 0x1d4   : >> { %2590 = vst [vmem:[%s3805_s24 + $0x50] sm:$0xf] %v2589_v7  ;;  %v2593_v37 = vld [vmem:[%s3809_s29 + $0x58] sm:$0xf]  ;;  %v2595_v36 = vld [vmem:[%s3809_s29 + $0x5c] sm:$0xf] }
 0x1d5   : >> { %2592 = vst [vmem:[%s3805_s24 + $0x54] sm:$0xf] %v2591_v4  ;;  %2594 = vst [vmem:[%s3805_s24 + $0x58] sm:$0xf] %v2593_v37  ;;  %v2597_v56 = vld [vmem:[%s3809_s29 + $0x60] sm:$0xf] }
 0x1d6   : >> { %2596 = vst [vmem:[%s3805_s24 + $0x5c] sm:$0xf] %v2595_v36  ;;  %v2599_v27 = vld [vmem:[%s3809_s29 + $0x64] sm:$0xf]  ;;  %v2601_v16 = vld [vmem:[%s3809_s29 + $0x68] sm:$0xf] }
 0x1d7   : >> { %2598 = vst [vmem:[%s3805_s24 + $0x60] sm:$0xf] %v2597_v56  ;;  %2600 = vst [vmem:[%s3805_s24 + $0x64] sm:$0xf] %v2599_v27  ;;  %v2603_v21 = vld [vmem:[%s3809_s29 + $0x6c] sm:$0xf] }
 0x1d8   : >> { %2602 = vst [vmem:[%s3805_s24 + $0x68] sm:$0xf] %v2601_v16  ;;  %v2605_v46 = vld [vmem:[%s3809_s29 + $0x70] sm:$0xf]  ;;  %v2607_v34 = vld [vmem:[%s3809_s29 + $0x74] sm:$0xf] }
 0x1d9   : >> { %2604 = vst [vmem:[%s3805_s24 + $0x6c] sm:$0xf] %v2603_v21  ;;  %2606 = vst [vmem:[%s3805_s24 + $0x70] sm:$0xf] %v2605_v46  ;;  %v2609_v45 = vld [vmem:[%s3809_s29 + $0x78] sm:$0xf] }
 0x1da   : >> { %2608 = vst [vmem:[%s3805_s24 + $0x74] sm:$0xf] %v2607_v34  ;;  %v2611_v28 = vld [vmem:[%s3809_s29 + $0x7c] sm:$0xf]  ;;  %2610 = vst [vmem:[%s3805_s24 + $0x78] sm:$0xf] %v2609_v45 }
 0x1db   : >> { %2612 = vst [vmem:[%s3805_s24 + $0x7c] sm:$0xf] %v2611_v28  ;;  %s4734_s26 = smov (%p2614_p11, %s2613_s26), 0  ;;  %s2543_s23 = sadd.s32 1, %s3817_s23  }
 0x1dc   : >> { %s3074_s27 = sshll.u32 %s4734_s26, 7  ;;  %p2542_p12 = scmp.ge.s32.totalorder %s2543_s23, %s4595_s20 }
 0x1dd   : >> { %s2618_s29 = scalar_lea.vmem %s4379_s13, %s3074_s27 [#allocation2]   ;;  %s2619_s24 = scalar_lea.vmem %s4589_s18, %s3074_s27  }
 0x1de   : >> { %s4727_s8 = smov %s4734_s26  ;;  %2545 = sbr.rel (!%p2542_p12) target bundleno = 454 (0x1c6), region = 139 }
 0x1e3 PF: > { %s4699_s30 = sand.u32 31, %s4732_s14   ;;  %s3117_s7 = sshll.u32 %s4595_s20, 7 }
 0x1e4   : > { %s2624_s9 = scalar_lea.vmem %s4379_s13, %s3117_s7 [#allocation2]   ;;  %s2626_s10 = scalar_lea.vmem %s4589_s18, %s3117_s7  }
 0x1e5   : > { %p3079_p13 = scmp.le.s32.totalorder %s4699_s30, 0 }
 0x1e6   : > { %s3819_s11 = smov (!%p3079_p13), %s2626_s10   ;;  %s3823_s12 = smov (!%p3079_p13), %s2624_s9  }
 0x1e7   : > { %2843 = sbr.rel (%p3079_p13) target bundleno = 500 (0x1f4), region = 144  ;;  %s3827_s21 = smov (!%p3079_p13), 0  }
 0x1e8   : > { %s3831_s15 = smov (!%p3079_p13), 0  }
 0x1ec LB: >> { %v2636_v47 = vld [vmem:[%s3825_s12] sm:$0xf]  ;;  %s2638_s14 = sadd.s32 1, %s3829_s21  ;;  %s2630_s15 = sadd.s32 1, %s3833_s15   ;;  %s3833_s15 = sphi %s3831_s15, %s2630_s15   ;;  %s3829_s21 = sphi %s3827_s21, %s3828_s21   ;;  %s3825_s12 = sphi %s3823_s12, %s2643_s12   ;;  %s3821_s11 = sphi %s3819_s11, %s2644_s11  }
 0x1ed   : >> { %2637 = vst [vmem:[%s3821_s11] sm:$0xf] %v2636_v47  ;;  %p2639_p0 = scmp.ge.s32.totalorder %s2638_s14, %s4699_s30  ;;  %p2629_p1 = scmp.ge.s32.totalorder %s2630_s15, %s4699_s30 }
 0x1ef   : >> { %s4736_s14 = smov (%p2639_p0, %s2638_s14), 0  ;;  %2632 = sbr.rel (!%p2629_p1) target bundleno = 492 (0x1ec), region = 150 }
 0x1f0   : >> { %s3080_s13 = sshll.u32 %s4736_s14, 2  ;;  %s3828_s21 = smov %s4736_s14  }
 0x1f1   : >> { %s2643_s12 = scalar_lea.vmem %s2624_s9, %s3080_s13 [#allocation2]   ;;  %s2644_s11 = scalar_lea.vmem %s2626_s10, %s3080_s13  }
 0x1f4 PF: > { %p13_p2 = scmp.ge.s32.totalorder %s3886_s25, 4   ;;  %s4728_s21 = smov %s3797_s22 }
 0x1f5   : > { %s4729_s22 = smov %s3894_s28  ;;  %s4730_s23 = smov %s3886_s25 }
 0x1f6   :  { %15 = sbr.rel (!%p13_p2) target bundleno = 2 (0x2), region = 161 }

// kernel: lenet_forward.4
= control target key start
LH: loop header
LB: loop body
LE: loop exit
PB: predicated region body
PF: predicated region fallthrough
CT: control target
= control target key end

     0   :  { %v942_v0 = vmov 0   ;;  %vm147_vm0 = vcmask 179200   ;;  %vm160_vm1 = vcmask 1042432   ;;  %vm745_vm2 = vcmask 125952   ;;  %s1277_s4 = inlined_call_operand.vmem [shape: bf16[150,16], index: 4, kind: input, shape index: {}]   ;;  %s1278_s0 = inlined_call_operand.vmem [shape: bf16[50,150], index: 0, kind: input, shape index: {}]   ;;  %s1279_s1 = inlined_call_operand.vmem [shape: bf16[50,150], index: 1, kind: input, shape index: {}]   ;;  %s1280_s2 = inlined_call_operand.vmem [shape: bf16[50,150], index: 2, kind: input, shape index: {}]   ;;  %s1281_s3 = inlined_call_operand.vmem [shape: bf16[50,150], index: 3, kind: input, shape index: {}]   ;;  %s1282_s5 = inlined_call_operand.vmem [shape: f32[1,16], index: 5, kind: input, shape index: {}]   ;;  %s1283_s6 = inlined_call_operand.vmem [shape: bf16[50,16], index: 6, kind: output, shape index: {}]  }
   0x1   :  { %164 = vmatprep.subr.bf16.mxu0 %v942_v0  ;;  %308 = vmatprep.subr.bf16.mxu1 %v942_v0  ;;  %v983_v1 = vld [vmem:[%s1277_s4 + $0x38] sm:$0xff]   ;;  %v990_v2 = vld [vmem:[%s1277_s4 + $0x30] sm:$0xff]   ;;  %v999_v3 = vld [vmem:[%s1277_s4 + $0x28] sm:$0xff]   ;;  %vm752_vm3 = vcmask 122880  }
   0x2   :  { %165 = vmatpush1.bf16.msra.mxu0 %v983_v1  ;;  %309 = vmatpush1.bf16.msra.mxu1 %v983_v1  ;;  %v1008_v4 = vld [vmem:[%s1277_s4 + $0x20] sm:$0xff]   ;;  %v1024_v7 = vld [vmem:[%s1277_s4 + $0x18] sm:$0xff]   ;;  %v1034_v8 = vld [vmem:[%s1277_s4 + $0x10] sm:$0xff]  }
   0x3   :  { %166 = vmatprep.subr.bf16.mxu0 %v942_v0  ;;  %310 = vmatprep.subr.bf16.mxu1 %v942_v0  ;;  %v844_v5 = vld [vmem:[%s1278_s0 + $0x4] ss:$8 sps:$4 sm:$0xff]   ;;  %v840_v11 = vld [vmem:[%s1277_s4 + $0x48] ss:$0 sps:$4 sm:$0x77]  }
   0x4   :  { %777 = vmatprep.mubr.msk.bf16.mxu0 %vm147_vm0, %v844_v5  ;;  %v847_v6 = vld [vmem:[%s1279_s1 + $0x4] ss:$8 sps:$4 sm:$0xff]   ;;  %v1063_v12 = vsel %vm160_vm1, %v840_v11, 0  ;;  %v842_v14 = vld [vmem:[%s1278_s0] ss:$8 sps:$4 sm:$0xff]  }
   0x5   :  { %789 = vmatprep.mubr.msk.bf16.mxu1 %vm147_vm0, %v847_v6  ;;  %v1043_v9 = vld [vmem:[%s1277_s4 + $0x8] sm:$0xff]   ;;  %v1052_v10 = vld [vmem:[%s1277_s4] sm:$0xff]   ;;  %v848_v16 = vld [vmem:[%s1278_s0 + $0x14] ss:$8 sps:$4 sm:$0xff]  }
   0x6   :  { %167 = vmatpush1.bf16.msra.mxu0 %v990_v2  ;;  %311 = vmatpush1.bf16.msra.mxu1 %v990_v2  ;;  %v1070_v13 = vld [vmem:[%s1277_s4 + $0x40] sm:$0xff]   ;;  %v851_v17 = vld [vmem:[%s1279_s1 + $0x14] ss:$8 sps:$4 sm:$0xff]   ;;  %v850_v18 = vld [vmem:[%s1278_s0 + $0x10] ss:$8 sps:$4 sm:$0xff]  }
   0x7   :  { %168 = vmatprep.subr.bf16.mxu0 %v942_v0  ;;  %312 = vmatprep.subr.bf16.mxu1 %v942_v0  ;;  %v845_v15 = vld [vmem:[%s1279_s1] ss:$8 sps:$4 sm:$0xff]   ;;  %v853_v19 = vld [vmem:[%s1279_s1 + $0x10] ss:$8 sps:$4 sm:$0xff]   ;;  %v854_v20 = vld [vmem:[%s1278_s0 + $0x24] ss:$8 sps:$4 sm:$0xff]  }
   0x8   :  { %v857_v21 = vld [vmem:[%s1279_s1 + $0x24] ss:$8 sps:$4 sm:$0xff]   ;;  %v856_v22 = vld [vmem:[%s1278_s0 + $0x20] ss:$8 sps:$4 sm:$0xff]   ;;  %v50_v24 = vld [vmem:[%s1278_s0 + $0x30] sm:$0x11] }
   0x9   :  { %v859_v23 = vld [vmem:[%s1279_s1 + $0x20] ss:$8 sps:$4 sm:$0xff]   ;;  %v262_v25 = vld [vmem:[%s1279_s1 + $0x30] sm:$0x11]  ;;  %v766_v26 = vcombine.high %v50_v24, %v50_v24  ;;  %v765_v28 = vcombine.low %v50_v24, %v50_v24  ;;  %v866_v30 = vld [vmem:[%s1280_s2 + $0x4] ss:$8 sps:$4 sm:$0xff]  }
   0xa   :  { %169 = vmatpush1.bf16.msra.mxu0 %v999_v3  ;;  %313 = vmatpush1.bf16.msra.mxu1 %v999_v3  ;;  %v788_v27 = vcombine.high %v262_v25, %v262_v25  ;;  %v787_v29 = vcombine.low %v262_v25, %v262_v25  ;;  %v869_v31 = vld [vmem:[%s1281_s3 + $0x4] ss:$8 sps:$4 sm:$0xff]   ;;  %v864_v32 = vld [vmem:[%s1280_s2] ss:$8 sps:$4 sm:$0xff]   ;;  %v870_v34 = vld [vmem:[%s1280_s2 + $0x14] ss:$8 sps:$4 sm:$0xff]  }
   0xb   :  { %170 = vmatprep.subr.bf16.mxu0 %v942_v0  ;;  %314 = vmatprep.subr.bf16.mxu1 %v942_v0  ;;  %v867_v33 = vld [vmem:[%s1281_s3] ss:$8 sps:$4 sm:$0xff]   ;;  %v872_v35 = vld [vmem:[%s1281_s3 + $0x14] ss:$8 sps:$4 sm:$0xff]   ;;  %v874_v36 = vld [vmem:[%s1280_s2 + $0x10] ss:$8 sps:$4 sm:$0xff]  }
   0xc   :  { %v875_v37 = vld [vmem:[%s1281_s3 + $0x10] ss:$8 sps:$4 sm:$0xff]   ;;  %v876_v38 = vld [vmem:[%s1280_s2 + $0x24] ss:$8 sps:$4 sm:$0xff]   ;;  %v880_v42 = vld [vmem:[%s1280_s2 + $0x20] ss:$8 sps:$4 sm:$0xff]  }
   0xd   :  { %v878_v39 = vld [vmem:[%s1281_s3 + $0x24] ss:$8 sps:$4 sm:$0xff]   ;;  %v413_v40 = vld [vmem:[%s1280_s2 + $0x30] sm:$0x11]  ;;  %v881_v43 = vld [vmem:[%s1281_s3 + $0x20] ss:$8 sps:$4 sm:$0xff]  }
   0xe   :  { %171 = vmatpush1.bf16.msra.mxu0 %v1008_v4  ;;  %315 = vmatpush1.bf16.msra.mxu1 %v1008_v4  ;;  %v564_v41 = vld [vmem:[%s1281_s3 + $0x30] sm:$0x11]  ;;  %v800_v44 = vcombine.high %v413_v40, %v413_v40  ;;  %v799_v46 = vcombine.low %v413_v40, %v413_v40  ;;  %v1213_v6 = vld [vmem:[%s1282_s5] ss:$0 sm:$0xff] }
   0xf   :  { %172 = vmatprep.subr.bf16.mxu0 %v942_v0  ;;  %316 = vmatprep.subr.bf16.mxu1 %v942_v0  ;;  %v812_v45 = vcombine.high %v564_v41, %v564_v41  ;;  %v811_v47 = vcombine.low %v564_v41, %v564_v41 }
  0x12   :  { %173 = vmatpush1.bf16.msra.mxu0 %v1024_v7  ;;  %317 = vmatpush1.bf16.msra.mxu1 %v1024_v7 }
  0x13   :  { %174 = vmatprep.subr.bf16.mxu0 %v942_v0  ;;  %318 = vmatprep.subr.bf16.mxu1 %v942_v0 }
  0x16   :  { %175 = vmatpush1.bf16.msra.mxu0 %v1034_v8  ;;  %319 = vmatpush1.bf16.msra.mxu1 %v1034_v8 }
  0x17   :  { %176 = vmatprep.subr.bf16.mxu0 %v942_v0  ;;  %320 = vmatprep.subr.bf16.mxu1 %v942_v0 }
  0x1a   :  { %177 = vmatpush1.bf16.msra.mxu0 %v1043_v9  ;;  %321 = vmatpush1.bf16.msra.mxu1 %v1043_v9 }
  0x1b   :  { %178 = vmatprep.subr.bf16.mxu0 %v942_v0  ;;  %322 = vmatprep.subr.bf16.mxu1 %v942_v0 }
  0x1e   :  { %179 = vmatpush1.bf16.msra.mxu0 %v1052_v10  ;;  %323 = vmatpush1.bf16.msra.mxu1 %v1052_v10 }
  0x1f   :  { %192 = vmatprep.subr.bf16.mxu0 %v942_v0  ;;  %336 = vmatprep.subr.bf16.mxu1 %v942_v0 }
  0x22   :  { %193 = vmatpush2.bf16.msra.mxu0 %v1063_v12  ;;  %337 = vmatpush2.bf16.msra.mxu1 %v1063_v12 }
  0x23   :  { %194 = vmatprep.subr.bf16.mxu0 %v942_v0  ;;  %338 = vmatprep.subr.bf16.mxu1 %v942_v0 }
  0x26   :  { %195 = vmatpush2.bf16.msra.mxu0 %v1070_v13  ;;  %339 = vmatpush2.bf16.msra.mxu1 %v1070_v13 }
  0x27   :  { %459 = vmatprep.subr.bf16.mxu0 %v942_v0  ;;  %610 = vmatprep.subr.bf16.mxu1 %v942_v0 }
  0x29   :  { %197 = vmatmul.mubr.bf16.vlgmr.msra.gmra.mxu0 %v842_v14  ;;  %341 = vmatmul.mubr.bf16.vlgmr.msra.gmra.mxu1 %v845_v15 }
  0x2a   :  { %460 = vmatpush1.bf16.msra.mxu0 %v983_v1  ;;  %611 = vmatpush1.bf16.msra.mxu1 %v983_v1 }
  0x2b   :  { %461 = vmatprep.subr.bf16.mxu0 %v942_v0  ;;  %612 = vmatprep.subr.bf16.mxu1 %v942_v0 }
  0x2c   :  { %778 = vmatprep.mubr.msk.bf16.mxu0 %vm147_vm0, %v848_v16  ;;  %790 = vmatprep.mubr.msk.bf16.mxu1 %vm147_vm0, %v851_v17 }
  0x2e   :  { %462 = vmatpush1.bf16.msra.mxu0 %v990_v2  ;;  %613 = vmatpush1.bf16.msra.mxu1 %v990_v2 }
  0x2f   :  { %463 = vmatprep.subr.bf16.mxu0 %v942_v0  ;;  %614 = vmatprep.subr.bf16.mxu1 %v942_v0 }
  0x31   :  { %205 = vmatmul.mubr.bf16.gmra.mxu0 %v850_v18  ;;  %349 = vmatmul.mubr.bf16.gmra.mxu1 %v853_v19 }
  0x32   :  { %464 = vmatpush1.bf16.msra.mxu0 %v999_v3  ;;  %615 = vmatpush1.bf16.msra.mxu1 %v999_v3 }
  0x33   :  { %465 = vmatprep.subr.bf16.mxu0 %v942_v0  ;;  %616 = vmatprep.subr.bf16.mxu1 %v942_v0 }
  0x34   :  { %779 = vmatprep.mubr.msk.bf16.mxu0 %vm147_vm0, %v854_v20  ;;  %791 = vmatprep.mubr.msk.bf16.mxu1 %vm147_vm0, %v857_v21 }
  0x36   :  { %466 = vmatpush1.bf16.msra.mxu0 %v1008_v4  ;;  %617 = vmatpush1.bf16.msra.mxu1 %v1008_v4 }
  0x37   :  { %467 = vmatprep.subr.bf16.mxu0 %v942_v0  ;;  %618 = vmatprep.subr.bf16.mxu1 %v942_v0 }
  0x39   :  { %213 = vmatmul.mubr.bf16.gmra.mxu0 %v856_v22  ;;  %357 = vmatmul.mubr.bf16.gmra.mxu1 %v859_v23 }
  0x3a   :  { %468 = vmatpush1.bf16.msra.mxu0 %v1024_v7  ;;  %619 = vmatpush1.bf16.msra.mxu1 %v1024_v7 }
  0x3b   :  { %469 = vmatprep.subr.bf16.mxu0 %v942_v0  ;;  %620 = vmatprep.subr.bf16.mxu1 %v942_v0 }
  0x3c   :  { %780 = vmatprep.mubr.msk.bf16.mxu0 %vm147_vm0, %v766_v26  ;;  %792 = vmatprep.mubr.msk.bf16.mxu1 %vm147_vm0, %v788_v27 }
  0x3e   :  { %470 = vmatpush1.bf16.msra.mxu0 %v1034_v8  ;;  %621 = vmatpush1.bf16.msra.mxu1 %v1034_v8 }
  0x3f   :  { %471 = vmatprep.subr.bf16.mxu0 %v942_v0  ;;  %622 = vmatprep.subr.bf16.mxu1 %v942_v0 }
  0x41   :  { %221 = vmatmul.mubr.bf16.gmra.mxu0 %v765_v28  ;;  %365 = vmatmul.mubr.bf16.gmra.mxu1 %v787_v29 }
  0x42   :  { %472 = vmatpush1.bf16.msra.mxu0 %v1043_v9  ;;  %623 = vmatpush1.bf16.msra.mxu1 %v1043_v9 }
  0x43   :  { %473 = vmatprep.subr.bf16.mxu0 %v942_v0  ;;  %624 = vmatprep.subr.bf16.mxu1 %v942_v0 }
  0x44   :  { %801 = vmatprep.mubr.msk.bf16.mxu0 %vm147_vm0, %v866_v30  ;;  %813 = vmatprep.mubr.msk.bf16.mxu1 %vm147_vm0, %v869_v31 }
  0x46   :  { %474 = vmatpush1.bf16.msra.mxu0 %v1052_v10  ;;  %625 = vmatpush1.bf16.msra.mxu1 %v1052_v10 }
  0x47   :  { %487 = vmatprep.subr.bf16.mxu0 %v942_v0  ;;  %638 = vmatprep.subr.bf16.mxu1 %v942_v0 }
  0x4a   :  { %488 = vmatpush2.bf16.msra.mxu0 %v1063_v12  ;;  %639 = vmatpush2.bf16.msra.mxu1 %v1063_v12 }
  0x4b   :  { %489 = vmatprep.subr.bf16.mxu0 %v942_v0  ;;  %640 = vmatprep.subr.bf16.mxu1 %v942_v0 }
  0x4e   :  { %490 = vmatpush2.bf16.msra.mxu0 %v1070_v13  ;;  %641 = vmatpush2.bf16.msra.mxu1 %v1070_v13 }
  0x51   :  { %492 = vmatmul.mubr.bf16.vlgmr.msra.gmra.mxu0 %v864_v32  ;;  %643 = vmatmul.mubr.bf16.vlgmr.msra.gmra.mxu1 %v867_v33 }
  0x52   :  { %802 = vmatprep.mubr.msk.bf16.mxu0 %vm147_vm0, %v870_v34  ;;  %814 = vmatprep.mubr.msk.bf16.mxu1 %vm147_vm0, %v872_v35 }
  0x59   :  { %500 = vmatmul.mubr.bf16.gmra.mxu0 %v874_v36  ;;  %651 = vmatmul.mubr.bf16.gmra.mxu1 %v875_v37 }
  0x5a   :  { %803 = vmatprep.mubr.msk.bf16.mxu0 %vm147_vm0, %v876_v38  ;;  %815 = vmatprep.mubr.msk.bf16.mxu1 %vm147_vm0, %v878_v39 }
  0x61   :  { %508 = vmatmul.mubr.bf16.gmra.mxu0 %v880_v42  ;;  %659 = vmatmul.mubr.bf16.gmra.mxu1 %v881_v43 }
  0x62   :  { %804 = vmatprep.mubr.msk.bf16.mxu0 %vm147_vm0, %v800_v44  ;;  %816 = vmatprep.mubr.msk.bf16.mxu1 %vm147_vm0, %v812_v45 }
  0x69   :  { %516 = vmatmul.mubr.bf16.gmra.mxu0 %v799_v46  ;;  %667 = vmatmul.mubr.bf16.gmra.mxu1 %v811_v47 }
  0xe9   :  { %v198_v48 = vpop.f32.mrf.mxu0  ;;  %v342_v49 = vpop.f32.mrf.mxu1 }
  0xea   :  { %v199_v11 = vadd.f32 %v1213_v6, %v198_v48  ;;  %v343_v12 = vadd.f32 %v1213_v6, %v342_v49 }
  0xeb   :  { %v200_v50 = vpop.f32.mrf.mxu0  ;;  %v344_v51 = vpop.f32.mrf.mxu1 }
  0xec   :  { %v228_v17 = vmul.f32 0.5, %v199_v11  ;;  %v372_v19 = vmul.f32 0.5, %v343_v12 }
  0xed   :  { %v201_v52 = vpop.f32.mrf.mxu0  ;;  %v345_v53 = vpop.f32.mrf.mxu1 }
  0xee   :  { %v202_v18 = vadd.f32 %v1213_v6, %v201_v52  ;;  %v346_v20 = vadd.f32 %v1213_v6, %v345_v53  ;;  %886 = vtanh.f32 %v228_v17 }
  0xef   :  { %v203_v54 = vpop.f32.mrf.mxu0  ;;  %v347_v55 = vpop.f32.mrf.mxu1  ;;  %888 = vtanh.f32 %v372_v19 }
  0xf0   :  { %v229_v25 = vmul.f32 0.5, %v202_v18  ;;  %v373_v26 = vmul.f32 0.5, %v346_v20 }
  0xf1   :  { %v206_v56 = vpop.f32.mrf.mxu0  ;;  %v350_v57 = vpop.f32.mrf.mxu1 }
  0xf2   :  { %v207_v23 = vadd.f32 %v1213_v6, %v206_v56  ;;  %v351_v24 = vadd.f32 %v1213_v6, %v350_v57  ;;  %890 = vtanh.f32 %v229_v25 }
  0xf3   :  { %v208_v58 = vpop.f32.mrf.mxu0  ;;  %v352_v59 = vpop.f32.mrf.mxu1  ;;  %892 = vtanh.f32 %v373_v26 }
  0xf4   :  { %v230_v27 = vmul.f32 0.5, %v207_v23  ;;  %v374_v29 = vmul.f32 0.5, %v351_v24 }
  0xf5   :  { %v209_v60 = vpop.f32.mrf.mxu0  ;;  %v353_v61 = vpop.f32.mrf.mxu1 }
  0xf6   :  { %v210_v28 = vadd.f32 %v1213_v6, %v209_v60  ;;  %v354_v30 = vadd.f32 %v1213_v6, %v353_v61  ;;  %894 = vtanh.f32 %v230_v27 }
  0xf7   :  { %v211_v62 = vpop.f32.mrf.mxu0  ;;  %v355_v63 = vpop.f32.mrf.mxu1  ;;  %896 = vtanh.f32 %v374_v29 }
  0xf8   :  { %v231_v31 = vmul.f32 0.5, %v210_v28  ;;  %v375_v33 = vmul.f32 0.5, %v354_v30 }
  0xf9   :  { %v214_v0 = vpop.f32.mrf.mxu0  ;;  %v358_v1 = vpop.f32.mrf.mxu1 }
  0xfa   :  { %v215_v32 = vadd.f32 %v1213_v6, %v214_v0  ;;  %v359_v34 = vadd.f32 %v1213_v6, %v358_v1  ;;  %898 = vtanh.f32 %v231_v31 }
  0xfb   :  { %v216_v2 = vpop.f32.mrf.mxu0  ;;  %v360_v3 = vpop.f32.mrf.mxu1  ;;  %900 = vtanh.f32 %v375_v33 }
  0xfc   :  { %v232_v41 = vmul.f32 0.5, %v215_v32  ;;  %v376_v44 = vmul.f32 0.5, %v359_v34  ;;  %v887_v49 = vpop.eup %886 }
  0xfd   :  { %v217_v4 = vpop.f32.mrf.mxu0  ;;  %v1208_v5 = vpop.f32.mrf.mxu1  ;;  %v242_v59 = vadd.f32 1.0, %v887_v49 }
  0xfe   :  { %v889_v52 = vpop.eup %888  ;;  %v218_v53 = vadd.f32 %v1213_v6, %v217_v4  ;;  %v362_v56 = vadd.f32 %v1213_v6, %v1208_v5 }
  0xff   :  { %v219_v7 = vpop.f32.mrf.mxu0  ;;  %v363_v8 = vpop.f32.mrf.mxu1  ;;  %v386_v63 = vadd.f32 1.0, %v889_v52 }
 0x100   :  { %v891_v62 = vpop.eup %890  ;;  %v233_v3 = vmul.f32 0.5, %v218_v53  ;;  %v377_v11 = vmul.f32 0.5, %v362_v56 }
 0x101   :  { %v1215_v9 = vpop.f32.mrf.mxu0  ;;  %v1217_v10 = vpop.f32.mrf.mxu1  ;;  %v393_v19 = vmul.f32 0.5, %v386_v63  ;;  %v243_v20 = vadd.f32 1.0, %v891_v62 }
 0x102   :  { %v893_v2 = vpop.eup %892  ;;  %v223_v4 = vadd.f32 %v1213_v6, %v1215_v9  ;;  %v367_v12 = vadd.f32 %v1213_v6, %v1217_v10 }
 0x103   :  { %v224_v13 = vpop.f32.mrf.mxu0  ;;  %v368_v14 = vpop.f32.mrf.mxu1 }
 0x104   :  { %v895_v8 = vpop.eup %894  ;;  %v234_v23 = vmul.f32 0.5, %v223_v4  ;;  %v378_v28 = vmul.f32 0.5, %v367_v12 }
 0x105   :  { %v225_v15 = vpop.f32.mrf.mxu0  ;;  %v369_v16 = vpop.f32.mrf.mxu1  ;;  %v244_v26 = vadd.f32 1.0, %v895_v8 }
 0x106   :  { %v897_v15 = vpop.eup %896  ;;  %v249_v16 = vmul.f32 0.5, %v242_v59 }
 0x107   :  { %v226_v21 = vpop.f32.mrf.mxu0  ;;  %v370_v22 = vpop.f32.mrf.mxu1  ;;  %v388_v27 = vadd.f32 1.0, %v897_v15 }
 0x108   :  { %v387_v21 = vadd.f32 1.0, %v893_v2  ;;  %v899_v10 = vpop.eup %898 }
 0x109   :  { %v901_v31 = vpop.eup %900  ;;  %v245_v56 = vadd.f32 1.0, %v899_v10 }
 0x10a   :  { %v389_v2 = vadd.f32 1.0, %v901_v31 }
 0x111   :  { %v493_v35 = vpop.f32.mrf.mxu0  ;;  %v644_v36 = vpop.f32.mrf.mxu1 }
 0x112   :  { %v494_v37 = vadd.f32 %v1213_v6, %v493_v35  ;;  %v645_v38 = vadd.f32 %v1213_v6, %v644_v36  ;;  %v400_v35 = vadd.f32 %v393_v19, %v249_v16  ;;  %v250_v36 = vmul.f32 0.5, %v243_v20 }
 0x113   :  { %v495_v39 = vpop.f32.mrf.mxu0  ;;  %v646_v40 = vpop.f32.mrf.mxu1 }
 0x114   :  { %v523_v42 = vmul.f32 0.5, %v494_v37  ;;  %v674_v43 = vmul.f32 0.5, %v645_v38  ;;  %v394_v37 = vmul.f32 0.5, %v387_v21 }
 0x115   :  { %v496_v45 = vpop.f32.mrf.mxu0  ;;  %v647_v46 = vpop.f32.mrf.mxu1 }
 0x116   :  { %902 = vtanh.f32 %v523_v42  ;;  %v497_v47 = vadd.f32 %v1213_v6, %v496_v45  ;;  %v648_v48 = vadd.f32 %v1213_v6, %v647_v46  ;;  %v251_v45 = vmul.f32 0.5, %v244_v26 }
 0x117   :  { %904 = vtanh.f32 %v674_v43  ;;  %v498_v50 = vpop.f32.mrf.mxu0  ;;  %v649_v51 = vpop.f32.mrf.mxu1  ;;  %v395_v46 = vmul.f32 0.5, %v388_v27 }
 0x118   :  { %906 = vtanh.f32 %v232_v41  ;;  %v524_v54 = vmul.f32 0.5, %v497_v47  ;;  %v675_v55 = vmul.f32 0.5, %v648_v48 }
 0x119   :  { %908 = vtanh.f32 %v376_v44  ;;  %v501_v57 = vpop.f32.mrf.mxu0  ;;  %v652_v58 = vpop.f32.mrf.mxu1 }
 0x11a   :  { %910 = vtanh.f32 %v524_v54  ;;  %v502_v60 = vadd.f32 %v1213_v6, %v501_v57  ;;  %v653_v61 = vadd.f32 %v1213_v6, %v652_v58 }
 0x11b   :  { %912 = vtanh.f32 %v675_v55  ;;  %v503_v0 = vpop.f32.mrf.mxu0  ;;  %v654_v1 = vpop.f32.mrf.mxu1  ;;  %v401_v55 = vadd.f32 %v394_v37, %v250_v36 }
 0x11c   :  { %v525_v7 = vmul.f32 0.5, %v502_v60  ;;  %v676_v5 = vmul.f32 0.5, %v653_v61  ;;  %v402_v1 = vadd.f32 %v395_v46, %v251_v45 }
 0x11d   :  { %v504_v13 = vpop.f32.mrf.mxu0  ;;  %v655_v14 = vpop.f32.mrf.mxu1 }
 0x11e   :  { %914 = vtanh.f32 %v525_v7  ;;  %v505_v17 = vadd.f32 %v1213_v6, %v504_v13  ;;  %v656_v18 = vadd.f32 %v1213_v6, %v655_v14 }
 0x11f   :  { %916 = vtanh.f32 %v676_v5  ;;  %v506_v9 = vpop.f32.mrf.mxu0  ;;  %v657_v22 = vpop.f32.mrf.mxu1 }
 0x120   :  { %918 = vtanh.f32 %v233_v3  ;;  %v526_v24 = vmul.f32 0.5, %v505_v17  ;;  %v677_v25 = vmul.f32 0.5, %v656_v18 }
 0x121   :  { %920 = vtanh.f32 %v377_v11  ;;  %v509_v29 = vpop.f32.mrf.mxu0  ;;  %v660_v30 = vpop.f32.mrf.mxu1 }
 0x122   :  { %922 = vtanh.f32 %v526_v24  ;;  %v510_v32 = vadd.f32 %v1213_v6, %v509_v29  ;;  %v661_v33 = vadd.f32 %v1213_v6, %v660_v30  ;;  %v252_v24 = vmul.f32 0.5, %v245_v56 }
 0x123   :  { %v903_v34 = vpop.eup %902  ;;  %924 = vtanh.f32 %v677_v25  ;;  %v511_v38 = vpop.f32.mrf.mxu0  ;;  %v396_v25 = vmul.f32 0.5, %v389_v2 }
 0x124   :  { %v662_v39 = vpop.f32.mrf.mxu1  ;;  %v905_v40 = vpop.eup %904  ;;  %926 = vtanh.f32 %v234_v23  ;;  %v537_v41 = vadd.f32 1.0, %v903_v34  ;;  %v527_v42 = vmul.f32 0.5, %v510_v32  ;;  %v678_v43 = vmul.f32 0.5, %v661_v33 }
 0x125   :  { %v907_v44 = vpop.eup %906  ;;  %928 = vtanh.f32 %v378_v28  ;;  %v688_v47 = vadd.f32 1.0, %v905_v40  ;;  %v512_v48 = vpop.f32.mrf.mxu0 }
 0x126   :  { %v663_v49 = vpop.f32.mrf.mxu1  ;;  %v909_v50 = vpop.eup %908  ;;  %v544_v51 = vmul.f32 0.5, %v537_v41  ;;  %930 = vtanh.f32 %v527_v42  ;;  %v513_v52 = vadd.f32 %v1213_v6, %v512_v48  ;;  %v246_v3 = vadd.f32 1.0, %v907_v44 }
 0x127   :  { %v664_v53 = vadd.f32 %v1213_v6, %v663_v49  ;;  %v911_v54 = vpop.eup %910  ;;  %v695_v57 = vmul.f32 0.5, %v688_v47  ;;  %932 = vtanh.f32 %v678_v43  ;;  %v514_v58 = vpop.f32.mrf.mxu0  ;;  %v390_v14 = vadd.f32 1.0, %v909_v50 }
 0x128   :  { %v665_v59 = vpop.f32.mrf.mxu1  ;;  %v913_v60 = vpop.eup %912  ;;  %v551_v61 = vadd.f32 %v544_v51, %v400_v35  ;;  %v538_v62 = vadd.f32 1.0, %v911_v54  ;;  %v528_v63 = vmul.f32 0.5, %v513_v52  ;;  %v253_v33 = vmul.f32 0.5, %v246_v3 }
 0x129   :  { %v679_v0 = vmul.f32 0.5, %v664_v53  ;;  %v689_v4 = vadd.f32 1.0, %v913_v60  ;;  %v517_v7 = vpop.f32.mrf.mxu0  ;;  %v397_v34 = vmul.f32 0.5, %v390_v14  ;;  %v403_v47 = vadd.f32 %v396_v25, %v252_v24 }
 0x12a   :  { %v668_v5 = vpop.f32.mrf.mxu1  ;;  %v702_v8 = vadd.f32 %v695_v57, %v551_v61  ;;  %v545_v11 = vmul.f32 0.5, %v538_v62  ;;  %934 = vtanh.f32 %v528_v63  ;;  %v518_v12 = vadd.f32 %v1213_v6, %v517_v7 }
 0x12b   :  { %v915_v13 = vpop.eup %914  ;;  %v696_v15 = vmul.f32 0.5, %v689_v4  ;;  %936 = vtanh.f32 %v679_v0  ;;  %v669_v16 = vadd.f32 %v1213_v6, %v668_v5  ;;  %v519_v17 = vpop.f32.mrf.mxu0  ;;  %v404_v52 = vadd.f32 %v397_v34, %v253_v33 }
 0x12c   :  { %v670_v18 = vpop.f32.mrf.mxu1  ;;  %v917_v19 = vpop.eup %916  ;;  %v709_v20 = vmul.f32 0.25, %v702_v8  ;;  %v552_v21 = vadd.f32 %v545_v11, %v401_v55  ;;  %v539_v9 = vadd.f32 1.0, %v915_v13  ;;  %v529_v22 = vmul.f32 0.5, %v518_v12 }
 0x12d   :  { %v919_v23 = vpop.eup %918  ;;  %v690_v10 = vadd.f32 1.0, %v917_v19  ;;  %v680_v26 = vmul.f32 0.5, %v669_v16  ;;  %v520_v27 = vpop.f32.mrf.mxu0 }
 0x12e   :  { %v671_v28 = vpop.f32.mrf.mxu1  ;;  %v921_v29 = vpop.eup %920  ;;  %v824_v30 = vpack.c.bf16 %v709_v20, %v709_v20  ;;  %v703_v31 = vadd.f32 %v696_v15, %v552_v21  ;;  %v546_v32 = vmul.f32 0.5, %v539_v9  ;;  %938 = vtanh.f32 %v529_v22 }
 0x12f   :  { %v923_v6 = vpop.eup %922  ;;  %v697_v35 = vmul.f32 0.5, %v690_v10  ;;  %940 = vtanh.f32 %v680_v26  ;;  %v521_v36 = vpop.f32.mrf.mxu0  ;;  %v247_v43 = vadd.f32 1.0, %v919_v23  ;;  %v391_v44 = vadd.f32 1.0, %v921_v29 }
 0x130   :  { %v672_v37 = vpop.f32.mrf.mxu1  ;;  %v925_v38 = vpop.eup %924  ;;  %746 = vst.msk [vmem:[%s1283_s6] sm:$0xf] %vm745_vm2, %v824_v30  ;;  %v710_v39 = vmul.f32 0.25, %v703_v31  ;;  %v553_v40 = vadd.f32 %v546_v32, %v402_v1  ;;  %v540_v41 = vadd.f32 1.0, %v923_v6 }
 0x131   :  { %v927_v42 = vpop.eup %926  ;;  %v691_v45 = vadd.f32 1.0, %v925_v38  ;;  %v254_v58 = vmul.f32 0.5, %v247_v43  ;;  %v398_v59 = vmul.f32 0.5, %v391_v44 }
 0x132   :  { %v929_v46 = vpop.eup %928  ;;  %v825_v48 = vpack.c.bf16 %v710_v39, %v710_v39  ;;  %v704_v49 = vadd.f32 %v697_v35, %v553_v40  ;;  %v547_v50 = vmul.f32 0.5, %v540_v41  ;;  %v248_v60 = vadd.f32 1.0, %v927_v42 }
 0x133   :  { %v931_v51 = vpop.eup %930  ;;  %v698_v56 = vmul.f32 0.5, %v691_v45  ;;  %v392_v62 = vadd.f32 1.0, %v929_v46  ;;  %v405_v11 = vadd.f32 %v398_v59, %v254_v58 }
 0x134   :  { %v933_v53 = vpop.eup %932  ;;  %747 = vst.msk [vmem:[%s1283_s6 + $0x4] sm:$0xf] %vm745_vm2, %v825_v48  ;;  %v711_v54 = vmul.f32 0.25, %v704_v49  ;;  %v554_v55 = vadd.f32 %v547_v50, %v403_v47  ;;  %v541_v57 = vadd.f32 1.0, %v931_v51  ;;  %v255_v12 = vmul.f32 0.5, %v248_v60 }
 0x135   :  { %v692_v61 = vadd.f32 1.0, %v933_v53  ;;  %v399_v14 = vmul.f32 0.5, %v392_v62 }
 0x136   :  { %v826_v63 = vpack.c.bf16 %v711_v54, %v711_v54  ;;  %v705_v0 = vadd.f32 %v698_v56, %v554_v55  ;;  %v548_v1 = vmul.f32 0.5, %v541_v57 }
 0x137   :  { %v935_v2 = vpop.eup %934  ;;  %v699_v3 = vmul.f32 0.5, %v692_v61  ;;  %v406_v24 = vadd.f32 %v399_v14, %v255_v12 }
 0x138   :  { %v937_v4 = vpop.eup %936  ;;  %748 = vst.msk [vmem:[%s1283_s6 + $0x8] sm:$0xf] %vm745_vm2, %v826_v63  ;;  %v712_v7 = vmul.f32 0.25, %v705_v0  ;;  %v555_v5 = vadd.f32 %v548_v1, %v404_v52  ;;  %v542_v8 = vadd.f32 1.0, %v935_v2 }
 0x139   :  { %v693_v13 = vadd.f32 1.0, %v937_v4 }
 0x13a   :  { %v827_v15 = vpack.c.bf16 %v712_v7, %v712_v7  ;;  %v706_v16 = vadd.f32 %v699_v3, %v555_v5  ;;  %v549_v17 = vmul.f32 0.5, %v542_v8 }
 0x13b   :  { %v939_v18 = vpop.eup %938  ;;  %v700_v9 = vmul.f32 0.5, %v693_v13 }
 0x13c   :  { %v941_v19 = vpop.eup %940  ;;  %749 = vst.msk [vmem:[%s1283_s6 + $0xc] sm:$0xf] %vm745_vm2, %v827_v15  ;;  %v713_v20 = vmul.f32 0.25, %v706_v16  ;;  %v556_v21 = vadd.f32 %v549_v17, %v405_v11  ;;  %v543_v22 = vadd.f32 1.0, %v939_v18 }
 0x13d   :  { %v694_v23 = vadd.f32 1.0, %v941_v19 }
 0x13e   :  { %v828_v25 = vpack.c.bf16 %v713_v20, %v713_v20  ;;  %v707_v10 = vadd.f32 %v700_v9, %v556_v21  ;;  %v550_v26 = vmul.f32 0.5, %v543_v22 }
 0x13f   :  { %v701_v27 = vmul.f32 0.5, %v694_v23 }
 0x140   :  { %750 = vst.msk [vmem:[%s1283_s6 + $0x10] sm:$0xf] %vm745_vm2, %v828_v25  ;;  %v714_v28 = vmul.f32 0.25, %v707_v10  ;;  %v557_v29 = vadd.f32 %v550_v26, %v406_v24 }
 0x142   :  { %v829_v30 = vpack.c.bf16 %v714_v28, %v714_v28  ;;  %v708_v31 = vadd.f32 %v701_v27, %v557_v29 }
 0x144   :  { %751 = vst.msk [vmem:[%s1283_s6 + $0x14] sm:$0xf] %vm745_vm2, %v829_v30  ;;  %v715_v32 = vmul.f32 0.25, %v708_v31 }
 0x146   :  { %v830_v6 = vpack.c.bf16 %v715_v32, %v715_v32 }
 0x148   :  { %753 = vst.msk [vmem:[%s1283_s6 + $0x18] sm:$0x1] %vm752_vm3, %v830_v6 }

// kernel: lenet_forward.5
= control target key start
LH: loop header
LB: loop body
LE: loop exit
PB: predicated region body
PF: predicated region fallthrough
CT: control target
= control target key end

     0   :  { %v809_v1 = vmov 0   ;;  %v98_v19 = vlaneseq  ;;  %v810_v27 = vmov 1966171168   ;;  %vm264_vm0 = vcmask 130048   ;;  %s1023_s0 = inlined_call_operand.vmem [shape: bf16[2,400], index: 0, kind: input, shape index: {}]   ;;  %s1024_s1 = inlined_call_operand.vmem [shape: bf16[400,128], index: 1, kind: input, shape index: {}]   ;;  %s1025_s2 = inlined_call_operand.vmem [shape: f32[1,128], index: 2, kind: input, shape index: {}]   ;;  %s1026_s3 = inlined_call_operand.vmem [shape: bf16[128,128], index: 3, kind: input, shape index: {}]   ;;  %s1027_s4 = inlined_call_operand.vmem [shape: f32[1,128], index: 4, kind: input, shape index: {}]   ;;  %s1028_s5 = inlined_call_operand.vmem [shape: bf16[128,10], index: 5, kind: input, shape index: {}]   ;;  %s1029_s6 = inlined_call_operand.vmem [shape: f32[1,10], index: 6, kind: input, shape index: {}]   ;;  %s1030_s7 = inlined_call_operand.hbm [shape: f32[2,10], index: 7, kind: output, shape index: {}]  }
   0x1   :  { %v738_v0 = vld [vmem:[%s1024_s1 + $0x78] sm:$0xff]   ;;  %308 = vmatprep.subr.bf16.mxu1 %v809_v1  ;;  %v741_v4 = vld [vmem:[%s1024_s1 + $0x70] sm:$0xff]   ;;  %v744_v7 = vld [vmem:[%s1024_s1 + $0x68] sm:$0xff]   ;;  %v96_v28 = vunpack.c.l.s4 %v810_v27  ;;  %v811_v37 = vmov 0.0  }
   0x2   :  { %v739_v2 = vld [vmem:[%s1024_s1 + $0xb8] sm:$0xff]   ;;  %653 = vmatprep.subr.bf16.mxu0 %v738_v0  ;;  %v742_v5 = vld [vmem:[%s1024_s1 + $0xb0] sm:$0xff]   ;;  %v745_v8 = vld [vmem:[%s1024_s1 + $0xa8] sm:$0xff]   ;;  %v99_v24 = vshrl.u32 %v98_v19, 7 }
   0x3   :  { %v740_v3 = vld [vmem:[%s1024_s1 + $0x38] sm:$0xff]   ;;  %309 = vmatpush1.bf16.msra.mxu1 %v739_v2  ;;  %v743_v6 = vld [vmem:[%s1024_s1 + $0x30] sm:$0xff]   ;;  %v746_v9 = vld [vmem:[%s1024_s1 + $0x28] sm:$0xff]   ;;  %v97_v31 = vunpack.c.0.s8 %v96_v28 }
   0x4   :  { %654 = vmatpush3.bf16.msra.mxu0 %v740_v3  ;;  %310 = vmatprep.subr.bf16.mxu1 %v809_v1  ;;  %v747_v10 = vld [vmem:[%s1024_s1 + $0x60] sm:$0xff]   ;;  %v750_v13 = vld [vmem:[%s1024_s1 + $0x58] sm:$0xff]   ;;  %v753_v16 = vld [vmem:[%s1024_s1 + $0x50] sm:$0xff]  }
   0x5   :  { %655 = vmatprep.subr.bf16.mxu0 %v741_v4  ;;  %v748_v11 = vld [vmem:[%s1024_s1 + $0xa0] sm:$0xff]   ;;  %v751_v14 = vld [vmem:[%s1024_s1 + $0x98] sm:$0xff]   ;;  %v754_v17 = vld [vmem:[%s1024_s1 + $0x90] sm:$0xff]   ;;  %v100_v32 = vsub.s32 %v97_v31, %v99_v24 }
   0x6   :  { %v749_v12 = vld [vmem:[%s1024_s1 + $0x20] sm:$0xff]   ;;  %v752_v15 = vld [vmem:[%s1024_s1 + $0x18] sm:$0xff]   ;;  %v755_v18 = vld [vmem:[%s1024_s1 + $0x10] sm:$0xff]  }
   0x7   :  { %311 = vmatpush1.bf16.msra.mxu1 %v742_v5  ;;  %v756_v20 = vld [vmem:[%s1024_s1 + $0x48] sm:$0xff]   ;;  %v759_v23 = vld [vmem:[%s1024_s1 + $0x40] sm:$0xff]  }
   0x8   :  { %656 = vmatpush3.bf16.msra.mxu0 %v743_v6  ;;  %312 = vmatprep.subr.bf16.mxu1 %v809_v1  ;;  %v757_v21 = vld [vmem:[%s1024_s1 + $0x88] sm:$0xff]   ;;  %v608_v25 = vld.sshfl [vmem:[%s1023_s0] sm:$0x33 pattern:$0x75316420] }
   0x9   :  { %657 = vmatprep.subr.bf16.mxu0 %v744_v7  ;;  %v758_v22 = vld [vmem:[%s1024_s1 + $0x8] sm:$0xff]   ;;  %v760_v26 = vld [vmem:[%s1024_s1 + $0x80] sm:$0xff]   ;;  %v94_v30 = vcombine.high %v608_v25, %v608_v25  ;;  %v101_v35 = vrot.slane %v608_v25, %v100_v32 }
   0xa   :  { %v761_v29 = vld [vmem:[%s1024_s1] sm:$0xff]  }
   0xb   :  { %313 = vmatpush1.bf16.msra.mxu1 %v745_v8  ;;  %v762_v33 = vld [vmem:[%s1024_s1 + $0xc0] sm:$0xff]   ;;  %v108_v34 = vrot.slane %v94_v30, %v100_v32  ;;  %v109_v38 = vcombine.high %v101_v35, %v101_v35 }
   0xc   :  { %658 = vmatpush3.bf16.msra.mxu0 %v746_v9  ;;  %314 = vmatprep.subr.bf16.mxu1 %v809_v1 }
   0xd   :  { %659 = vmatprep.subr.bf16.mxu0 %v747_v10  ;;  %300 = vmatprep.mubr.bf16.mxu0 %v108_v34  ;;  %v110_v36 = vcombine.high %v108_v34, %v108_v34 }
   0xf   :  { %315 = vmatpush1.bf16.msra.mxu1 %v748_v11  ;;  %634 = vmatprep.mubr.msk.bf16.mxu1 %vm264_vm0, %v110_v36 }
  0x10   :  { %660 = vmatpush3.bf16.msra.mxu0 %v749_v12  ;;  %316 = vmatprep.subr.bf16.mxu1 %v809_v1 }
  0x11   :  { %661 = vmatprep.subr.bf16.mxu0 %v750_v13 }
  0x13   :  { %317 = vmatpush1.bf16.msra.mxu1 %v751_v14 }
  0x14   :  { %662 = vmatpush3.bf16.msra.mxu0 %v752_v15  ;;  %318 = vmatprep.subr.bf16.mxu1 %v809_v1 }
  0x15   :  { %663 = vmatprep.subr.bf16.mxu0 %v753_v16 }
  0x17   :  { %319 = vmatpush1.bf16.msra.mxu1 %v754_v17 }
  0x18   :  { %664 = vmatpush3.bf16.msra.mxu0 %v755_v18  ;;  %320 = vmatprep.subr.bf16.mxu1 %v809_v1 }
  0x19   :  { %665 = vmatprep.subr.bf16.mxu0 %v756_v20 }
  0x1b   :  { %321 = vmatpush1.bf16.msra.mxu1 %v757_v21 }
  0x1c   :  { %666 = vmatpush3.bf16.msra.mxu0 %v758_v22  ;;  %322 = vmatprep.subr.bf16.mxu1 %v809_v1 }
  0x1d   :  { %667 = vmatprep.subr.bf16.mxu0 %v759_v23 }
  0x1f   :  { %323 = vmatpush1.bf16.msra.mxu1 %v760_v26 }
  0x20   :  { %668 = vmatpush3.bf16.msra.mxu0 %v761_v29  ;;  %338 = vmatprep.subr.bf16.mxu1 %v809_v1 }
  0x21   :  { %693 = vmatprep.subr.bf16.mxu0 %v811_v37 }
  0x23   :  { %301 = vmatmul.mubr.bf16.vlgmr.msra.gmra.mxu0 %v101_v35  ;;  %339 = vmatpush2.bf16.msra.mxu1 %v762_v33 }
  0x24   :  { %713 = vmatprep.subr.bf16.mxu1 %v811_v37 }
  0x25   :  { %12 = vsyncpa [#allocation3], 0  ;;  %v763_v39 = vld [vmem:[%s1026_s3 + $0x38] sm:$0xff]   ;;  %v764_v40 = vld [vmem:[%s1026_s3 + $0x30] sm:$0xff]   ;;  %vm812_vm1 = vmmov 0   ;;  %vm580_vm2 = vcmask 74752  }
  0x26   :  { %341 = vmatmul.mubr.bf16.vlgmr.msra.gmra.mxu1 %v109_v38  ;;  %694 = vmatpush3.bf16.msra.mxu0 %v763_v39  ;;  %v765_v41 = vld [vmem:[%s1026_s3 + $0x28] sm:$0xff]   ;;  %v766_v42 = vld [vmem:[%s1026_s3 + $0x20] sm:$0xff]   ;;  %v767_v43 = vld [vmem:[%s1026_s3 + $0x18] sm:$0xff]  }
  0x27   :  { %695 = vmatprep.subr.bf16.mxu0 %v811_v37  ;;  %v768_v44 = vld [vmem:[%s1026_s3 + $0x10] sm:$0xff]   ;;  %v769_v45 = vld [vmem:[%s1026_s3 + $0x8] sm:$0xff]   ;;  %v770_v46 = vld [vmem:[%s1026_s3] sm:$0xff]   ;;  %709 = vmatprep.mubr.msk.bf16.mxu0 %vm812_vm1, %v811_v37 }
  0x28   :  { %729 = vmatprep.mubr.msk.bf16.mxu1 %vm812_vm1, %v811_v37  ;;  %v771_v47 = vld [vmem:[%s1028_s5 + $0x38] sm:$0xff]   ;;  %v772_v48 = vld [vmem:[%s1028_s5 + $0x30] sm:$0xff]   ;;  %v607_v51 = vld [vmem:[%s1025_s2] ss:$0 sm:$0xff] }
  0x29   :  { %714 = vmatpush3.bf16.msra.mxu1 %v771_v47  ;;  %v773_v2 = vld [vmem:[%s1028_s5 + $0x28] sm:$0xff]   ;;  %v774_v3 = vld [vmem:[%s1028_s5 + $0x20] sm:$0xff]   ;;  %v775_v4 = vld [vmem:[%s1028_s5 + $0x18] sm:$0xff]  }
  0x2a   :  { %696 = vmatpush3.bf16.msra.mxu0 %v764_v40  ;;  %715 = vmatprep.subr.bf16.mxu1 %v811_v37  ;;  %v776_v5 = vld [vmem:[%s1028_s5 + $0x10] sm:$0xff]   ;;  %v777_v6 = vld [vmem:[%s1028_s5 + $0x8] sm:$0xff]   ;;  %v778_v7 = vld [vmem:[%s1028_s5] sm:$0xff]  }
  0x2b   :  { %697 = vmatprep.subr.bf16.mxu0 %v811_v37  ;;  %v635_v8 = vld [vmem:[%s1027_s4] ss:$0 sm:$0xff]  ;;  %s813_s4 = smov [#allocation2]  }
  0x2c   :  { %v644_v19 = vld [vmem:[%s1029_s6] ss:$0 sm:$0xff]  ;;  %s599_s5 = sshll.u32 %s813_s4, 4  ;;  %s600_s5 = int_to_ptr.vmem [resolvable:$true] %s599_s5 }
  0x2d   :  { %716 = vmatpush3.bf16.msra.mxu1 %v772_v48  ;;  %s787_s6 = scalar_lea.vmem %s600_s5, 32  ;;  %p792_p1 = scmp.lt.s32.totalorder %s600_s5, %s600_s5 }
  0x2e   :  { %698 = vmatpush3.bf16.msra.mxu0 %v765_v41  ;;  %717 = vmatprep.subr.bf16.mxu1 %v811_v37  ;;  %p788_p0 = scmp.ne.s32.totalorder %s600_s5, %s787_s6  ;;  %p793_p2 = scmp.lt.s32.totalorder %s787_s6, %s787_s6 }
  0x2f   :  { %699 = vmatprep.subr.bf16.mxu0 %v811_v37 }
  0x30   :  { %p794_p3 = por %p793_p2, %p792_p1 }
  0x31   :  { %718 = vmatpush3.bf16.msra.mxu1 %v773_v2 }
  0x32   :  { %700 = vmatpush3.bf16.msra.mxu0 %v766_v42  ;;  %719 = vmatprep.subr.bf16.mxu1 %v811_v37  ;;  %p795_p4 = pnand %p794_p3, %p788_p0 }
  0x33   :  { %701 = vmatprep.subr.bf16.mxu0 %v811_v37 }
  0x35   :  { %720 = vmatpush3.bf16.msra.mxu1 %v774_v3 }
  0x36   :  { %702 = vmatpush3.bf16.msra.mxu0 %v767_v43  ;;  %721 = vmatprep.subr.bf16.mxu1 %v811_v37 }
  0x37   :  { %703 = vmatprep.subr.bf16.mxu0 %v811_v37 }
  0x39   :  { %722 = vmatpush3.bf16.msra.mxu1 %v775_v4 }
  0x3a   :  { %704 = vmatpush3.bf16.msra.mxu0 %v768_v44  ;;  %723 = vmatprep.subr.bf16.mxu1 %v811_v37 }
  0x3b   :  { %705 = vmatprep.subr.bf16.mxu0 %v811_v37 }
  0x3d   :  { %724 = vmatpush3.bf16.msra.mxu1 %v776_v5 }
  0x3e   :  { %706 = vmatpush3.bf16.msra.mxu0 %v769_v45  ;;  %725 = vmatprep.subr.bf16.mxu1 %v811_v37 }
  0x3f   :  { %707 = vmatprep.subr.bf16.mxu0 %v811_v37 }
  0x41   :  { %726 = vmatpush3.bf16.msra.mxu1 %v777_v6 }
  0x42   :  { %708 = vmatpush3.bf16.msra.mxu0 %v770_v46  ;;  %727 = vmatprep.subr.bf16.mxu1 %v811_v37 }
  0x45   :  { %728 = vmatpush3.bf16.msra.mxu1 %v778_v7 }
  0xe3   :  { %v669_v49 = vpop.f32.mrf.mxu0 }
  0xe5   :  { %v670_v50 = vpop.f32.mrf.mxu0 }
  0xe6   :  { %v671_v52 = vadd.f32 %v670_v50, %v669_v49  ;;  %v342_v53 = vpop.f32.mrf.mxu1 }
  0xe7   :  { %v672_v54 = vpop.f32.mrf.mxu0 }
  0xe8   :  { %v303_v55 = vadd.f32 %v671_v52, %v607_v51  ;;  %v344_v56 = vpop.f32.mrf.mxu1 }
  0xe9   :  { %v673_v57 = vpop.f32.mrf.mxu0 }
  0xea   :  { %v343_v58 = vadd.f32 %v342_v53, %v303_v55  ;;  %v345_v59 = vpop.f32.mrf.mxu1 }
  0xec   :  { %v348_v60 = vmul.f32 0.5, %v343_v58  ;;  %v346_v61 = vpop.f32.mrf.mxu1 }
  0xee   :  { %779 = vtanh.f32 %v348_v60 }
  0xfb   :  { %v780_v62 = vpop.eup %779 }
  0xfc   :  { %v350_v63 = vadd.f32 1.0, %v780_v62 }
  0xfe   :  { %v351_v0 = vmul.f32 0.5, %v350_v63 }
 0x100   :  { %v352_v1 = vpack.c.bf16 %v351_v0, %v351_v0 }
 0x102   :  { %710 = vmatmul.mubr.bf16.vlgmr.msra.gmra.mxu0 %v352_v1 }
 0x1c2   :  { %v458_v9 = vpop.f32.mrf.mxu0 }
 0x1c3   :  { %v459_v10 = vadd.f32 %v635_v8, %v458_v9 }
 0x1c4   :  { %v711_v11 = vpop.f32.mrf.mxu0 }
 0x1c5   :  { %v464_v12 = vmul.f32 0.5, %v459_v10 }
 0x1c6   :  { %v461_v13 = vpop.f32.mrf.mxu0 }
 0x1c7   :  { %781 = vtanh.f32 %v464_v12 }
 0x1c8   :  { %v712_v14 = vpop.f32.mrf.mxu0 }
 0x1d4   :  { %v782_v15 = vpop.eup %781 }
 0x1d5   :  { %v466_v16 = vadd.f32 1.0, %v782_v15 }
 0x1d7   :  { %v467_v17 = vmul.f32 0.5, %v466_v16 }
 0x1d9   :  { %v468_v18 = vpack.c.bf16 %v467_v17, %v467_v17 }
 0x1db   :  { %730 = vmatmul.mubr.bf16.vlgmr.msra.gmra.mxu1 %v468_v18 }
 0x29b   :  { %v574_v20 = vpop.f32.mrf.mxu1 }
 0x29c   :  { %v575_v21 = vadd.f32 %v644_v19, %v574_v20 }
 0x29d   :  { %v731_v22 = vpop.f32.mrf.mxu1 }
 0x29e   :  { %v581_v23 = vsel %vm580_vm2, %v575_v21, -inf }
 0x29f   :  { %582 = vmax.xlane.f32.xlu0 %v581_v23  ;;  %v577_v24 = vpop.f32.mrf.mxu1 }
 0x2a1   :  { %v732_v25 = vpop.f32.mrf.mxu1 }
 0x328   :  { %v583_v26 = vpop.xlane.xlu0 %582 }
 0x329   :  { %v584_v27 = vsub.f32 %v575_v21, %v583_v26 }
 0x32b   :  { %v585_v28 = vmul.f32 1.442695, %v584_v27 }
 0x32d   :  { %783 = vpow2.f32 %v585_v28 }
 0x33a   :  { %v784_v29 = vpop.eup %783 }
 0x33b   :  { %v587_v30 = vsel %vm580_vm2, %v784_v29, 0.0 }
 0x33c   :  { %588 = vadd.xlane.f32.xlu0 %v587_v30 }
 0x3c5   :  { %v589_v31 = vpop.xlane.xlu0 %588 }
 0x3c6   :  { %785 = vrcp.f32 %v589_v31 }
 0x3d3   :  { %v786_v32 = vpop.eup %785 }
 0x3d4   :  { %v591_v33 = vmul.f32 %v786_v32, %v784_v29 }
 0x3d6   :  { %592 = vst.msk [vmem:[#allocation2] sm:$0x3] %vm580_vm2, %v591_v33 }
 0x3d7   :  { %798 = shalt.err (!%p795_p4)
}
 0x3d8   :  { %602 = dma.vmem_to_hbm [thread:$0]  %s600_s5, 32, %s1030_s7, [#allocation3]  }
 0x3d9   :  { %807 = dma.done.wait [#allocation3], 32  }
 0x3da   :  { %808 = vsyncadd [#allocation3], 4294967264 }
 0x3db   :  { %606 = vsyncpa [#allocation3], 1 }

</bundles_post_ra>
